<compile_context>
chip_gen: v7x
topology: tpu7x:2x2x1
jax: 0.10.0
libtpu: 0.0.40
codegen_flags: <defaults>
</compile_context>

<pallas_src>
import functools

import jax
import jax.numpy as jnp
from jax import lax
from jax.experimental import pallas as pl
from jax.experimental.pallas import tpu as pltpu


def _resblock_kernel(x_ref, w1_ref, b1_ref, alpha_ref, w2_ref, b2_ref, mask_ref,
                     o_ref, xp_ref, col_ref, *, H, W, CP, res_scale):
    Wp = W + 1                      # row width incl. one zero pad column
    HWp = H * Wp                    # flattened (width-padded) spatial extent
    base = Wp + 1                   # halo rows above the data region
    P = HWp + 2 * base              # total rows of the shift buffer

    # Zero only the top/bottom halo rows.  The interior (including the per-row
    # pad column) is fully rewritten before every conv, so this is the only
    # state that must be zero -- doing it unconditionally every grid step is
    # cheap (2 x `base` rows) and safe under megacore grid partitioning.
    xp_ref[0:base, :] = jnp.zeros((base, CP), jnp.float32)
    xp_ref[base + HWp:P, :] = jnp.zeros((base, CP), jnp.float32)

    def conv3x3(inp, w_ref, b_ref):
        # Place the input in the interior of the halo-padded buffer.  Pad
        # columns inside `inp` are zero (wrapper for conv1, mask for conv2),
        # so every out-of-image tap below reads a genuine zero.
        xp_ref[base:base + HWp, :] = inp
        # im2col: 9 statically shifted windows packed side by side on lanes.
        for kh in range(3):
            for kw in range(3):
                t = kh * 3 + kw
                start = base + (kh - 1) * Wp + (kw - 1)
                col_ref[:, t * CP:(t + 1) * CP] = xp_ref[start:start + HWp, :]
        # Single long-K MXU matmul: (HWp, 9*CP) x (9*CP, CP).
        return jnp.dot(col_ref[...], w_ref[...],
                       preferred_element_type=jnp.float32) + b_ref[...]

    x = x_ref[0]                    # (HWp, CP), lane-dense
    y = conv3x3(x, w1_ref, b1_ref)
    # PReLU with a single shared parameter (nn.PReLU() default), f32 on the VPU.
    y = jnp.where(y > 0.0, y, alpha_ref[...] * y)
    # Re-zero the per-row pad column before it becomes conv2's padding source.
    y = y * mask_ref[...]
    z = conv3x3(y, w2_ref, b2_ref)

    # Residual add; re-read x from VMEM (cheap) instead of keeping it live.
    o_ref[0] = (z * res_scale + x_ref[0]).astype(o_ref.dtype)


def resblock_forward(x_nchw, params, *, res_scale=1.0):
    w1, b1, alpha, w2, b2 = params
    N, C, H, W = x_nchw.shape
    Wp = W + 1
    HWp = H * Wp
    CP = max(128, ((C + 127) // 128) * 128)   # lane-dense channel padding
    P = HWp + 2 * (Wp + 1)

    # NCHW -> NHWC, pad one zero column per row and pad channels to CP,
    # then flatten spatial dims: (N, HWp, CP) with channels on lanes.
    x_nhwc = jnp.transpose(x_nchw, (0, 2, 3, 1)).astype(jnp.float32)
    x_flat = jnp.pad(x_nhwc, ((0, 0), (0, 0), (0, 1), (0, CP - C))
                     ).reshape(N, HWp, CP)

    def pack_w(w):
        # (kh, kw, cin, cout) -> zero-pad channels -> (9*CP, CP) lane-dense slab,
        # rows ordered (kh, kw, cin) to match the im2col tap/lane layout.
        wp = jnp.pad(jnp.asarray(w, jnp.float32),
                     ((0, 0), (0, 0), (0, CP - C), (0, CP - C)))
        return wp.reshape(9 * CP, CP)

    def pack_b(b):
        return jnp.pad(jnp.asarray(b, jnp.float32).reshape(1, C),
                       ((0, 0), (0, CP - C)))

    w1p, w2p = pack_w(w1), pack_w(w2)
    b1p, b2p = pack_b(b1), pack_b(b2)
    alpha_p = jnp.full((1, CP), alpha, dtype=jnp.float32)

    # Lane-dense valid-column mask over the width-padded flat layout:
    # 1 for real pixels, 0 for the per-row pad column.  Full CP lanes so the
    # kernel loads it with unmasked full-width vld.
    row_mask = (jnp.arange(Wp, dtype=jnp.int32) < W).astype(jnp.float32)   # (Wp,)
    mask = jnp.broadcast_to(row_mask[None, :, None], (H, Wp, CP)).reshape(HWp, CP)

    kernel = functools.partial(_resblock_kernel, H=H, W=W, CP=CP,
                               res_scale=float(res_scale))

    # Rough VMEM footprint: double-buffered x/out blocks, resident weights/bias/
    # alpha/mask, and the two scratch buffers.  Raise the scoped limit only if
    # the 32 MiB default would not fit (cap at 64 MiB = v7x physical VMEM).
    vmem_bytes = 4 * (2 * 2 * HWp * CP                     # x/out, double buffered
                      + 2 * 9 * CP * CP + 2 * CP + HWp * CP  # weights/bias/alpha/mask
                      + P * CP + HWp * 9 * CP)             # scratch
    compiler_kwargs = dict(dimension_semantics=("parallel",))
    if vmem_bytes > (32 << 20):
        compiler_kwargs["vmem_limit_bytes"] = min(int(vmem_bytes * 1.2), 64 << 20)

    out_flat = pl.pallas_call(
        kernel,
        out_shape=jax.ShapeDtypeStruct((N, HWp, CP), jnp.float32),
        grid=(N,),
        in_specs=[
            pl.BlockSpec((1, HWp, CP), lambda n: (n, 0, 0)),     # x
            pl.BlockSpec((9 * CP, CP), lambda n: (0, 0)),        # w1 (im2col slab)
            pl.BlockSpec((1, CP), lambda n: (0, 0)),             # b1
            pl.BlockSpec((1, CP), lambda n: (0, 0)),             # PReLU alpha
            pl.BlockSpec((9 * CP, CP), lambda n: (0, 0)),        # w2 (im2col slab)
            pl.BlockSpec((1, CP), lambda n: (0, 0)),             # b2
            pl.BlockSpec((HWp, CP), lambda n: (0, 0)),           # pad-column mask
        ],
        out_specs=pl.BlockSpec((1, HWp, CP), lambda n: (n, 0, 0)),
        scratch_shapes=[
            pltpu.VMEM((P, CP), jnp.float32),        # halo-padded shift buffer
            pltpu.VMEM((HWp, 9 * CP), jnp.float32),  # im2col slab
        ],
        compiler_params=pltpu.CompilerParams(**compiler_kwargs),
    )(x_flat, w1p, b1p, alpha_p, w2p, b2p, mask)

    # Drop the width pad column and channel padding, back to NCHW.
    out = out_flat.reshape(N, H, Wp, CP)[:, :, :W, :C]
    return jnp.transpose(out, (0, 3, 1, 2))


def resblock_reference(x, params, *, res_scale=1.0):
    """Pure-JAX reference (lax convolutions), matches PyTorch semantics."""
    w1, b1, alpha, w2, b2 = params
    dn = ('NCHW', 'HWIO', 'NCHW')
    y = lax.conv_general_dilated(x, w1, (1, 1), 'SAME', dimension_numbers=dn)
    y = y + b1.reshape(1, -1, 1, 1)
    y = jnp.where(y > 0, y, alpha * y)               # PReLU, shared alpha
    z = lax.conv_general_dilated(y, w2, (1, 1), 'SAME', dimension_numbers=dn)
    z = z + b2.reshape(1, -1, 1, 1)
    return z * res_scale + x


if __name__ == "__main__":
    key = jax.random.PRNGKey(0)
    k1, k2, k3, k4, kx = jax.random.split(key, 5)

    # ResBlock(conv, n_feats=4, kernel_size=3, bias=True, bn=False, act=PReLU())
    N, C, H, W = 2, 4, 16, 16
    w1 = jax.random.normal(k1, (3, 3, C, C), jnp.float32) * 0.1   # (kh, kw, cin, cout)
    b1 = jax.random.normal(k2, (C,), jnp.float32) * 0.1
    w2 = jax.random.normal(k3, (3, 3, C, C), jnp.float32) * 0.1
    b2 = jax.random.normal(k4, (C,), jnp.float32) * 0.1
    alpha = 0.25                                                  # nn.PReLU() default
    res_scale = 1.0                                               # ResBlock default

    x = jax.random.normal(kx, (N, C, H, W), jnp.float32)
    params = (w1, b1, alpha, w2, b2)

    out = resblock_forward(x, params, res_scale=res_scale)
    out = jax.block_until_ready(out)

    ref = resblock_reference(x, params, res_scale=res_scale)
    assert out.shape == x.shape and out.dtype == jnp.float32
    max_err = float(jnp.max(jnp.abs(out - ref)))
    assert jnp.allclose(out, ref, rtol=1e-4, atol=1e-4), max_err

    print("KERNEL_OK")
</pallas_src>

<mosaic_0001>
module attributes {stable_mosaic.version = 11 : i64} {
  func.func @_resblock_kernel(%arg0: i32, %arg1: memref<1x272x128xf32, #tpu.memory_space<vmem>>, %arg2: memref<1152x128xf32, #tpu.memory_space<vmem>>, %arg3: memref<1x128xf32, #tpu.memory_space<vmem>>, %arg4: memref<1x128xf32, #tpu.memory_space<vmem>>, %arg5: memref<1152x128xf32, #tpu.memory_space<vmem>>, %arg6: memref<1x128xf32, #tpu.memory_space<vmem>>, %arg7: memref<272x128xf32, #tpu.memory_space<vmem>>, %arg8: memref<1x272x128xf32, #tpu.memory_space<vmem>>, %arg9: memref<308x128xf32, #tpu.memory_space<vmem>>, %arg10: memref<272x1152xf32, #tpu.memory_space<vmem>>) attributes {dimension_semantics = [#tpu.dimension_semantics<parallel>], iteration_bounds = array<i64: 2>, scalar_prefetch = 0 : i64, scratch_operands = 2 : i64, tpu.core_type = #tpu.core_type<tc>, window_params = [{transform_indices = @transform_0, window_bounds = array<i64: 1, 272, 128>}, {pipeline_mode = #tpu.pipeline_mode<synchronous>, transform_indices = @transform_1, window_bounds = array<i64: 1152, 128>}, {pipeline_mode = #tpu.pipeline_mode<synchronous>, transform_indices = @transform_2, window_bounds = array<i64: 1, 128>}, {pipeline_mode = #tpu.pipeline_mode<synchronous>, transform_indices = @transform_3, window_bounds = array<i64: 1, 128>}, {pipeline_mode = #tpu.pipeline_mode<synchronous>, transform_indices = @transform_4, window_bounds = array<i64: 1152, 128>}, {pipeline_mode = #tpu.pipeline_mode<synchronous>, transform_indices = @transform_5, window_bounds = array<i64: 1, 128>}, {pipeline_mode = #tpu.pipeline_mode<synchronous>, transform_indices = @transform_6, window_bounds = array<i64: 272, 128>}, {transform_indices = @transform_7, window_bounds = array<i64: 1, 272, 128>}]} {
    %cst = arith.constant 0.000000e+00 : f32
    %0 = vector.broadcast %cst : f32 to vector<18x128xf32>
    %c0 = arith.constant 0 : index
    %c0_0 = arith.constant 0 : index
    %1 = vector.load %arg9[%c0, %c0_0] : memref<308x128xf32, #tpu.memory_space<vmem>>, vector<18x128xf32>
    tpu.vector_store %arg9[%c0, %c0_0], %0 {strides = array<i32>} : memref<308x128xf32, #tpu.memory_space<vmem>>, vector<18x128xf32>,
    %cst_1 = arith.constant 0.000000e+00 : f32
    %2 = vector.broadcast %cst_1 : f32 to vector<18x128xf32>
    %c290 = arith.constant 290 : index
    %c0_2 = arith.constant 0 : index
    %3 = vector.load %arg9[%c290, %c0_2] : memref<308x128xf32, #tpu.memory_space<vmem>>, vector<18x128xf32>
    tpu.vector_store %arg9[%c290, %c0_2], %2 {strides = array<i32>} : memref<308x128xf32, #tpu.memory_space<vmem>>, vector<18x128xf32>,
    %c0_3 = arith.constant 0 : index
    %c0_4 = arith.constant 0 : index
    %c0_5 = arith.constant 0 : index
    %4 = vector.load %arg1[%c0_3, %c0_4, %c0_5] : memref<1x272x128xf32, #tpu.memory_space<vmem>>, vector<1x272x128xf32>
    %5 = vector.shape_cast %4 : vector<1x272x128xf32> to vector<272x128xf32>
    %c18 = arith.constant 18 : index
    %c0_6 = arith.constant 0 : index
    %6 = vector.load %arg9[%c18, %c0_6] : memref<308x128xf32, #tpu.memory_space<vmem>>, vector<272x128xf32>
    tpu.vector_store %arg9[%c18, %c0_6], %5 {strides = array<i32>} : memref<308x128xf32, #tpu.memory_space<vmem>>, vector<272x128xf32>,
    %c0_7 = arith.constant 0 : index
    %c0_8 = arith.constant 0 : index
    %7 = vector.load %arg9[%c0_7, %c0_8] : memref<308x128xf32, #tpu.memory_space<vmem>>, vector<272x128xf32>
    %c0_9 = arith.constant 0 : index
    %c0_10 = arith.constant 0 : index
    %8 = vector.load %arg10[%c0_9, %c0_10] : memref<272x1152xf32, #tpu.memory_space<vmem>>, vector<272x128xf32>
    tpu.vector_store %arg10[%c0_9, %c0_10], %7 {strides = array<i32>} : memref<272x1152xf32, #tpu.memory_space<vmem>>, vector<272x128xf32>,
    %c1 = arith.constant 1 : index
    %c0_11 = arith.constant 0 : index
    %9 = vector.load %arg9[%c1, %c0_11] : memref<308x128xf32, #tpu.memory_space<vmem>>, vector<272x128xf32>
    %c0_12 = arith.constant 0 : index
    %c128 = arith.constant 128 : index
    %10 = vector.load %arg10[%c0_12, %c128] : memref<272x1152xf32, #tpu.memory_space<vmem>>, vector<272x128xf32>
    tpu.vector_store %arg10[%c0_12, %c128], %9 {strides = array<i32>} : memref<272x1152xf32, #tpu.memory_space<vmem>>, vector<272x128xf32>,
    %c2 = arith.constant 2 : index
    %c0_13 = arith.constant 0 : index
    %11 = vector.load %arg9[%c2, %c0_13] : memref<308x128xf32, #tpu.memory_space<vmem>>, vector<272x128xf32>
    %c0_14 = arith.constant 0 : index
    %c256 = arith.constant 256 : index
    %12 = vector.load %arg10[%c0_14, %c256] : memref<272x1152xf32, #tpu.memory_space<vmem>>, vector<272x128xf32>
    tpu.vector_store %arg10[%c0_14, %c256], %11 {strides = array<i32>} : memref<272x1152xf32, #tpu.memory_space<vmem>>, vector<272x128xf32>,
    %c17 = arith.constant 17 : index
    %c0_15 = arith.constant 0 : index
    %13 = vector.load %arg9[%c17, %c0_15] : memref<308x128xf32, #tpu.memory_space<vmem>>, vector<272x128xf32>
    %c0_16 = arith.constant 0 : index
    %c384 = arith.constant 384 : index
    %14 = vector.load %arg10[%c0_16, %c384] : memref<272x1152xf32, #tpu.memory_space<vmem>>, vector<272x128xf32>
    tpu.vector_store %arg10[%c0_16, %c384], %13 {strides = array<i32>} : memref<272x1152xf32, #tpu.memory_space<vmem>>, vector<272x128xf32>,
    %c18_17 = arith.constant 18 : index
    %c0_18 = arith.constant 0 : index
    %15 = vector.load %arg9[%c18_17, %c0_18] : memref<308x128xf32, #tpu.memory_space<vmem>>, vector<272x128xf32>
    %c0_19 = arith.constant 0 : index
    %c512 = arith.constant 512 : index
    %16 = vector.load %arg10[%c0_19, %c512] : memref<272x1152xf32, #tpu.memory_space<vmem>>, vector<272x128xf32>
    tpu.vector_store %arg10[%c0_19, %c512], %15 {strides = array<i32>} : memref<272x1152xf32, #tpu.memory_space<vmem>>, vector<272x128xf32>,
    %c19 = arith.constant 19 : index
    %c0_20 = arith.constant 0 : index
    %17 = vector.load %arg9[%c19, %c0_20] : memref<308x128xf32, #tpu.memory_space<vmem>>, vector<272x128xf32>
    %c0_21 = arith.constant 0 : index
    %c640 = arith.constant 640 : index
    %18 = vector.load %arg10[%c0_21, %c640] : memref<272x1152xf32, #tpu.memory_space<vmem>>, vector<272x128xf32>
    tpu.vector_store %arg10[%c0_21, %c640], %17 {strides = array<i32>} : memref<272x1152xf32, #tpu.memory_space<vmem>>, vector<272x128xf32>,
    %c34 = arith.constant 34 : index
    %c0_22 = arith.constant 0 : index
    %19 = vector.load %arg9[%c34, %c0_22] : memref<308x128xf32, #tpu.memory_space<vmem>>, vector<272x128xf32>
    %c0_23 = arith.constant 0 : index
    %c768 = arith.constant 768 : index
    %20 = vector.load %arg10[%c0_23, %c768] : memref<272x1152xf32, #tpu.memory_space<vmem>>, vector<272x128xf32>
    tpu.vector_store %arg10[%c0_23, %c768], %19 {strides = array<i32>} : memref<272x1152xf32, #tpu.memory_space<vmem>>, vector<272x128xf32>,
    %c35 = arith.constant 35 : index
    %c0_24 = arith.constant 0 : index
    %21 = vector.load %arg9[%c35, %c0_24] : memref<308x128xf32, #tpu.memory_space<vmem>>, vector<272x128xf32>
    %c0_25 = arith.constant 0 : index
    %c896 = arith.constant 896 : index
    %22 = vector.load %arg10[%c0_25, %c896] : memref<272x1152xf32, #tpu.memory_space<vmem>>, vector<272x128xf32>
    tpu.vector_store %arg10[%c0_25, %c896], %21 {strides = array<i32>} : memref<272x1152xf32, #tpu.memory_space<vmem>>, vector<272x128xf32>,
    %c36 = arith.constant 36 : index
    %c0_26 = arith.constant 0 : index
    %23 = vector.load %arg9[%c36, %c0_26] : memref<308x128xf32, #tpu.memory_space<vmem>>, vector<272x128xf32>
    %c0_27 = arith.constant 0 : index
    %c1024 = arith.constant 1024 : index
    %24 = vector.load %arg10[%c0_27, %c1024] : memref<272x1152xf32, #tpu.memory_space<vmem>>, vector<272x128xf32>
    tpu.vector_store %arg10[%c0_27, %c1024], %23 {strides = array<i32>} : memref<272x1152xf32, #tpu.memory_space<vmem>>, vector<272x128xf32>,
    %c0_28 = arith.constant 0 : index
    %c0_29 = arith.constant 0 : index
    %25 = vector.load %arg10[%c0_28, %c0_29] : memref<272x1152xf32, #tpu.memory_space<vmem>>, vector<272x1152xf32>
    %c0_30 = arith.constant 0 : index
    %c0_31 = arith.constant 0 : index
    %26 = vector.load %arg2[%c0_30, %c0_31] : memref<1152x128xf32, #tpu.memory_space<vmem>>, vector<1152x128xf32>
    %cst_32 = arith.constant dense<0.000000e+00> : vector<272x128xf32>
    %27 = tpu.matmul %25, %26, %cst_32 {dimension_numbers = #tpu.dot_dimension_numbers<[1], [0], [0], [1], [0, 0, 1, 1], [], []>} : vector<272x1152xf32>, vector<1152x128xf32>, vector<272x128xf32> -> vector<272x128xf32>
    %c0_33 = arith.constant 0 : index
    %c0_34 = arith.constant 0 : index
    %28 = vector.load %arg3[%c0_33, %c0_34] : memref<1x128xf32, #tpu.memory_space<vmem>>, vector<1x128xf32>
    %29 = vector.broadcast %28 : vector<1x128xf32> to vector<272x128xf32>
    %30 = arith.addf %27, %29 : vector<272x128xf32>
    %cst_35 = arith.constant 0.000000e+00 : f32
    %31 = vector.broadcast %cst_35 : f32 to vector<272x128xf32>
    %32 = arith.cmpf ogt, %30, %31 : vector<272x128xf32>
    %c0_36 = arith.constant 0 : index
    %c0_37 = arith.constant 0 : index
    %33 = vector.load %arg4[%c0_36, %c0_37] : memref<1x128xf32, #tpu.memory_space<vmem>>, vector<1x128xf32>
    %34 = vector.broadcast %33 : vector<1x128xf32> to vector<272x128xf32>
    %35 = arith.mulf %34, %30 : vector<272x128xf32>
    %36 = arith.select %32, %30, %35 : vector<272x128xi1>, vector<272x128xf32>
    %c0_38 = arith.constant 0 : index
    %c0_39 = arith.constant 0 : index
    %37 = vector.load %arg7[%c0_38, %c0_39] : memref<272x128xf32, #tpu.memory_space<vmem>>, vector<272x128xf32>
    %38 = arith.mulf %36, %37 : vector<272x128xf32>
    %c18_40 = arith.constant 18 : index
    %c0_41 = arith.constant 0 : index
    %39 = vector.load %arg9[%c18_40, %c0_41] : memref<308x128xf32, #tpu.memory_space<vmem>>, vector<272x128xf32>
    tpu.vector_store %arg9[%c18_40, %c0_41], %38 {strides = array<i32>} : memref<308x128xf32, #tpu.memory_space<vmem>>, vector<272x128xf32>,
    %c0_42 = arith.constant 0 : index
    %c0_43 = arith.constant 0 : index
    %40 = vector.load %arg9[%c0_42, %c0_43] : memref<308x128xf32, #tpu.memory_space<vmem>>, vector<272x128xf32>
    %c0_44 = arith.constant 0 : index
    %c0_45 = arith.constant 0 : index
    %41 = vector.load %arg10[%c0_44, %c0_45] : memref<272x1152xf32, #tpu.memory_space<vmem>>, vector<272x128xf32>
    tpu.vector_store %arg10[%c0_44, %c0_45], %40 {strides = array<i32>} : memref<272x1152xf32, #tpu.memory_space<vmem>>, vector<272x128xf32>,
    %c1_46 = arith.constant 1 : index
    %c0_47 = arith.constant 0 : index
    %42 = vector.load %arg9[%c1_46, %c0_47] : memref<308x128xf32, #tpu.memory_space<vmem>>, vector<272x128xf32>
    %c0_48 = arith.constant 0 : index
    %c128_49 = arith.constant 128 : index
    %43 = vector.load %arg10[%c0_48, %c128_49] : memref<272x1152xf32, #tpu.memory_space<vmem>>, vector<272x128xf32>
    tpu.vector_store %arg10[%c0_48, %c128_49], %42 {strides = array<i32>} : memref<272x1152xf32, #tpu.memory_space<vmem>>, vector<272x128xf32>,
    %c2_50 = arith.constant 2 : index
    %c0_51 = arith.constant 0 : index
    %44 = vector.load %arg9[%c2_50, %c0_51] : memref<308x128xf32, #tpu.memory_space<vmem>>, vector<272x128xf32>
    %c0_52 = arith.constant 0 : index
    %c256_53 = arith.constant 256 : index
    %45 = vector.load %arg10[%c0_52, %c256_53] : memref<272x1152xf32, #tpu.memory_space<vmem>>, vector<272x128xf32>
    tpu.vector_store %arg10[%c0_52, %c256_53], %44 {strides = array<i32>} : memref<272x1152xf32, #tpu.memory_space<vmem>>, vector<272x128xf32>,
    %c17_54 = arith.constant 17 : index
    %c0_55 = arith.constant 0 : index
    %46 = vector.load %arg9[%c17_54, %c0_55] : memref<308x128xf32, #tpu.memory_space<vmem>>, vector<272x128xf32>
    %c0_56 = arith.constant 0 : index
    %c384_57 = arith.constant 384 : index
    %47 = vector.load %arg10[%c0_56, %c384_57] : memref<272x1152xf32, #tpu.memory_space<vmem>>, vector<272x128xf32>
    tpu.vector_store %arg10[%c0_56, %c384_57], %46 {strides = array<i32>} : memref<272x1152xf32, #tpu.memory_space<vmem>>, vector<272x128xf32>,
    %c18_58 = arith.constant 18 : index
    %c0_59 = arith.constant 0 : index
    %48 = vector.load %arg9[%c18_58, %c0_59] : memref<308x128xf32, #tpu.memory_space<vmem>>, vector<272x128xf32>
    %c0_60 = arith.constant 0 : index
    %c512_61 = arith.constant 512 : index
    %49 = vector.load %arg10[%c0_60, %c512_61] : memref<272x1152xf32, #tpu.memory_space<vmem>>, vector<272x128xf32>
    tpu.vector_store %arg10[%c0_60, %c512_61], %48 {strides = array<i32>} : memref<272x1152xf32, #tpu.memory_space<vmem>>, vector<272x128xf32>,
    %c19_62 = arith.constant 19 : index
    %c0_63 = arith.constant 0 : index
    %50 = vector.load %arg9[%c19_62, %c0_63] : memref<308x128xf32, #tpu.memory_space<vmem>>, vector<272x128xf32>
    %c0_64 = arith.constant 0 : index
    %c640_65 = arith.constant 640 : index
    %51 = vector.load %arg10[%c0_64, %c640_65] : memref<272x1152xf32, #tpu.memory_space<vmem>>, vector<272x128xf32>
    tpu.vector_store %arg10[%c0_64, %c640_65], %50 {strides = array<i32>} : memref<272x1152xf32, #tpu.memory_space<vmem>>, vector<272x128xf32>,
    %c34_66 = arith.constant 34 : index
    %c0_67 = arith.constant 0 : index
    %52 = vector.load %arg9[%c34_66, %c0_67] : memref<308x128xf32, #tpu.memory_space<vmem>>, vector<272x128xf32>
    %c0_68 = arith.constant 0 : index
    %c768_69 = arith.constant 768 : index
    %53 = vector.load %arg10[%c0_68, %c768_69] : memref<272x1152xf32, #tpu.memory_space<vmem>>, vector<272x128xf32>
    tpu.vector_store %arg10[%c0_68, %c768_69], %52 {strides = array<i32>} : memref<272x1152xf32, #tpu.memory_space<vmem>>, vector<272x128xf32>,
    %c35_70 = arith.constant 35 : index
    %c0_71 = arith.constant 0 : index
    %54 = vector.load %arg9[%c35_70, %c0_71] : memref<308x128xf32, #tpu.memory_space<vmem>>, vector<272x128xf32>
    %c0_72 = arith.constant 0 : index
    %c896_73 = arith.constant 896 : index
    %55 = vector.load %arg10[%c0_72, %c896_73] : memref<272x1152xf32, #tpu.memory_space<vmem>>, vector<272x128xf32>
    tpu.vector_store %arg10[%c0_72, %c896_73], %54 {strides = array<i32>} : memref<272x1152xf32, #tpu.memory_space<vmem>>, vector<272x128xf32>,
    %c36_74 = arith.constant 36 : index
    %c0_75 = arith.constant 0 : index
    %56 = vector.load %arg9[%c36_74, %c0_75] : memref<308x128xf32, #tpu.memory_space<vmem>>, vector<272x128xf32>
    %c0_76 = arith.constant 0 : index
    %c1024_77 = arith.constant 1024 : index
    %57 = vector.load %arg10[%c0_76, %c1024_77] : memref<272x1152xf32, #tpu.memory_space<vmem>>, vector<272x128xf32>
    tpu.vector_store %arg10[%c0_76, %c1024_77], %56 {strides = array<i32>} : memref<272x1152xf32, #tpu.memory_space<vmem>>, vector<272x128xf32>,
    %c0_78 = arith.constant 0 : index
    %c0_79 = arith.constant 0 : index
    %58 = vector.load %arg10[%c0_78, %c0_79] : memref<272x1152xf32, #tpu.memory_space<vmem>>, vector<272x1152xf32>
    %c0_80 = arith.constant 0 : index
    %c0_81 = arith.constant 0 : index
    %59 = vector.load %arg5[%c0_80, %c0_81] : memref<1152x128xf32, #tpu.memory_space<vmem>>, vector<1152x128xf32>
    %cst_82 = arith.constant dense<0.000000e+00> : vector<272x128xf32>
    %60 = tpu.matmul %58, %59, %cst_82 {dimension_numbers = #tpu.dot_dimension_numbers<[1], [0], [0], [1], [0, 0, 1, 1], [], []>} : vector<272x1152xf32>, vector<1152x128xf32>, vector<272x128xf32> -> vector<272x128xf32>
    %c0_83 = arith.constant 0 : index
    %c0_84 = arith.constant 0 : index
    %61 = vector.load %arg6[%c0_83, %c0_84] : memref<1x128xf32, #tpu.memory_space<vmem>>, vector<1x128xf32>
    %62 = vector.broadcast %61 : vector<1x128xf32> to vector<272x128xf32>
    %63 = arith.addf %60, %62 : vector<272x128xf32>
    %cst_85 = arith.constant 1.000000e+00 : f32
    %64 = vector.broadcast %cst_85 : f32 to vector<272x128xf32>
    %65 = arith.mulf %63, %64 : vector<272x128xf32>
    %c0_86 = arith.constant 0 : index
    %c0_87 = arith.constant 0 : index
    %c0_88 = arith.constant 0 : index
    %66 = vector.load %arg1[%c0_86, %c0_87, %c0_88] : memref<1x272x128xf32, #tpu.memory_space<vmem>>, vector<1x272x128xf32>
    %67 = vector.shape_cast %66 : vector<1x272x128xf32> to vector<272x128xf32>
    %68 = arith.addf %65, %67 : vector<272x128xf32>
    %c0_89 = arith.constant 0 : index
    %c0_90 = arith.constant 0 : index
    %c0_91 = arith.constant 0 : index
    %69 = vector.load %arg8[%c0_89, %c0_90, %c0_91] : memref<1x272x128xf32, #tpu.memory_space<vmem>>, vector<1x272x128xf32>
    %70 = vector.shape_cast %69 : vector<1x272x128xf32> to vector<272x128xf32>
    %71 = vector.shape_cast %68 : vector<272x128xf32> to vector<1x272x128xf32>
    tpu.vector_store %arg8[%c0_89, %c0_90, %c0_91], %71 {strides = array<i32>} : memref<1x272x128xf32, #tpu.memory_space<vmem>>, vector<1x272x128xf32>,
    return
  }
  func.func @transform_0(%arg0: i32) -> (i32, i32, i32) {
    %c0_i32 = arith.constant 0 : i32
    %c0_i32_0 = arith.constant 0 : i32
    %c0_i32_1 = arith.constant 0 : i32
    return %arg0, %c0_i32, %c0_i32_0 : i32, i32, i32
  }
  func.func @transform_1(%arg0: i32) -> (i32, i32) {
    %c0_i32 = arith.constant 0 : i32
    %c0_i32_0 = arith.constant 0 : i32
    %c0_i32_1 = arith.constant 0 : i32
    return %c0_i32, %c0_i32_0 : i32, i32
  }
  func.func @transform_2(%arg0: i32) -> (i32, i32) {
    %c0_i32 = arith.constant 0 : i32
    %c0_i32_0 = arith.constant 0 : i32
    %c0_i32_1 = arith.constant 0 : i32
    return %c0_i32, %c0_i32_0 : i32, i32
  }
  func.func @transform_3(%arg0: i32) -> (i32, i32) {
    %c0_i32 = arith.constant 0 : i32
    %c0_i32_0 = arith.constant 0 : i32
    %c0_i32_1 = arith.constant 0 : i32
    return %c0_i32, %c0_i32_0 : i32, i32
  }
  func.func @transform_4(%arg0: i32) -> (i32, i32) {
    %c0_i32 = arith.constant 0 : i32
    %c0_i32_0 = arith.constant 0 : i32
    %c0_i32_1 = arith.constant 0 : i32
    return %c0_i32, %c0_i32_0 : i32, i32
  }
  func.func @transform_5(%arg0: i32) -> (i32, i32) {
    %c0_i32 = arith.constant 0 : i32
    %c0_i32_0 = arith.constant 0 : i32
    %c0_i32_1 = arith.constant 0 : i32
    return %c0_i32, %c0_i32_0 : i32, i32
  }
  func.func @transform_6(%arg0: i32) -> (i32, i32) {
    %c0_i32 = arith.constant 0 : i32
    %c0_i32_0 = arith.constant 0 : i32
    %c0_i32_1 = arith.constant 0 : i32
    return %c0_i32, %c0_i32_0 : i32, i32
  }
  func.func @transform_7(%arg0: i32) -> (i32, i32, i32) {
    %c0_i32 = arith.constant 0 : i32
    %c0_i32_0 = arith.constant 0 : i32
    %c0_i32_1 = arith.constant 0 : i32
    return %arg0, %c0_i32, %c0_i32_0 : i32, i32, i32
  }
}

</mosaic_0001>

<bundles_post_ra>
// kernel: tpu_custom_call.1
= control target key start
LH: loop header
LB: loop body
LE: loop exit
PB: predicated region body
PF: predicated region fallthrough
CT: control target
= control target key end

     0   :  { %12 = vsyncpa [#allocation5], 0  ;;  %s8638_s0 = inlined_call_operand.hbm [shape: f32[2,272,128], index: 0, kind: input, shape index: {}]   ;;  %s8639_s1 = inlined_call_operand.hbm [shape: f32[1152,128], index: 1, kind: input, shape index: {}]   ;;  %s8640_s2 = inlined_call_operand.vmem [shape: f32[1,128], index: 2, kind: input, shape index: {}]   ;;  %s8641_s3 = inlined_call_operand.vmem [shape: f32[1,128], index: 3, kind: input, shape index: {}]   ;;  %s8642_s4 = inlined_call_operand.hbm [shape: f32[1152,128], index: 4, kind: input, shape index: {}]   ;;  %s8643_s5 = inlined_call_operand.vmem [shape: f32[1,128], index: 5, kind: input, shape index: {}]   ;;  %s8644_s6 = inlined_call_operand.hbm [shape: f32[272,128], index: 6, kind: input, shape index: {}]   ;;  %s8645_s7 = inlined_call_operand.hbm [shape: f32[2,272,128], index: 7, kind: output, shape index: {}]  }
   0x1   :  { %14 = vsyncpa [#allocation5 + $0x1], 0 }
   0x2   :  { %15 = vsyncpa [#allocation8], 0 }
   0x3   :  { %16 = vsyncpa [#allocation11], 0 }
   0x4   :  { %17 = vsyncpa [#allocation6], 0 }
   0x5   :  { %19 = vsyncpa [#allocation6 + $0x1], 0  ;;  %s6921_s24 = smov 0   ;;  %s6923_s25 = smov 0  }
   0x6   :  { %s6925_s26 = smov 0   ;;  %s6927_s27 = smov 0  }
   0x7 LB: > { %s6942_s28 = sadd.s32 4294967295, %s6868_s27   ;;  %s5332_s29 = sadd.s32 4294967294, %s6868_s27   ;;  %s6868_s27 = sphi %s6927_s27, %s8803_s27   ;;  %s6864_s26 = sphi %s6925_s26, %s8802_s26   ;;  %s6860_s25 = sphi %s6923_s25, %s8801_s25   ;;  %s6856_s24 = sphi %s6921_s24, %s8800_s24  }
   0x8   : > { %p45_p0 = scmp.ne.s32.totalorder %s6860_s25, %s6856_s24  ;;  %p8646_p1 = scmp.eq.s32.totalorder %s6942_s28, 0 }
   0x9   : > { %p201_p3 = scmp.eq.s32.totalorder %s5332_s29, 1  ;;  %p5333_p5 = scmp.ge.s32.totalorder %s6868_s27, 1 }
   0xa   : > { %p6951_p4 = por %p8646_p1, %p45_p0  ;;  %p208_p7 = scmp.lt.s32.totalorder %s6868_s27, 3 }
   0xb   : > { %p6956_p6 = por %p201_p3, %p45_p0  ;;  %s6870_s10 = smov [#allocation7]  }
   0xc   : > { %s8683_s30 = scalar_select %p6951_p4, 1, 0 }
   0xd   : > { %s8684_s8 = scalar_select %p6956_p6, 1, 0 }
   0xe   : > { %p6961_p8 = pnand %p5333_p5, %p208_p7  ;;  %s220_s11 = sshll.u32 %s6870_s10, 4  ;;  %s6965_s11 = int_to_ptr.vmem [resolvable:$true] %s220_s11 }
   0xf   : > { %8685 = sst [smem:[#allocation17_spill]] %s8684_s8  ;;  %s6871_s13 = smov [#allocation9]  }
  0x10   : > { %s8686_s9 = scalar_select %p6961_p8, 1, 0 }
  0x11   : > { %p6575_p9 = pneg %p6961_p8  ;;  %s239_s14 = sshll.u32 %s6871_s13, 4  ;;  %s6976_s14 = int_to_ptr.vmem [resolvable:$true] %s239_s14 }
  0x12   : > { %s6872_s15 = smov [#allocation10]   ;;  %s6680_s19 = scalar_lea.hbm %s8639_s1, 18432 }
  0x13   : > { %p6972_p11 = pnand %p6575_p9, %p8646_p1  ;;  %s6978_s16 = sshll.u32 %s6872_s15, 4  ;;  %s256_s16 = int_to_ptr.vmem [resolvable:$true] %s6978_s16 }
  0x14   : > { %p6681_p12 = scmp.ne.s32.totalorder %s8639_s1, %s6680_s19  ;;  %p6687_p5 = scmp.lt.u32.totalorder %s6680_s19, %s8639_s1 }
  0x15   : > { %p6988_p13 = pneg %p6972_p11 }
  0x17   : > { %p6683_p0 = pnand %p6988_p13, %p6681_p12 }
  0x19   : > { %p6684_p3 = pneg %p6683_p0 }
  0x1b   : > { %p6689_p7 = pnand %p6687_p5, %p6684_p3 }
  0x1d   : > { %6692 = shalt.err (!%p6689_p7)
}
  0x1e   : > { %s6693_s10 = scalar_lea.vmem %s6965_s11, 18432  ;;  %p6701_p2 = scmp.lt.s32.totalorder %s6965_s11, %s6965_s11 }
  0x1f   : > { %p6694_p9 = scmp.ne.s32.totalorder %s6965_s11, %s6693_s10  ;;  %p6702_p6 = scmp.lt.s32.totalorder %s6693_s10, %s6693_s10 }
  0x21   : > { %p6696_p10 = pnand %p6694_p9, %p6988_p13  ;;  %p6703_p12 = por %p6702_p6, %p6701_p2 }
  0x23   : > { %p6697_p1 = pneg %p6696_p10 }
  0x25   : > { %p6704_p0 = pnand %p6703_p12, %p6697_p1 }
  0x27   : > { %6707 = shalt.err (!%p6704_p0)
}
  0x28   : > { %s8650_s13 = smov 128   ;;  %s8651_s15 = smov 8  }
  0x29   : > { %6578 = dma.hbm_to_vmem [thread:$0]  (!%p6972_p11), %s8639_s1, 18432, %s6965_s11, [#allocation8], %s8650_s13, %s8650_s13, %s8651_s15  }
  0x2a   : > { %s6708_s21 = scalar_lea.hbm %s8642_s4, 18432 }
  0x2b   : > { %p6709_p1 = scmp.ne.s32.totalorder %s8642_s4, %s6708_s21  ;;  %p6715_p10 = scmp.lt.u32.totalorder %s6708_s21, %s8642_s4 }
  0x2d   : > { %p6711_p2 = pnand %p6709_p1, %p6988_p13 }
  0x2f   : > { %p6712_p6 = pneg %p6711_p2 }
  0x31   : > { %p6717_p3 = pnand %p6715_p10, %p6712_p6 }
  0x33   : > { %6720 = shalt.err (!%p6717_p3)
}
  0x34   : > { %s6721_s11 = scalar_lea.vmem %s6976_s14, 18432  ;;  %p6729_p12 = scmp.lt.s32.totalorder %s6976_s14, %s6976_s14 }
  0x35   : > { %p6722_p5 = scmp.ne.s32.totalorder %s6976_s14, %s6721_s11  ;;  %p6730_p0 = scmp.lt.s32.totalorder %s6721_s11, %s6721_s11 }
  0x37   : > { %p6724_p7 = pnand %p6722_p5, %p6988_p13  ;;  %p6731_p1 = por %p6730_p0, %p6729_p12 }
  0x39   : > { %p6725_p9 = pneg %p6724_p7 }
  0x3b   : > { %p6732_p2 = pnand %p6731_p1, %p6725_p9 }
  0x3d   : > { %6735 = shalt.err (!%p6732_p2)
}
  0x3e   : > { %6581 = dma.hbm_to_vmem [thread:$0]  (!%p6972_p11), %s8642_s4, 18432, %s6976_s14, [#allocation8], %s8650_s13, %s8650_s13, %s8651_s15  }
  0x3f   : > { %s6736_s20 = scalar_lea.hbm %s8644_s6, 4352 }
  0x40   : > { %p6737_p6 = scmp.ne.s32.totalorder %s8644_s6, %s6736_s20  ;;  %p6743_p5 = scmp.lt.u32.totalorder %s6736_s20, %s8644_s6 }
  0x42   : > { %p6739_p10 = pnand %p6737_p6, %p6988_p13 }
  0x44   : > { %p6740_p3 = pneg %p6739_p10 }
  0x46   : > { %p6745_p7 = pnand %p6743_p5, %p6740_p3 }
  0x48   : > { %6748 = shalt.err (!%p6745_p7)
}
  0x49   : > { %s6749_s11 = scalar_lea.vmem %s256_s16, 4352  ;;  %p6757_p1 = scmp.lt.s32.totalorder %s256_s16, %s256_s16 }
  0x4a   : > { %p6750_p9 = scmp.ne.s32.totalorder %s256_s16, %s6749_s11  ;;  %p6758_p2 = scmp.lt.s32.totalorder %s6749_s11, %s6749_s11 }
  0x4c   : > { %p6752_p12 = pnand %p6750_p9, %p6988_p13  ;;  %p6759_p4 = por %p6758_p2, %p6757_p1 }
  0x4e   : > { %p6753_p0 = pneg %p6752_p12 }
  0x50   : > { %p6760_p8 = pnand %p6759_p4, %p6753_p0 }
  0x52   : > { %6763 = shalt.err (!%p6760_p8)
}
  0x53   : > { %6584 = dma.hbm_to_vmem [thread:$0]  (!%p6972_p11), %s8644_s6, 4352, %s256_s16, [#allocation11], %s8650_s13, %s8650_s13, %s8651_s15  }
  0x54   : > { %s7061_s22 = sadd.s32 1, %s6868_s27   ;;  %s32_s17 = sadd.s32 1, %s6864_s26 }
  0x55   : > { %s29_s12 = ssub.s32 %s6868_s27, %s7061_s22  ;;  %p39_p8 = scmp.ne.s32.totalorder %s6864_s26, %s6860_s25 }
  0x56   : > { %p30_p4 = scmp.eq.s32.totalorder %s29_s12, 0  ;;  %p40_p13 = scmp.eq.s32.totalorder %s6868_s27, 0 }
  0x57   : > { %p6596_p6 = scmp.lt.s32.totalorder %s6868_s27, 2  ;;  %p8689_p3 = scmp.eq.s32.totalorder %s6942_s28, 1 }
  0x58   : > { %s7071_s18 = scalar_select %p30_p4, %s6864_s26, %s32_s17  }
  0x59   : > { %p41_p10 = por %p40_p13, %p39_p8  ;;  %p7075_p5 = por %p8689_p3, %p39_p8 }
  0x5a   : > { %s269_s20 = sand.u32 1, %s6864_s26   ;;  %s6556_s21 = smul.u32 4352, %s6868_s27 }
  0x5b   : > { %s6555_s16 = smul.u32 272, %s269_s20  ;;  %p7081_p11 = pnand %p6596_p6, %p41_p10 }
  0x5c   : > { %s7088_s11 = scalar_lea.hbm %s8638_s0, %s6556_s21  ;;  %s7092_s12 = scalar_lea.sflag [#allocation5], %s269_s20 }
  0x5d   : > { %s273_s14 = scalar_lea.vmem [#allocation4], %s6555_s16  ;;  %s6764_s17 = scalar_lea.hbm %s7088_s11, 4352 }
  0x5e   : > { %s280_s8 = sshll.u32 %s273_s14, 4  ;;  %p6765_p7 = scmp.ne.s32.totalorder %s7088_s11, %s6764_s17  ;;  %s7090_s8 = int_to_ptr.vmem [resolvable:$true] %s280_s8 }
  0x5f   : > { %p6766_p9 = pneg %p7081_p11  ;;  %s6769_s10 = scalar_lea.hbm %s8638_s0, 8704 }
  0x60   : > { %p6770_p1 = scmp.lt.u32.totalorder %s7088_s11, %s8638_s0  ;;  %p6771_p2 = scmp.lt.u32.totalorder %s6769_s10, %s6764_s17 }
  0x61   : > { %p6767_p12 = pnand %p6766_p9, %p6765_p7  ;;  %p6773_p8 = scmp.lt.u32.totalorder %s6764_s17, %s7088_s11 }
  0x62   : > { %p6772_p4 = por %p6771_p2, %p6770_p1 }
  0x63   : > { %p6768_p0 = pneg %p6767_p12 }
  0x64   : > { %p6774_p13 = por %p6773_p8, %p6772_p4 }
  0x66   : > { %p6775_p6 = pnand %p6774_p13, %p6768_p0 }
  0x68   : > { %6778 = shalt.err (!%p6775_p6)
}
  0x69   : > { %s6779_s20 = scalar_lea.vmem %s7090_s8, 4352  ;;  %s6875_s16 = smov [#allocation4]  }
  0x6a   : > { %p6780_p10 = scmp.ne.s32.totalorder %s7090_s8, %s6779_s20  ;;  %s6784_s14 = sshll.u32 %s6875_s16, 4  ;;  %s6785_s14 = int_to_ptr.vmem [resolvable:$false] %s6784_s14 }
  0x6b   : > { %s6786_s13 = scalar_lea.vmem %s6785_s14, 8704  ;;  %p6787_p12 = scmp.lt.s32.totalorder %s7090_s8, %s6785_s14 }
  0x6c   : > { %p6782_p3 = pnand %p6780_p10, %p6766_p9  ;;  %p6788_p1 = scmp.lt.s32.totalorder %s6786_s13, %s6779_s20 }
  0x6e   : > { %p6783_p7 = pneg %p6782_p3  ;;  %p6789_p2 = por %p6788_p1, %p6787_p12 }
  0x70   : > { %p6790_p4 = pnand %p6789_p2, %p6783_p7 }
  0x72   : > { %6793 = shalt.err (!%p6790_p4)
}
  0x73   : > { %s8692_s15 = smov 8   ;;  %s8693_s17 = smov 128  }
  0x74   : > { %6588 = dma.hbm_to_vmem [thread:$0]  (!%p7081_p11), %s7088_s11, 4352, %s7090_s8, %s7092_s12, %s8693_s17, %s8693_s17, %s8692_s15  }
  0x75   : > { %p8694_p9 = scmp.ne.s32.totalorder %s8686_s9, 0 }
  0x77   : > { %292 = sbr.rel (%p8694_p9) target bundleno = 1623 (0x657), region = 48 }
  0x7e   : > { %s7126_s21 = sand.u32 1, %s6860_s25   ;;  %p8695_p0 = scmp.ne.s32.totalorder %s8683_s30, 0 }
  0x7f   : > { %s6557_s29 = smul.u32 272, %s7126_s21  ;;  %s295_s10 = scalar_lea.sflag [#allocation5], %s7126_s21 }
  0x81   : > { %s7132_s23 = scalar_lea.vmem [#allocation4], %s6557_s29 }
  0x82   : > { %6839 = dma.done.wait (%p8695_p0), %s295_s10, 4352  }
  0x83   : > { %6841 = vsyncadd (%p8695_p0), %s295_s10, 4294962944  ;;  %p8696_p11 = scmp.eq.s32.totalorder %s6942_s28, 0 }
  0x85   : > { %6843 = dma.done.wait (%p8696_p11), [#allocation8], 36864   ;;  %p8697_p8 = pmov %p8696_p11 }
  0x87   : > { %6845 = vsyncadd (%p8697_p8), [#allocation8], 4294930432  ;;  %p8698_p13 = pmov %p8697_p8 }
  0x88   : > { %p8699_p6 = pmov %p8697_p8 }
  0x89   : > { %6847 = dma.done.wait (%p8698_p13), [#allocation11], 4352  }
  0x8a   : > { %6849 = vsyncadd (%p8699_p6), [#allocation11], 4294962944  ;;  %v8652_v0 = vmov 0.0|0.0   ;;  %v6877_v1 = vmov 0.0   ;;  %v1333_v2 = vld [vmem:[#allocation7] sm:$0xff]  ;;  %v1334_v3 = vld [vmem:[#allocation7 + $0x8] sm:$0xff] }
  0x8b   : > { %5615 = vmatprep.subr.bf16.mxu0 %v8652_v0  ;;  %341 = vst [vmem:[#allocation2] sm:$0xff] %v6877_v1  ;;  %342 = vst [vmem:[#allocation2 + $0x8] sm:$0xff] %v6877_v1  ;;  %v1335_v4 = vld [vmem:[#allocation7 + $0x10] sm:$0xff]  ;;  %v5616_v5 = vpack.c.bf16 %v1334_v3, %v1333_v2  ;;  %v1336_v6 = vld [vmem:[#allocation7 + $0x18] sm:$0xff]  ;;  %s8462_s17 = scalar_lea.vmem [#allocation12], %s6557_s29  ;;  %s6558_s29 = smul.u32 4352, %s6942_s28 }
  0x8c   : > { %343 = vst [vmem:[#allocation2 + $0x10] sm:$0x3] %v6877_v1  ;;  %344 = vst [vmem:[#allocation2 + $0x122] sm:$0xff] %v6877_v1  ;;  %v5619_v7 = vpack.c.bf16 %v1336_v6, %v1335_v4  ;;  %v1337_v8 = vld [vmem:[#allocation7 + $0x20] sm:$0xff]  ;;  %v1338_v9 = vld [vmem:[#allocation7 + $0x28] sm:$0xff]  ;;  %s5230_s10 = sshll.u32 %s8462_s17, 4  ;;  %s8592_s10 = int_to_ptr.vmem [resolvable:$true] %s5230_s10 }
  0x8d   : > { %345 = vst [vmem:[#allocation2 + $0x12a] sm:$0xff] %v6877_v1  ;;  %346 = vst [vmem:[#allocation2 + $0x132] sm:$0x3] %v6877_v1  ;;  %5617 = vmatpush1.bf16.msra.mxu0 %v5616_v5  ;;  %v5622_v10 = vpack.c.bf16 %v1338_v9, %v1337_v8  ;;  %v1339_v11 = vld [vmem:[#allocation7 + $0x30] sm:$0xff]  ;;  %v1340_v12 = vld [vmem:[#allocation7 + $0x38] sm:$0xff]  ;;  %s8590_s28 = scalar_lea.hbm %s8645_s7, %s6558_s29  ;;  %s5217_s11 = scalar_lea.sflag [#allocation6], %s7126_s21 }
  0x8e   : > { %5618 = vmatprep.subr.bf16.mxu0 %v8652_v0  ;;  %v5625_v14 = vpack.c.bf16 %v1340_v12, %v1339_v11  ;;  %v1341_v15 = vld [vmem:[#allocation7 + $0x40] sm:$0xff]  ;;  %v1342_v16 = vld [vmem:[#allocation7 + $0x48] sm:$0xff]  ;;  %v1343_v23 = vld [vmem:[#allocation7 + $0x50] sm:$0xff]  ;;  %s6794_s8 = scalar_lea.vmem %s8592_s10, 4352 }
  0x8f   : > { %v7157_v17 = vld [vmem:[%s7132_s23] sm:$0xff]  ;;  %v7161_v18 = vld [vmem:[%s7132_s23 + $0x8] sm:$0xff]  ;;  %v7164_v19 = vld [vmem:[%s7132_s23 + $0x10] sm:$0xff]  ;;  %v5628_v22 = vpack.c.bf16 %v1342_v16, %v1341_v15  ;;  %p6795_p10 = scmp.ne.s32.totalorder %s8592_s10, %s6794_s8 }
  0x90   : > { %381 = vst [vmem:[#allocation2 + $0x12] sm:$0xff] %v7157_v17  ;;  %382 = vst [vmem:[#allocation2 + $0x1a] sm:$0xff] %v7161_v18  ;;  %v7169_v20 = vld [vmem:[%s7132_s23 + $0x18] sm:$0xff]  ;;  %v7172_v21 = vld [vmem:[%s7132_s23 + $0x20] sm:$0xff] }
  0x91   : > { %5620 = vmatpush1.bf16.msra.mxu0 %v5619_v7  ;;  %383 = vst [vmem:[#allocation2 + $0x22] sm:$0xff] %v7164_v19  ;;  %384 = vst [vmem:[#allocation2 + $0x2a] sm:$0xff] %v7169_v20  ;;  %v7177_v24 = vld [vmem:[%s7132_s23 + $0x28] sm:$0xff]  ;;  %v7182_v26 = vld [vmem:[%s7132_s23 + $0x30] sm:$0xff]  ;;  %p6796_p3 = pnand %p6795_p10, %p7075_p5 }
  0x92   : > { %5621 = vmatprep.subr.bf16.mxu0 %v8652_v0  ;;  %v483_v13 = vld [vmem:[#allocation2 + $0x1] sm:$0xff]  ;;  %385 = vst [vmem:[#allocation2 + $0x32] sm:$0xff] %v7172_v21  ;;  %v1344_v25 = vld [vmem:[#allocation7 + $0x58] sm:$0xff]  ;;  %386 = vst [vmem:[#allocation2 + $0x3a] sm:$0xff] %v7177_v24 }
  0x93   : > { %1548 = vmatprep.mubr.f32.mxu0 %v483_v13  ;;  %v7185_v27 = vld [vmem:[%s7132_s23 + $0x38] sm:$0xff]  ;;  %387 = vst [vmem:[#allocation2 + $0x42] sm:$0xff] %v7182_v26  ;;  %v7190_v28 = vld [vmem:[%s7132_s23 + $0x40] sm:$0xff]  ;;  %v7193_v29 = vld [vmem:[%s7132_s23 + $0x48] sm:$0xff]  ;;  %v5631_v31 = vpack.c.bf16 %v1344_v25, %v1343_v23  ;;  %p6797_p7 = pneg %p6796_p3 }
  0x94   : > { %388 = vst [vmem:[#allocation2 + $0x4a] sm:$0xff] %v7185_v27  ;;  %389 = vst [vmem:[#allocation2 + $0x52] sm:$0xff] %v7190_v28  ;;  %v7198_v30 = vld [vmem:[%s7132_s23 + $0x50] sm:$0xff]  ;;  %v7202_v32 = vld [vmem:[%s7132_s23 + $0x58] sm:$0xff] }
  0x95   : > { %5623 = vmatpush1.bf16.msra.mxu0 %v5622_v10  ;;  %390 = vst [vmem:[#allocation2 + $0x5a] sm:$0xff] %v7193_v29  ;;  %391 = vst [vmem:[#allocation2 + $0x62] sm:$0xff] %v7198_v30  ;;  %v1345_v33 = vld [vmem:[#allocation7 + $0x60] sm:$0xff]  ;;  %v1346_v34 = vld [vmem:[#allocation7 + $0x68] sm:$0xff] }
  0x96   : > { %5624 = vmatprep.subr.bf16.mxu0 %v8652_v0  ;;  %392 = vst [vmem:[#allocation2 + $0x6a] sm:$0xff] %v7202_v32  ;;  %v7207_v35 = vld [vmem:[%s7132_s23 + $0x60] sm:$0xff]  ;;  %v5634_v36 = vpack.c.bf16 %v1346_v34, %v1345_v33  ;;  %v1348_v38 = vld [vmem:[#allocation7 + $0x78] sm:$0xff]  ;;  %v1350_v41 = vld [vmem:[#allocation7 + $0x88] sm:$0xff] }
  0x97   : > { %393 = vst [vmem:[#allocation2 + $0x72] sm:$0xff] %v7207_v35  ;;  %v1347_v37 = vld [vmem:[#allocation7 + $0x70] sm:$0xff]  ;;  %v1349_v40 = vld [vmem:[#allocation7 + $0x80] sm:$0xff]  ;;  %v7213_v42 = vld [vmem:[%s7132_s23 + $0x68] sm:$0xff] }
  0x98   : > { %v5637_v39 = vpack.c.bf16 %v1348_v38, %v1347_v37  ;;  %394 = vst [vmem:[#allocation2 + $0x7a] sm:$0xff] %v7213_v42  ;;  %v7217_v43 = vld [vmem:[%s7132_s23 + $0x70] sm:$0xff]  ;;  %v7220_v44 = vld [vmem:[%s7132_s23 + $0x78] sm:$0xff]  ;;  %v5640_v45 = vpack.c.bf16 %v1350_v41, %v1349_v40  ;;  %v7225_v46 = vld [vmem:[%s7132_s23 + $0x80] sm:$0xff] }
  0x99   : > { %5626 = vmatpush1.bf16.msra.mxu0 %v5625_v14  ;;  %395 = vst [vmem:[#allocation2 + $0x82] sm:$0xff] %v7217_v43  ;;  %396 = vst [vmem:[#allocation2 + $0x8a] sm:$0xff] %v7220_v44  ;;  %v7228_v47 = vld [vmem:[%s7132_s23 + $0x88] sm:$0xff]  ;;  %v1351_v48 = vld [vmem:[#allocation7 + $0x90] sm:$0xff] }
  0x9a   : > { %5627 = vmatprep.subr.bf16.mxu0 %v8652_v0  ;;  %v1352_v49 = vld [vmem:[#allocation7 + $0x98] sm:$0xff]  ;;  %397 = vst [vmem:[#allocation2 + $0x92] sm:$0xff] %v7225_v46  ;;  %398 = vst [vmem:[#allocation2 + $0x9a] sm:$0xff] %v7228_v47  ;;  %v7234_v50 = vld [vmem:[%s7132_s23 + $0x90] sm:$0xff] }
  0x9b   : > { %399 = vst [vmem:[#allocation2 + $0xa2] sm:$0xff] %v7234_v50  ;;  %v7238_v51 = vld [vmem:[%s7132_s23 + $0x98] sm:$0xff]  ;;  %v7242_v52 = vld [vmem:[%s7132_s23 + $0xa0] sm:$0xff]  ;;  %v7245_v53 = vld [vmem:[%s7132_s23 + $0xa8] sm:$0xff]  ;;  %v5643_v55 = vpack.c.bf16 %v1352_v49, %v1351_v48 }
  0x9c   : > { %400 = vst [vmem:[#allocation2 + $0xaa] sm:$0xff] %v7238_v51  ;;  %v7248_v54 = vld [vmem:[%s7132_s23 + $0xb0] sm:$0xff]  ;;  %401 = vst [vmem:[#allocation2 + $0xb2] sm:$0xff] %v7242_v52  ;;  %v7254_v57 = vld [vmem:[%s7132_s23 + $0xb8] sm:$0xff] }
  0x9d   : > { %5629 = vmatpush1.bf16.msra.mxu0 %v5628_v22  ;;  %v1353_v56 = vld [vmem:[#allocation7 + $0xa0] sm:$0xff]  ;;  %402 = vst [vmem:[#allocation2 + $0xba] sm:$0xff] %v7245_v53  ;;  %403 = vst [vmem:[#allocation2 + $0xc2] sm:$0xff] %v7248_v54  ;;  %v1354_v58 = vld [vmem:[#allocation7 + $0xa8] sm:$0xff] }
  0x9e   : > { %5630 = vmatprep.subr.bf16.mxu0 %v8652_v0  ;;  %404 = vst [vmem:[#allocation2 + $0xca] sm:$0xff] %v7254_v57  ;;  %v7259_v59 = vld [vmem:[%s7132_s23 + $0xc0] sm:$0xff]  ;;  %v7262_v60 = vld [vmem:[%s7132_s23 + $0xc8] sm:$0xff]  ;;  %v5646_v61 = vpack.c.bf16 %v1354_v58, %v1353_v56  ;;  %v7269_v5 = vld [vmem:[%s7132_s23 + $0xd0] sm:$0xff] }
  0x9f   : > { %8700 = vst [vmem:[#allocation18_spill] sm:$0xff] %v7259_v59  ;;  %8701 = vst [vmem:[#allocation19_spill] sm:$0xff] %v7262_v60  ;;  %v1355_v62 = vld [vmem:[#allocation7 + $0xb0] sm:$0xff]  ;;  %v1356_v63 = vld [vmem:[#allocation7 + $0xb8] sm:$0xff] }
  0xa0   : > { %405 = vst [vmem:[#allocation2 + $0xd2] sm:$0xff] %v7259_v59  ;;  %406 = vst [vmem:[#allocation2 + $0xda] sm:$0xff] %v7262_v60  ;;  %v5649_v2 = vpack.c.bf16 %v1356_v63, %v1355_v62  ;;  %v1357_v3 = vld [vmem:[#allocation7 + $0xc0] sm:$0xff]  ;;  %v1358_v4 = vld [vmem:[#allocation7 + $0xc8] sm:$0xff] }
  0xa1   : > { %5632 = vmatpush1.bf16.msra.mxu0 %v5631_v31  ;;  %8702 = vst [vmem:[#allocation20_spill] sm:$0xff] %v7269_v5  ;;  %v5652_v6 = vpack.c.bf16 %v1358_v4, %v1357_v3  ;;  %407 = vst [vmem:[#allocation2 + $0xe2] sm:$0xff] %v7269_v5  ;;  %v7273_v7 = vld [vmem:[%s7132_s23 + $0xd8] sm:$0xff]  ;;  %v1359_v8 = vld [vmem:[#allocation7 + $0xd0] sm:$0xff] }
  0xa2   : > { %5633 = vmatprep.subr.bf16.mxu0 %v8652_v0  ;;  %8703 = vst [vmem:[#allocation21_spill] sm:$0xff] %v7273_v7  ;;  %v1360_v9 = vld [vmem:[#allocation7 + $0xd8] sm:$0xff]  ;;  %408 = vst [vmem:[#allocation2 + $0xea] sm:$0xff] %v7273_v7  ;;  %v7278_v10 = vld [vmem:[%s7132_s23 + $0xe0] sm:$0xff] }
  0xa3   : > { %8704 = vst [vmem:[#allocation22_spill] sm:$0xff] %v7278_v10  ;;  %409 = vst [vmem:[#allocation2 + $0xf2] sm:$0xff] %v7278_v10  ;;  %v5655_v11 = vpack.c.bf16 %v1360_v9, %v1359_v8  ;;  %v1361_v12 = vld [vmem:[#allocation7 + $0xe0] sm:$0xff]  ;;  %v1362_v13 = vld [vmem:[#allocation7 + $0xe8] sm:$0xff] }
  0xa4   : > { %v7283_v14 = vld [vmem:[%s7132_s23 + $0xe8] sm:$0xff]  ;;  %v5658_v15 = vpack.c.bf16 %v1362_v13, %v1361_v12  ;;  %v1363_v16 = vld [vmem:[#allocation7 + $0xf0] sm:$0xff]  ;;  %v1365_v31 = vld [vmem:[#allocation7 + $0x100] sm:$0xff] }
  0xa5   : > { %5635 = vmatpush1.bf16.msra.mxu0 %v5634_v36  ;;  %8705 = vst [vmem:[#allocation23_spill] sm:$0xff] %v7283_v14  ;;  %410 = vst [vmem:[#allocation2 + $0xfa] sm:$0xff] %v7283_v14  ;;  %v1364_v22 = vld [vmem:[#allocation7 + $0xf8] sm:$0xff]  ;;  %v7288_v23 = vld [vmem:[%s7132_s23 + $0xf0] sm:$0xff] }
  0xa6   : > { %5636 = vmatprep.subr.bf16.mxu0 %v8652_v0  ;;  %8706 = vst [vmem:[#allocation24_spill] sm:$0xff] %v7288_v23  ;;  %411 = vst [vmem:[#allocation2 + $0x102] sm:$0xff] %v7288_v23  ;;  %v5661_v25 = vpack.c.bf16 %v1364_v22, %v1363_v16  ;;  %v1366_v33 = vld [vmem:[#allocation7 + $0x108] sm:$0xff]  ;;  %v484_v37 = vld [vmem:[#allocation2 + $0x9] sm:$0xff] }
  0xa7   : > { %v7293_v34 = vld [vmem:[%s7132_s23 + $0xf8] sm:$0xff]  ;;  %v5664_v36 = vpack.c.bf16 %v1366_v33, %v1365_v31  ;;  %v1367_v38 = vld [vmem:[#allocation7 + $0x110] sm:$0xff]  ;;  %v418_v62 = vld [vmem:[#allocation2 + $0x18] sm:$0xff] }
  0xa8   : > { %8707 = vst [vmem:[#allocation25_spill] sm:$0xff] %v7293_v34  ;;  %412 = vst [vmem:[#allocation2 + $0x10a] sm:$0xff] %v7293_v34  ;;  %v7298_v41 = vld [vmem:[#allocation2 + $0x11] sm:$0xff]  ;;  %v1370_v48 = vld [vmem:[#allocation7 + $0x128] sm:$0xff] }
  0xa9   : > { %5638 = vmatpush1.bf16.msra.mxu0 %v5637_v39  ;;  %v1368_v39 = vld [vmem:[#allocation7 + $0x118] sm:$0xff]  ;;  %v7303_v56 = vld [vmem:[#allocation2 + $0x19] sm:$0xff]  ;;  %v1371_v58 = vld [vmem:[#allocation7 + $0x130] sm:$0xff] }
  0xaa   : > { %5639 = vmatprep.subr.bf16.mxu0 %v8652_v0  ;;  %v5667_v40 = vpack.c.bf16 %v1368_v39, %v1367_v38  ;;  %v417_v49 = vld [vmem:[#allocation2 + $0x10] sm:$0xff]  ;;  %v1374_v3 = vld [vmem:[#allocation7 + $0x148] sm:$0xff]  ;;  %v1375_v9 = vld [vmem:[#allocation7 + $0x150] sm:$0xff] }
  0xab   : > { %v419_v4 = vld [vmem:[#allocation2 + $0x20] sm:$0xff]  ;;  %v7311_v8 = vld [vmem:[#allocation2 + $0x29] sm:$0xff]  ;;  %v1377_v16 = vld [vmem:[#allocation7 + $0x160] sm:$0xff] }
  0xac   : > { %v420_v12 = vld [vmem:[#allocation2 + $0x28] sm:$0xff]  ;;  %v1378_v22 = vld [vmem:[#allocation7 + $0x168] sm:$0xff]  ;;  %v422_v38 = vld [vmem:[#allocation2 + $0x38] sm:$0xff] }
  0xad   : > { %5641 = vmatpush1.bf16.msra.mxu0 %v5640_v45  ;;  %v1369_v45 = vld [vmem:[#allocation7 + $0x120] sm:$0xff]  ;;  %v5682_v31 = vpack.c.bf16 %v1378_v22, %v1377_v16  ;;  %v1388_v16 = vld [vmem:[#allocation7 + $0x1b8] sm:$0xff]  ;;  %v7405_v14 = vld [vmem:[#allocation2 + $0x101] sm:$0xff] }
  0xae   : > { %5642 = vmatprep.subr.bf16.mxu0 %v8652_v0  ;;  %v7319_v33 = vld [vmem:[#allocation2 + $0x39] sm:$0xff]  ;;  %v7399_v34 = vld [vmem:[#allocation2 + $0xf1] sm:$0xff]  ;;  %8711 = vst [vmem:[#allocation29_spill] sm:$0xff] %v7405_v14 }
  0xaf   : > { %v426_v22 = vld [vmem:[#allocation2 + $0x58] sm:$0xff]  ;;  %8709 = vst [vmem:[#allocation27_spill] sm:$0xff] %v7399_v34  ;;  %v7408_v10 = vld [vmem:[#allocation2 + $0x109] sm:$0xff]  ;;  %v1398_v5 = vld [vmem:[#allocation7 + $0x208] sm:$0xff] }
  0xb0   : > { %v7402_v23 = vld [vmem:[#allocation2 + $0xf9] sm:$0xff]  ;;  %8712 = vst [vmem:[#allocation30_spill] sm:$0xff] %v7408_v10  ;;  %v1400_v60 = vld [vmem:[#allocation7 + $0x218] sm:$0xff] }
  0xb1   : > { %5644 = vmatpush1.bf16.msra.mxu0 %v5643_v55  ;;  %v5670_v55 = vpack.c.bf16 %v1370_v48, %v1369_v45  ;;  %v1381_v45 = vld [vmem:[#allocation7 + $0x180] sm:$0xff]  ;;  %v1382_v48 = vld [vmem:[#allocation7 + $0x188] sm:$0xff]  ;;  %8710 = vst [vmem:[#allocation28_spill] sm:$0xff] %v7402_v23 }
  0xb2   : > { %5645 = vmatprep.subr.bf16.mxu0 %v8652_v0  ;;  %v7411_v7 = vld [vmem:[%s7132_s23 + $0x100] sm:$0xff]  ;;  %v1402_v59 = vld [vmem:[#allocation7 + $0x228] sm:$0xff] }
  0xb3   : > { %8713 = vst [vmem:[#allocation31_spill] sm:$0xff] %v7411_v7  ;;  %413 = vst [vmem:[#allocation2 + $0x112] sm:$0xff] %v7411_v7 }
  0xb5   : > { %5647 = vmatpush1.bf16.msra.mxu0 %v5646_v61  ;;  %v1372_v61 = vld [vmem:[#allocation7 + $0x138] sm:$0xff] }
  0xb6   : > { %5648 = vmatprep.subr.bf16.mxu0 %v8652_v0  ;;  %v5673_v63 = vpack.c.bf16 %v1372_v61, %v1371_v58  ;;  %v7327_v58 = vld [vmem:[#allocation2 + $0x49] sm:$0xff] }
  0xb7   : > { %v1383_v61 = vld [vmem:[#allocation7 + $0x190] sm:$0xff] }
  0xb9   : > { %5650 = vmatpush1.bf16.msra.mxu0 %v5649_v2  ;;  %v7307_v2 = vld [vmem:[#allocation2 + $0x21] sm:$0xff] }
  0xba   : > { %5651 = vmatprep.subr.bf16.mxu0 %v8652_v0 }
  0xbd   : > { %5653 = vmatpush1.bf16.msra.mxu0 %v5652_v6 }
  0xbe   : > { %5654 = vmatprep.subr.bf16.mxu0 %v8652_v0 }
  0xc1   : > { %5656 = vmatpush1.bf16.msra.mxu0 %v5655_v11  ;;  %v1376_v11 = vld [vmem:[#allocation7 + $0x158] sm:$0xff] }
  0xc2   : > { %5657 = vmatprep.subr.bf16.mxu0 %v8652_v0  ;;  %v5679_v13 = vpack.c.bf16 %v1376_v11, %v1375_v9  ;;  %v425_v9 = vld [vmem:[#allocation2 + $0x50] sm:$0xff] }
  0xc5   : > { %5659 = vmatpush1.bf16.msra.mxu0 %v5658_v15  ;;  %v7315_v15 = vld [vmem:[#allocation2 + $0x31] sm:$0xff] }
  0xc6   : > { %5660 = vmatprep.subr.bf16.mxu0 %v8652_v0 }
  0xc9   : > { %5662 = vmatpush1.bf16.msra.mxu0 %v5661_v25  ;;  %v421_v25 = vld [vmem:[#allocation2 + $0x30] sm:$0xff] }
  0xca   : > { %5663 = vmatprep.subr.bf16.mxu0 %v8652_v0 }
  0xcc   : > { %1549 = vmatmul.mubr.f32.vlgmr.msra.gmra.mrb[0].mxu0 %v6877_v1 }
  0xcd   : > { %5665 = vmatpush1.bf16.msra.mxu0 %v5664_v36  ;;  %1553 = vmatprep.mubr.f32.mxu0 %v484_v37  ;;  %v1379_v36 = vld [vmem:[#allocation7 + $0x170] sm:$0xff]  ;;  %v1380_v37 = vld [vmem:[#allocation7 + $0x178] sm:$0xff] }
  0xce   : > { %5666 = vmatprep.subr.bf16.mxu0 %v8652_v0  ;;  %v5685_v39 = vpack.c.bf16 %v1380_v37, %v1379_v36  ;;  %v1389_v36 = vld [vmem:[#allocation7 + $0x1c0] sm:$0xff]  ;;  %v1390_v37 = vld [vmem:[#allocation7 + $0x1c8] sm:$0xff] }
  0xd0   : > { %1554 = vmatmul.mubr.f32.gmra.mrb[2].mxu0 %v6877_v1  ;;  %v1373_v1 = vld [vmem:[#allocation7 + $0x140] sm:$0xff] }
  0xd1   : > { %1558 = vmatprep.mubr.f32.mxu0 %v7298_v41  ;;  %5668 = vmatpush1.bf16.msra.mxu0 %v5667_v40  ;;  %v5676_v6 = vpack.c.bf16 %v1374_v3, %v1373_v1  ;;  %v7323_v40 = vld [vmem:[#allocation2 + $0x41] sm:$0xff]  ;;  %v7331_v3 = vld [vmem:[#allocation2 + $0x51] sm:$0xff] }
  0xd2   : > { %5669 = vmatprep.subr.bf16.mxu0 %v8652_v0 }
  0xd4   : > { %1559 = vmatmul.mubr.f32.gmra.mrb[4].mxu0 %v417_v49  ;;  %v423_v49 = vld [vmem:[#allocation2 + $0x40] sm:$0xff] }
  0xd5   : > { %1563 = vmatprep.mubr.f32.mxu0 %v7303_v56  ;;  %5671 = vmatpush1.bf16.msra.mxu0 %v5670_v55  ;;  %v5688_v55 = vpack.c.bf16 %v1382_v48, %v1381_v45  ;;  %v7343_v45 = vld [vmem:[#allocation2 + $0x69] sm:$0xff] }
  0xd6   : > { %5672 = vmatprep.subr.bf16.mxu0 %v8652_v0  ;;  %v1391_v48 = vld [vmem:[#allocation7 + $0x1d0] sm:$0xff] }
  0xd8   : > { %1564 = vmatmul.mubr.f32.gmra.mrb[6].mxu0 %v418_v62  ;;  %v1384_v62 = vld [vmem:[#allocation7 + $0x198] sm:$0xff] }
  0xd9   : > { %1568 = vmatprep.mubr.f32.mxu0 %v7307_v2  ;;  %5674 = vmatpush1.bf16.msra.mxu0 %v5673_v63  ;;  %v424_v63 = vld [vmem:[#allocation2 + $0x48] sm:$0xff]  ;;  %v5691_v1 = vpack.c.bf16 %v1384_v62, %v1383_v61  ;;  %v7347_v62 = vld [vmem:[#allocation2 + $0x71] sm:$0xff] }
  0xda   : > { %5675 = vmatprep.subr.bf16.mxu0 %v8652_v0 }
  0xdc   : > { %1569 = vmatmul.mubr.f32.gmra.mrb[8].mxu0 %v419_v4  ;;  %v1385_v4 = vld [vmem:[#allocation7 + $0x1a0] sm:$0xff] }
  0xdd   : > { %1573 = vmatprep.mubr.f32.mxu0 %v7311_v8  ;;  %5677 = vmatpush1.bf16.msra.mxu0 %v5676_v6  ;;  %v1386_v6 = vld [vmem:[#allocation7 + $0x1a8] sm:$0xff] }
  0xde   : > { %5678 = vmatprep.subr.bf16.mxu0 %v8652_v0  ;;  %v5694_v11 = vpack.c.bf16 %v1386_v6, %v1385_v4  ;;  %v429_v4 = vld [vmem:[#allocation2 + $0x70] sm:$0xff] }
  0xe0   : > { %1574 = vmatmul.mubr.f32.gmra.mrb[10].mxu0 %v420_v12  ;;  %v7335_v12 = vld [vmem:[#allocation2 + $0x59] sm:$0xff] }
  0xe1   : > { %1578 = vmatprep.mubr.f32.mxu0 %v7315_v15  ;;  %5680 = vmatpush1.bf16.msra.mxu0 %v5679_v13  ;;  %v1387_v13 = vld [vmem:[#allocation7 + $0x1b0] sm:$0xff] }
  0xe2   : > { %5681 = vmatprep.subr.bf16.mxu0 %v8652_v0 }
  0xe4   : > { %1579 = vmatmul.mubr.f32.gmra.mrb[12].mxu0 %v421_v25  ;;  %v5697_v25 = vpack.c.bf16 %v1388_v16, %v1387_v13  ;;  %v1396_v13 = vld [vmem:[#allocation7 + $0x1f8] sm:$0xff]  ;;  %v430_v16 = vld [vmem:[#allocation2 + $0x78] sm:$0xff] }
  0xe5   : > { %1583 = vmatprep.mubr.f32.mxu0 %v7319_v33  ;;  %5683 = vmatpush1.bf16.msra.mxu0 %v5682_v31  ;;  %v7339_v31 = vld [vmem:[#allocation2 + $0x61] sm:$0xff] }
  0xe6   : > { %5684 = vmatprep.subr.bf16.mxu0 %v8652_v0 }
  0xe8   : > { %1584 = vmatmul.mubr.f32.gmra.mrb[14].mxu0 %v422_v38  ;;  %v427_v38 = vld [vmem:[#allocation2 + $0x60] sm:$0xff] }
  0xe9   : > { %1588 = vmatprep.mubr.f32.mxu0 %v7323_v40  ;;  %5686 = vmatpush1.bf16.msra.mxu0 %v5685_v39  ;;  %v5700_v39 = vpack.c.bf16 %v1390_v37, %v1389_v36  ;;  %v431_v36 = vld [vmem:[#allocation2 + $0x80] sm:$0xff]  ;;  %v7359_v37 = vld [vmem:[#allocation2 + $0x89] sm:$0xff] }
  0xea   : > { %5687 = vmatprep.subr.bf16.mxu0 %v8652_v0 }
  0xec   : > { %1589 = vmatmul.mubr.f32.gmra.mrb[16].mxu0 %v423_v49  ;;  %v1392_v49 = vld [vmem:[#allocation7 + $0x1d8] sm:$0xff] }
  0xed   : > { %1593 = vmatprep.mubr.f32.mxu0 %v7327_v58  ;;  %5689 = vmatpush1.bf16.msra.mxu0 %v5688_v55  ;;  %v428_v55 = vld [vmem:[#allocation2 + $0x68] sm:$0xff]  ;;  %v5703_v61 = vpack.c.bf16 %v1392_v49, %v1391_v48  ;;  %v433_v48 = vld [vmem:[#allocation2 + $0x90] sm:$0xff]  ;;  %v7366_v49 = vld [vmem:[#allocation2 + $0x99] sm:$0xff] }
  0xee   : > { %5690 = vmatprep.subr.bf16.mxu0 %v8652_v0 }
  0xf0   : > { %1594 = vmatmul.mubr.f32.gmra.mrb[18].mxu0 %v424_v63  ;;  %v1393_v63 = vld [vmem:[#allocation7 + $0x1e0] sm:$0xff] }
  0xf1   : > { %1598 = vmatprep.mubr.f32.mxu0 %v7331_v3  ;;  %5692 = vmatpush1.bf16.msra.mxu0 %v5691_v1  ;;  %v1394_v1 = vld [vmem:[#allocation7 + $0x1e8] sm:$0xff] }
  0xf2   : > { %5693 = vmatprep.subr.bf16.mxu0 %v8652_v0  ;;  %v5706_v6 = vpack.c.bf16 %v1394_v1, %v1393_v63  ;;  %v435_v63 = vld [vmem:[#allocation2 + $0xa0] sm:$0xff]  ;;  %v7372_v1 = vld [vmem:[#allocation2 + $0xa9] sm:$0xff] }
  0xf4   : > { %1599 = vmatmul.mubr.f32.gmra.mrb[20].mxu0 %v425_v9  ;;  %v7351_v9 = vld [vmem:[#allocation2 + $0x79] sm:$0xff] }
  0xf5   : > { %1603 = vmatprep.mubr.f32.mxu0 %v7335_v12  ;;  %5695 = vmatpush1.bf16.msra.mxu0 %v5694_v11  ;;  %v1395_v11 = vld [vmem:[#allocation7 + $0x1f0] sm:$0xff] }
  0xf6   : > { %5696 = vmatprep.subr.bf16.mxu0 %v8652_v0 }
  0xf8   : > { %1604 = vmatmul.mubr.f32.gmra.mrb[22].mxu0 %v426_v22  ;;  %v5709_v22 = vpack.c.bf16 %v1396_v13, %v1395_v11  ;;  %v437_v11 = vld [vmem:[#allocation2 + $0xb0] sm:$0xff]  ;;  %v7378_v13 = vld [vmem:[#allocation2 + $0xb9] sm:$0xff] }
  0xf9   : > { %1608 = vmatprep.mubr.f32.mxu0 %v7339_v31  ;;  %5698 = vmatpush1.bf16.msra.mxu0 %v5697_v25  ;;  %v7355_v25 = vld [vmem:[#allocation2 + $0x81] sm:$0xff] }
  0xfa   : > { %5699 = vmatprep.subr.bf16.mxu0 %v8652_v0 }
  0xfc   : > { %1609 = vmatmul.mubr.f32.gmra.mrb[24].mxu0 %v427_v38  ;;  %v432_v38 = vld [vmem:[#allocation2 + $0x88] sm:$0xff] }
  0xfd   : > { %1613 = vmatprep.mubr.f32.mxu0 %v7343_v45  ;;  %5701 = vmatpush1.bf16.msra.mxu0 %v5700_v39  ;;  %v7363_v39 = vld [vmem:[#allocation2 + $0x91] sm:$0xff] }
  0xfe   : > { %5702 = vmatprep.subr.bf16.mxu0 %v8652_v0 }
 0x100   : > { %1614 = vmatmul.mubr.f32.gmra.mrb[26].mxu0 %v428_v55  ;;  %v434_v55 = vld [vmem:[#allocation2 + $0x98] sm:$0xff] }
 0x101   : > { %1618 = vmatprep.mubr.f32.mxu0 %v7347_v62  ;;  %5704 = vmatpush1.bf16.msra.mxu0 %v5703_v61  ;;  %v7369_v61 = vld [vmem:[#allocation2 + $0xa1] sm:$0xff] }
 0x102   : > { %5705 = vmatprep.subr.bf16.mxu0 %v8652_v0 }
 0x104   : > { %1619 = vmatmul.mubr.f32.gmra.mrb[28].mxu0 %v429_v4  ;;  %v436_v4 = vld [vmem:[#allocation2 + $0xa8] sm:$0xff] }
 0x105   : > { %1623 = vmatprep.mubr.f32.mxu0 %v7351_v9  ;;  %5707 = vmatpush1.bf16.msra.mxu0 %v5706_v6  ;;  %v7375_v6 = vld [vmem:[#allocation2 + $0xb1] sm:$0xff] }
 0x106   : > { %5708 = vmatprep.subr.bf16.mxu0 %v8652_v0 }
 0x108   : > { %1624 = vmatmul.mubr.f32.gmra.mrb[30].mxu0 %v430_v16  ;;  %v438_v16 = vld [vmem:[#allocation2 + $0xb8] sm:$0xff] }
 0x109   : > { %1628 = vmatprep.mubr.f32.mxu0 %v7355_v25  ;;  %5710 = vmatpush1.bf16.msra.mxu0 %v5709_v22  ;;  %v7381_v22 = vld [vmem:[#allocation2 + $0xc1] sm:$0xff] }
 0x10a   : > { %5711 = vmatprep.subr.bf16.mxu0 %v8652_v0  ;;  %v7396_v0 = vld [vmem:[#allocation2 + $0xe9] sm:$0xff] }
 0x10b   : > { %8708 = vst [vmem:[#allocation26_spill] sm:$0xff] %v7396_v0 }
 0x10c   : > { %1629 = vmatmul.mubr.f32.gmra.mrb[32].mxu0 %v431_v36  ;;  %v439_v36 = vld [vmem:[#allocation2 + $0xc0] sm:$0xff] }
 0x10d   : > { %1633 = vmatprep.mubr.f32.mxu0 %v7359_v37 }
 0x110   : > { %1634 = vmatmul.mubr.f32.gmra.mrb[34].mxu0 %v432_v38  ;;  %v7384_v38 = vld [vmem:[#allocation2 + $0xc9] sm:$0xff] }
 0x111   : > { %1638 = vmatprep.mubr.f32.mxu0 %v7363_v39 }
 0x114   : > { %1639 = vmatmul.mubr.f32.gmra.mrb[36].mxu0 %v433_v48  ;;  %v440_v48 = vld [vmem:[#allocation2 + $0xc8] sm:$0xff] }
 0x115   : > { %1643 = vmatprep.mubr.f32.mxu0 %v7366_v49 }
 0x118   : > { %1644 = vmatmul.mubr.f32.gmra.mrb[38].mxu0 %v434_v55  ;;  %v7387_v55 = vld [vmem:[#allocation2 + $0xd1] sm:$0xff] }
 0x119   : > { %1648 = vmatprep.mubr.f32.mxu0 %v7369_v61 }
 0x11c   : > { %1649 = vmatmul.mubr.f32.gmra.mrb[40].mxu0 %v435_v63  ;;  %v441_v63 = vld [vmem:[#allocation2 + $0xd0] sm:$0xff] }
 0x11d   : > { %1653 = vmatprep.mubr.f32.mxu0 %v7372_v1 }
 0x120   : > { %1654 = vmatmul.mubr.f32.gmra.mrb[42].mxu0 %v436_v4  ;;  %v7390_v4 = vld [vmem:[#allocation2 + $0xd9] sm:$0xff] }
 0x121   : > { %1658 = vmatprep.mubr.f32.mxu0 %v7375_v6 }
 0x124   : > { %1659 = vmatmul.mubr.f32.gmra.mrb[44].mxu0 %v437_v11  ;;  %v442_v11 = vld [vmem:[#allocation2 + $0xd8] sm:$0xff] }
 0x125   : > { %1663 = vmatprep.mubr.f32.mxu0 %v7378_v13 }
 0x128   : > { %1664 = vmatmul.mubr.f32.gmra.mrb[46].mxu0 %v438_v16  ;;  %v7393_v16 = vld [vmem:[#allocation2 + $0xe1] sm:$0xff] }
 0x129   : > { %1668 = vmatprep.mubr.f32.mxu0 %v7381_v22 }
 0x12c   : > { %1669 = vmatmul.mubr.f32.gmra.mrb[48].mxu0 %v439_v36  ;;  %v443_v36 = vld [vmem:[#allocation2 + $0xe0] sm:$0xff] }
 0x12d   : > { %1673 = vmatprep.mubr.f32.mxu0 %v7384_v38 }
 0x130   : > { %1674 = vmatmul.mubr.f32.gmra.mrb[50].mxu0 %v440_v48  ;;  %v444_v48 = vld [vmem:[#allocation2 + $0xe8] sm:$0xff] }
 0x131   : > { %1678 = vmatprep.mubr.f32.mxu0 %v7387_v55 }
 0x134   : > { %1679 = vmatmul.mubr.f32.gmra.mrb[52].mxu0 %v441_v63  ;;  %v445_v63 = vld [vmem:[#allocation2 + $0xf0] sm:$0xff] }
 0x135   : > { %1683 = vmatprep.mubr.f32.mxu0 %v7390_v4 }
 0x138   : > { %1684 = vmatmul.mubr.f32.gmra.mrb[54].mxu0 %v442_v11  ;;  %v446_v11 = vld [vmem:[#allocation2 + $0xf8] sm:$0xff] }
 0x139   : > { %1688 = vmatprep.mubr.f32.mxu0 %v7393_v16 }
 0x13c   : > { %1689 = vmatmul.mubr.f32.gmra.mrb[56].mxu0 %v443_v36  ;;  %v447_v36 = vld [vmem:[#allocation2 + $0x100] sm:$0xff] }
 0x13d   : > { %1693 = vmatprep.mubr.f32.mxu0 %v7396_v0  ;;  %v1401_v0 = vld [vmem:[#allocation7 + $0x220] sm:$0xff] }
 0x140   : > { %1694 = vmatmul.mubr.f32.gmra.mrb[58].mxu0 %v444_v48  ;;  %v448_v48 = vld [vmem:[#allocation2 + $0x108] sm:$0xff] }
 0x141   : > { %1698 = vmatprep.mubr.f32.mxu0 %v7399_v34  ;;  %v1399_v34 = vld [vmem:[#allocation7 + $0x210] sm:$0xff] }
 0x142   : > { %v5715_v7 = vpack.c.bf16 %v1400_v60, %v1399_v34  ;;  %v1405_v60 = vld [vmem:[#allocation7 + $0x240] sm:$0xff]  ;;  %v1406_v34 = vld [vmem:[#allocation7 + $0x248] sm:$0xff] }
 0x144   : > { %1699 = vmatmul.mubr.f32.gmra.mrb[60].mxu0 %v445_v63  ;;  %v1397_v63 = vld [vmem:[#allocation7 + $0x200] sm:$0xff] }
 0x145   : > { %1703 = vmatprep.mubr.f32.mxu0 %v7402_v23  ;;  %v7416_v23 = vld [vmem:[%s7132_s23 + $0x108] sm:$0xff] }
 0x146   : > { %414 = vst [vmem:[#allocation2 + $0x11a] sm:$0xff] %v7416_v23 }
 0x148   : > { %1704 = vmatmul.mubr.f32.gmra.mrb[62].mxu0 %v446_v11  ;;  %v551_v11 = vld [vmem:[#allocation2 + $0x2] sm:$0xff] }
 0x149   : > { %1708 = vmatprep.mubr.f32.mxu0 %v7405_v14  ;;  %v5712_v14 = vpack.c.bf16 %v1398_v5, %v1397_v63  ;;  %v1403_v5 = vld [vmem:[#allocation7 + $0x230] sm:$0xff]  ;;  %v1414_v63 = vld [vmem:[#allocation7 + $0x288] sm:$0xff] }
 0x14c   : > { %1709 = vmatmul.mubr.f32.gmra.mrb[64].mxu0 %v447_v36  ;;  %v552_v36 = vld [vmem:[#allocation2 + $0xa] sm:$0xff] }
 0x14d   : > { %1713 = vmatprep.mubr.f32.mxu0 %v7408_v10  ;;  %v8714_v10 = vmov 0.0|0.0  }
 0x150   : > { %1714 = vmatmul.mubr.f32.gmra.mrb[66].mxu0 %v448_v48  ;;  %v5718_v48 = vpack.c.bf16 %v1402_v59, %v1401_v0  ;;  %v5724_v0 = vpack.c.bf16 %v1406_v34, %v1405_v60  ;;  %v1407_v59 = vld [vmem:[#allocation7 + $0x250] sm:$0xff]  ;;  %v1428_v60 = vld [vmem:[#allocation7 + $0x2f8] sm:$0xff] }
 0x151   : > { %1783 = vmatprep.mubr.f32.mxu0 %v7298_v41  ;;  %v1404_v41 = vld [vmem:[#allocation7 + $0x238] sm:$0xff] }
 0x154   : > { %1784 = vmatmul.mubr.f32.vlgmr.msra.gmra.mrb[0].mxu0 %v551_v11  ;;  %v1416_v11 = vld [vmem:[#allocation7 + $0x298] sm:$0xff] }
 0x155   : > { %5713 = vmatpush1.bf16.msra.mxu0 %v5712_v14  ;;  %1788 = vmatprep.mubr.f32.mxu0 %v7303_v56  ;;  %v5721_v14 = vpack.c.bf16 %v1404_v41, %v1403_v5  ;;  %v1409_v56 = vld [vmem:[#allocation7 + $0x260] sm:$0xff]  ;;  %v1422_v5 = vld [vmem:[#allocation7 + $0x2c8] sm:$0xff]  ;;  %v1424_v41 = vld [vmem:[#allocation7 + $0x2d8] sm:$0xff] }
 0x156   : > { %5714 = vmatprep.subr.bf16.mxu0 %v8714_v10 }
 0x158   : > { %1789 = vmatmul.mubr.f32.gmra.mrb[2].mxu0 %v552_v36  ;;  %v1418_v36 = vld [vmem:[#allocation7 + $0x2a8] sm:$0xff] }
 0x159   : > { %1793 = vmatprep.mubr.f32.mxu0 %v7307_v2  ;;  %5716 = vmatpush1.bf16.msra.mxu0 %v5715_v7  ;;  %v1408_v7 = vld [vmem:[#allocation7 + $0x258] sm:$0xff]  ;;  %v1410_v2 = vld [vmem:[#allocation7 + $0x268] sm:$0xff] }
 0x15a   : > { %5717 = vmatprep.subr.bf16.mxu0 %v8714_v10 }
 0x15c   : > { %1794 = vmatmul.mubr.f32.gmra.mrb[4].mxu0 %v7157_v17  ;;  %v5727_v17 = vpack.c.bf16 %v1408_v7, %v1407_v59  ;;  %v1471_v59 = vld [vmem:[#allocation7 + $0x450] sm:$0xff]  ;;  %v1472_v7 = vld [vmem:[#allocation7 + $0x458] sm:$0xff] }
 0x15d   : > { %1798 = vmatprep.mubr.f32.mxu0 %v7311_v8  ;;  %5719 = vmatpush1.bf16.msra.mxu0 %v5718_v48  ;;  %v1411_v8 = vld [vmem:[#allocation7 + $0x270] sm:$0xff]  ;;  %v1420_v48 = vld [vmem:[#allocation7 + $0x2b8] sm:$0xff] }
 0x15e   : > { %5720 = vmatprep.subr.bf16.mxu0 %v8714_v10 }
 0x160   : > { %1799 = vmatmul.mubr.f32.gmra.mrb[6].mxu0 %v7161_v18  ;;  %v5730_v18 = vpack.c.bf16 %v1410_v2, %v1409_v56  ;;  %v1429_v56 = vld [vmem:[#allocation7 + $0x300] sm:$0xff]  ;;  %v1430_v2 = vld [vmem:[#allocation7 + $0x308] sm:$0xff] }
 0x161   : > { %1803 = vmatprep.mubr.f32.mxu0 %v7315_v15  ;;  %5722 = vmatpush1.bf16.msra.mxu0 %v5721_v14  ;;  %v1412_v15 = vld [vmem:[#allocation7 + $0x278] sm:$0xff]  ;;  %v1426_v14 = vld [vmem:[#allocation7 + $0x2e8] sm:$0xff] }
 0x162   : > { %5723 = vmatprep.subr.bf16.mxu0 %v8714_v10 }
 0x164   : > { %1804 = vmatmul.mubr.f32.gmra.mrb[8].mxu0 %v7164_v19  ;;  %v5733_v19 = vpack.c.bf16 %v1412_v15, %v1411_v8  ;;  %v8727_v8 = vld [vmem:[#allocation25_spill] sm:$0xff]  ;;  %v5760_v15 = vpack.c.bf16 %v1430_v2, %v1429_v56  ;;  %v6650_v56 = vld [vmem:[#allocation2 + $0x52] sm:$0xff] }
 0x165   : > { %1808 = vmatprep.mubr.f32.mxu0 %v7319_v33  ;;  %5725 = vmatpush1.bf16.msra.mxu0 %v5724_v0  ;;  %v1413_v33 = vld [vmem:[#allocation7 + $0x280] sm:$0xff] }
 0x166   : > { %5726 = vmatprep.subr.bf16.mxu0 %v8714_v10  ;;  %v8726_v0 = vld [vmem:[#allocation24_spill] sm:$0xff] }
 0x168   : > { %1809 = vmatmul.mubr.f32.gmra.mrb[10].mxu0 %v7169_v20  ;;  %v5736_v20 = vpack.c.bf16 %v1414_v63, %v1413_v33  ;;  %v1474_v33 = vld [vmem:[#allocation7 + $0x468] sm:$0xff] }
 0x169   : > { %1813 = vmatprep.mubr.f32.mxu0 %v7323_v40  ;;  %5728 = vmatpush1.bf16.msra.mxu0 %v5727_v17  ;;  %v1415_v40 = vld [vmem:[#allocation7 + $0x290] sm:$0xff]  ;;  %v755_v17 = vld [vmem:[#allocation2 + $0x13] sm:$0xff]  ;;  %v756_v63 = vld [vmem:[#allocation2 + $0x1b] sm:$0xff] }
 0x16a   : > { %5729 = vmatprep.subr.bf16.mxu0 %v8714_v10 }
 0x16c   : > { %1814 = vmatmul.mubr.f32.gmra.mrb[12].mxu0 %v7172_v21  ;;  %v5739_v21 = vpack.c.bf16 %v1416_v11, %v1415_v40  ;;  %v1432_v40 = vld [vmem:[#allocation7 + $0x318] sm:$0xff] }
 0x16d   : > { %1818 = vmatprep.mubr.f32.mxu0 %v7327_v58  ;;  %5731 = vmatpush1.bf16.msra.mxu0 %v5730_v18  ;;  %v1417_v58 = vld [vmem:[#allocation7 + $0x2a0] sm:$0xff]  ;;  %v5827_v18 = vpack.c.bf16 %v1472_v7, %v1471_v59  ;;  %v1448_v59 = vld [vmem:[#allocation7 + $0x398] sm:$0xff] }
 0x16e   : > { %5732 = vmatprep.subr.bf16.mxu0 %v8714_v10  ;;  %v965_v7 = vld [vmem:[#allocation2 + $0x54] sm:$0xff] }
 0x170   : > { %1819 = vmatmul.mubr.f32.gmra.mrb[14].mxu0 %v7177_v24  ;;  %v5742_v24 = vpack.c.bf16 %v1418_v36, %v1417_v58  ;;  %v1475_v36 = vld [vmem:[#allocation7 + $0x470] sm:$0xff] }
 0x171   : > { %1823 = vmatprep.mubr.f32.mxu0 %v7331_v3  ;;  %5734 = vmatpush1.bf16.msra.mxu0 %v5733_v19  ;;  %v1419_v3 = vld [vmem:[#allocation7 + $0x2b0] sm:$0xff]  ;;  %v1473_v19 = vld [vmem:[#allocation7 + $0x460] sm:$0xff] }
 0x172   : > { %5735 = vmatprep.subr.bf16.mxu0 %v8714_v10  ;;  %v5831_v11 = vpack.c.bf16 %v1474_v33, %v1473_v19  ;;  %v6651_v19 = vld [vmem:[#allocation2 + $0x5a] sm:$0xff]  ;;  %v7536_v33 = vld [vmem:[#allocation2 + $0x6b] sm:$0xff] }
 0x174   : > { %1824 = vmatmul.mubr.f32.gmra.mrb[16].mxu0 %v7182_v26  ;;  %v5745_v26 = vpack.c.bf16 %v1420_v48, %v1419_v3  ;;  %v7499_v3 = vld [vmem:[#allocation2 + $0x23] sm:$0xff]  ;;  %v1433_v48 = vld [vmem:[#allocation7 + $0x320] sm:$0xff] }
 0x175   : > { %1828 = vmatprep.mubr.f32.mxu0 %v7335_v12  ;;  %5737 = vmatpush1.bf16.msra.mxu0 %v5736_v20  ;;  %v1421_v12 = vld [vmem:[#allocation7 + $0x2c0] sm:$0xff]  ;;  %v1431_v20 = vld [vmem:[#allocation7 + $0x310] sm:$0xff] }
 0x176   : > { %5738 = vmatprep.subr.bf16.mxu0 %v8714_v10  ;;  %v5763_v58 = vpack.c.bf16 %v1432_v40, %v1431_v20  ;;  %v1451_v20 = vld [vmem:[#allocation7 + $0x3b0] sm:$0xff]  ;;  %v1452_v40 = vld [vmem:[#allocation7 + $0x3b8] sm:$0xff] }
 0x178   : > { %1829 = vmatmul.mubr.f32.gmra.mrb[18].mxu0 %v7185_v27  ;;  %v5748_v27 = vpack.c.bf16 %v1422_v5, %v1421_v12  ;;  %v6643_v5 = vld [vmem:[#allocation2 + $0x1a] sm:$0xff] }
 0x179   : > { %1833 = vmatprep.mubr.f32.mxu0 %v7339_v31  ;;  %5740 = vmatpush1.bf16.msra.mxu0 %v5739_v21  ;;  %v1423_v31 = vld [vmem:[#allocation7 + $0x2d0] sm:$0xff]  ;;  %v6642_v21 = vld [vmem:[#allocation2 + $0x12] sm:$0xff] }
 0x17a   : > { %5741 = vmatprep.subr.bf16.mxu0 %v8714_v10 }
 0x17c   : > { %1834 = vmatmul.mubr.f32.gmra.mrb[20].mxu0 %v7190_v28  ;;  %v5751_v28 = vpack.c.bf16 %v1424_v41, %v1423_v31  ;;  %v1435_v41 = vld [vmem:[#allocation7 + $0x330] sm:$0xff] }
 0x17d   : > { %1838 = vmatprep.mubr.f32.mxu0 %v7343_v45  ;;  %5743 = vmatpush1.bf16.msra.mxu0 %v5742_v24  ;;  %v1425_v45 = vld [vmem:[#allocation7 + $0x2e0] sm:$0xff]  ;;  %v1476_v24 = vld [vmem:[#allocation7 + $0x478] sm:$0xff] }
 0x17e   : > { %5744 = vmatprep.subr.bf16.mxu0 %v8714_v10  ;;  %v5835_v12 = vpack.c.bf16 %v1476_v24, %v1475_v36  ;;  %v5793_v36 = vpack.c.bf16 %v1452_v40, %v1451_v20  ;;  %v7540_v24 = vld [vmem:[#allocation2 + $0x73] sm:$0xff]  ;;  %v6664_v40 = vld [vmem:[#allocation2 + $0xc2] sm:$0xff] }
 0x17f   : > { %v980_v20 = vld [vmem:[#allocation2 + $0xcc] sm:$0xff] }
 0x180   : > { %1839 = vmatmul.mubr.f32.gmra.mrb[22].mxu0 %v7193_v29  ;;  %v5754_v29 = vpack.c.bf16 %v1426_v14, %v1425_v45  ;;  %v959_v45 = vld [vmem:[#allocation2 + $0x24] sm:$0xff]  ;;  %v960_v14 = vld [vmem:[#allocation2 + $0x2c] sm:$0xff] }
 0x181   : > { %1843 = vmatprep.mubr.f32.mxu0 %v7347_v62  ;;  %5746 = vmatpush1.bf16.msra.mxu0 %v5745_v26  ;;  %v1427_v62 = vld [vmem:[#allocation7 + $0x2f0] sm:$0xff]  ;;  %v1434_v26 = vld [vmem:[#allocation7 + $0x328] sm:$0xff] }
 0x182   : > { %5747 = vmatprep.subr.bf16.mxu0 %v8714_v10  ;;  %v5766_v31 = vpack.c.bf16 %v1434_v26, %v1433_v48  ;;  %5481 = vmatprep.mubr.f32.mxu1 %v959_v45  ;;  %v1453_v48 = vld [vmem:[#allocation7 + $0x3c0] sm:$0xff]  ;;  %v1454_v26 = vld [vmem:[#allocation7 + $0x3c8] sm:$0xff] }
 0x183   : > { %v969_v45 = vld [vmem:[#allocation2 + $0x74] sm:$0xff] }
 0x184   : > { %1844 = vmatmul.mubr.f32.gmra.mrb[24].mxu0 %v7198_v30  ;;  %v5757_v30 = vpack.c.bf16 %v1428_v60, %v1427_v62  ;;  %v7508_v60 = vld [vmem:[#allocation2 + $0x33] sm:$0xff] }
 0x185   : > { %1848 = vmatprep.mubr.f32.mxu0 %v7351_v9  ;;  %5749 = vmatpush1.bf16.msra.mxu0 %v5748_v27  ;;  %v8722_v9 = vld [vmem:[#allocation29_spill] sm:$0xff]  ;;  %v7503_v27 = vld [vmem:[#allocation2 + $0x2b] sm:$0xff] }
 0x186   : > { %5750 = vmatprep.subr.bf16.mxu0 %v8714_v10 }
 0x188   : > { %1849 = vmatmul.mubr.f32.gmra.mrb[26].mxu0 %v7202_v32  ;;  %v8715_v32 = vld [vmem:[#allocation18_spill] sm:$0xff] }
 0x189   : > { %1853 = vmatprep.mubr.f32.mxu0 %v7355_v25  ;;  %5752 = vmatpush1.bf16.msra.mxu0 %v5751_v28  ;;  %v1465_v25 = vld [vmem:[#allocation7 + $0x420] sm:$0xff]  ;;  %v1436_v28 = vld [vmem:[#allocation7 + $0x338] sm:$0xff] }
 0x18a   : > { %5753 = vmatprep.subr.bf16.mxu0 %v8714_v10  ;;  %v5769_v62 = vpack.c.bf16 %v1436_v28, %v1435_v41  ;;  %v1455_v41 = vld [vmem:[#allocation7 + $0x3d0] sm:$0xff]  ;;  %v1456_v28 = vld [vmem:[#allocation7 + $0x3d8] sm:$0xff] }
 0x18c   : > { %1854 = vmatmul.mubr.f32.gmra.mrb[28].mxu0 %v7207_v35  ;;  %v8716_v35 = vld [vmem:[#allocation26_spill] sm:$0xff] }
 0x18d   : > { %1858 = vmatprep.mubr.f32.mxu0 %v7359_v37  ;;  %5755 = vmatpush1.bf16.msra.mxu0 %v5754_v29  ;;  %v1466_v37 = vld [vmem:[#allocation7 + $0x428] sm:$0xff] }
 0x18e   : > { %5756 = vmatprep.subr.bf16.mxu0 %v8714_v10  ;;  %v6644_v29 = vld [vmem:[#allocation2 + $0x22] sm:$0xff] }
 0x190   : > { %1859 = vmatmul.mubr.f32.gmra.mrb[30].mxu0 %v7213_v42  ;;  %v8717_v42 = vld [vmem:[#allocation19_spill] sm:$0xff] }
 0x191   : > { %1863 = vmatprep.mubr.f32.mxu0 %v7363_v39  ;;  %5758 = vmatpush1.bf16.msra.mxu0 %v5757_v30  ;;  %v5815_v39 = vpack.c.bf16 %v1466_v37, %v1465_v25  ;;  %v1437_v30 = vld [vmem:[#allocation7 + $0x340] sm:$0xff]  ;;  %v7520_v25 = vld [vmem:[#allocation2 + $0x4b] sm:$0xff] }
 0x192   : > { %5759 = vmatprep.subr.bf16.mxu0 %v8714_v10 }
 0x194   : > { %1864 = vmatmul.mubr.f32.gmra.mrb[32].mxu0 %v7217_v43  ;;  %v8718_v43 = vld [vmem:[#allocation27_spill] sm:$0xff] }
 0x195   : > { %1868 = vmatprep.mubr.f32.mxu0 %v7366_v49  ;;  %v8723_v49 = vld [vmem:[#allocation22_spill] sm:$0xff] }
 0x198   : > { %1869 = vmatmul.mubr.f32.gmra.mrb[34].mxu0 %v7220_v44  ;;  %v1461_v44 = vld [vmem:[#allocation7 + $0x400] sm:$0xff] }
 0x199   : > { %1873 = vmatprep.mubr.f32.mxu0 %v7369_v61  ;;  %v8724_v61 = vld [vmem:[#allocation30_spill] sm:$0xff] }
 0x19c   : > { %1874 = vmatmul.mubr.f32.gmra.mrb[36].mxu0 %v7225_v46  ;;  %v1462_v46 = vld [vmem:[#allocation7 + $0x408] sm:$0xff] }
 0x19d   : > { %1878 = vmatprep.mubr.f32.mxu0 %v7372_v1  ;;  %v1467_v1 = vld [vmem:[#allocation7 + $0x430] sm:$0xff] }
 0x1a0   : > { %1879 = vmatmul.mubr.f32.gmra.mrb[38].mxu0 %v7228_v47  ;;  %v5807_v47 = vpack.c.bf16 %v1462_v46, %v1461_v44  ;;  %v1439_v44 = vld [vmem:[#allocation7 + $0x350] sm:$0xff]  ;;  %v1440_v46 = vld [vmem:[#allocation7 + $0x358] sm:$0xff] }
 0x1a1   : > { %1883 = vmatprep.mubr.f32.mxu0 %v7375_v6  ;;  %v1468_v6 = vld [vmem:[#allocation7 + $0x438] sm:$0xff] }
 0x1a2   : > { %5808 = vmatprep.subr.bf16.mxu1 %v5807_v47 }
 0x1a3   : > { %5810 = vmatpush3.bf16.msra.mxu1 %v5807_v47  ;;  %v961_v47 = vld [vmem:[#allocation2 + $0x34] sm:$0xff] }
 0x1a4   : > { %1884 = vmatmul.mubr.f32.gmra.mrb[40].mxu0 %v7234_v50  ;;  %v8719_v50 = vld [vmem:[#allocation20_spill] sm:$0xff] }
 0x1a5   : > { %1888 = vmatprep.mubr.f32.mxu0 %v7378_v13  ;;  %v651_v13 = vld [vmem:[#allocation2 + $0x111] sm:$0xff] }
 0x1a8   : > { %1889 = vmatmul.mubr.f32.gmra.mrb[42].mxu0 %v7238_v51  ;;  %v8720_v51 = vld [vmem:[#allocation28_spill] sm:$0xff] }
 0x1a9   : > { %1893 = vmatprep.mubr.f32.mxu0 %v7381_v22  ;;  %v5819_v22 = vpack.c.bf16 %v1468_v6, %v1467_v1  ;;  %v964_v1 = vld [vmem:[#allocation2 + $0x4c] sm:$0xff]  ;;  %v6648_v6 = vld [vmem:[#allocation2 + $0x42] sm:$0xff] }
 0x1ac   : > { %1894 = vmatmul.mubr.f32.gmra.mrb[44].mxu0 %v7242_v52  ;;  %v1463_v52 = vld [vmem:[#allocation7 + $0x410] sm:$0xff] }
 0x1ad   : > { %1898 = vmatprep.mubr.f32.mxu0 %v7384_v38  ;;  %v8725_v38 = vld [vmem:[#allocation23_spill] sm:$0xff] }
 0x1b0   : > { %1899 = vmatmul.mubr.f32.gmra.mrb[46].mxu0 %v7245_v53  ;;  %v1464_v53 = vld [vmem:[#allocation7 + $0x418] sm:$0xff] }
 0x1b1   : > { %1903 = vmatprep.mubr.f32.mxu0 %v7387_v55  ;;  %v1469_v55 = vld [vmem:[#allocation7 + $0x440] sm:$0xff] }
 0x1b4   : > { %1904 = vmatmul.mubr.f32.gmra.mrb[48].mxu0 %v7248_v54  ;;  %v5811_v54 = vpack.c.bf16 %v1464_v53, %v1463_v52  ;;  %v5775_v52 = vpack.c.bf16 %v1440_v46, %v1439_v44  ;;  %v7516_v53 = vld [vmem:[#allocation2 + $0x43] sm:$0xff]  ;;  %v7552_v44 = vld [vmem:[#allocation2 + $0x8b] sm:$0xff] }
 0x1b5   : > { %1908 = vmatprep.mubr.f32.mxu0 %v7390_v4  ;;  %v1470_v4 = vld [vmem:[#allocation7 + $0x448] sm:$0xff] }
 0x1b6   : > { %5812 = vmatprep.subr.bf16.mxu1 %v5811_v54  ;;  %v5823_v34 = vpack.c.bf16 %v1470_v4, %v1469_v55  ;;  %v1446_v55 = vld [vmem:[#allocation7 + $0x388] sm:$0xff]  ;;  %v6649_v4 = vld [vmem:[#allocation2 + $0x4a] sm:$0xff] }
 0x1b7   : > { %5814 = vmatpush3.bf16.msra.mxu1 %v5811_v54  ;;  %v1441_v54 = vld [vmem:[#allocation7 + $0x360] sm:$0xff] }
 0x1b8   : > { %1909 = vmatmul.mubr.f32.gmra.mrb[50].mxu0 %v7254_v57  ;;  %v8721_v57 = vld [vmem:[#allocation21_spill] sm:$0xff]  ;;  %5816 = vmatprep.subr.bf16.mxu1 %v5815_v39 }
 0x1b9   : > { %1913 = vmatprep.mubr.f32.mxu0 %v7393_v16  ;;  %v652_v16 = vld [vmem:[#allocation2 + $0x119] sm:$0xff] }
 0x1bb   : > { %5818 = vmatpush3.bf16.msra.mxu1 %v5815_v39  ;;  %v1443_v39 = vld [vmem:[#allocation7 + $0x370] sm:$0xff] }
 0x1bc   : > { %1914 = vmatmul.mubr.f32.gmra.mrb[52].mxu0 %v8715_v32  ;;  %5820 = vmatprep.subr.bf16.mxu1 %v5819_v22  ;;  %v1438_v32 = vld [vmem:[#allocation7 + $0x348] sm:$0xff] }
 0x1bd   : > { %1918 = vmatprep.mubr.f32.mxu0 %v8716_v35  ;;  %v6645_v35 = vld [vmem:[#allocation2 + $0x2a] sm:$0xff] }
 0x1bf   : > { %5822 = vmatpush3.bf16.msra.mxu1 %v5819_v22  ;;  %v7524_v22 = vld [vmem:[#allocation2 + $0x53] sm:$0xff] }
 0x1c0   : > { %1919 = vmatmul.mubr.f32.gmra.mrb[54].mxu0 %v8717_v42  ;;  %5824 = vmatprep.subr.bf16.mxu1 %v5823_v34  ;;  %v7512_v42 = vld [vmem:[#allocation2 + $0x3b] sm:$0xff] }
 0x1c1   : > { %1923 = vmatprep.mubr.f32.mxu0 %v8718_v43  ;;  %v5772_v43 = vpack.c.bf16 %v1438_v32, %v1437_v30  ;;  %v7548_v30 = vld [vmem:[#allocation2 + $0x83] sm:$0xff]  ;;  %v1457_v32 = vld [vmem:[#allocation7 + $0x3e0] sm:$0xff] }
 0x1c3   : > { %5826 = vmatpush3.bf16.msra.mxu1 %v5823_v34 }
 0x1c4   : > { %1924 = vmatmul.mubr.f32.gmra.mrb[56].mxu0 %v8719_v50  ;;  %5828 = vmatprep.subr.bf16.mxu1 %v5827_v18  ;;  %v962_v50 = vld [vmem:[#allocation2 + $0x3c] sm:$0xff] }
 0x1c5   : > { %1928 = vmatprep.mubr.f32.mxu0 %v8720_v51  ;;  %v6646_v51 = vld [vmem:[#allocation2 + $0x32] sm:$0xff] }
 0x1c7   : > { %5830 = vmatpush3.bf16.msra.mxu1 %v5827_v18  ;;  %v7532_v18 = vld [vmem:[#allocation2 + $0x63] sm:$0xff] }
 0x1c8   : > { %1929 = vmatmul.mubr.f32.gmra.mrb[58].mxu0 %v8721_v57  ;;  %5832 = vmatprep.subr.bf16.mxu1 %v5831_v11  ;;  %v1442_v57 = vld [vmem:[#allocation7 + $0x368] sm:$0xff] }
 0x1c9   : > { %1933 = vmatprep.mubr.f32.mxu0 %v8722_v9  ;;  %v6647_v9 = vld [vmem:[#allocation2 + $0x3a] sm:$0xff]  ;;  %v5778_v37 = vpack.c.bf16 %v1442_v57, %v1441_v54  ;;  %v6656_v54 = vld [vmem:[#allocation2 + $0x82] sm:$0xff] }
 0x1cb   : > { %5834 = vmatpush3.bf16.msra.mxu1 %v5831_v11  ;;  %v967_v11 = vld [vmem:[#allocation2 + $0x64] sm:$0xff] }
 0x1cc   : > { %1934 = vmatmul.mubr.f32.gmra.mrb[60].mxu0 %v8723_v49  ;;  %5836 = vmatprep.subr.bf16.mxu1 %v5835_v12  ;;  %v1444_v49 = vld [vmem:[#allocation7 + $0x378] sm:$0xff] }
 0x1cd   : > { %1938 = vmatprep.mubr.f32.mxu0 %v8724_v61  ;;  %v963_v61 = vld [vmem:[#allocation2 + $0x44] sm:$0xff] }
 0x1cf   : > { %5838 = vmatpush3.bf16.msra.mxu1 %v5835_v12  ;;  %v6653_v12 = vld [vmem:[#allocation2 + $0x6a] sm:$0xff] }
 0x1d0   : > { %1939 = vmatmul.mubr.f32.gmra.mrb[62].mxu0 %v8725_v38  ;;  %5839 = vmatprep.subr.bf16.mxu1 %v8714_v10  ;;  %v1445_v38 = vld [vmem:[#allocation7 + $0x380] sm:$0xff] }
 0x1d1   : > { %1943 = vmatprep.mubr.f32.mxu0 %v651_v13  ;;  %v5781_v13 = vpack.c.bf16 %v1444_v49, %v1443_v39  ;;  %v5784_v34 = vpack.c.bf16 %v1446_v55, %v1445_v38  ;;  %v7560_v39 = vld [vmem:[#allocation2 + $0x9b] sm:$0xff]  ;;  %v7566_v38 = vld [vmem:[#allocation2 + $0xab] sm:$0xff] }
 0x1d2   : > { %5482 = vmatmul.mubr.f32.vlgmr.msra.gmra.mrb[0].mxu1 %v960_v14  ;;  %v970_v14 = vld [vmem:[#allocation2 + $0x7c] sm:$0xff]  ;;  %v973_v49 = vld [vmem:[#allocation2 + $0x94] sm:$0xff]  ;;  %v975_v55 = vld [vmem:[#allocation2 + $0xa4] sm:$0xff] }
 0x1d3   : > { %5484 = vmatprep.mubr.f32.mxu1 %v961_v47  ;;  %v1459_v47 = vld [vmem:[#allocation7 + $0x3f0] sm:$0xff] }
 0x1d4   : > { %1944 = vmatmul.mubr.f32.gmra.mrb[64].mxu0 %v8726_v0  ;;  %v1447_v0 = vld [vmem:[#allocation7 + $0x390] sm:$0xff] }
 0x1d5   : > { %1948 = vmatprep.mubr.f32.mxu0 %v652_v16  ;;  %v7528_v16 = vld [vmem:[#allocation2 + $0x5b] sm:$0xff]  ;;  %v5787_v2 = vpack.c.bf16 %v1448_v59, %v1447_v0  ;;  %v7569_v0 = vld [vmem:[#allocation2 + $0xb3] sm:$0xff]  ;;  %v6661_v59 = vld [vmem:[#allocation2 + $0xaa] sm:$0xff] }
 0x1d6   : > { %5485 = vmatmul.mubr.f32.gmra.mrb[2].mxu1 %v962_v50  ;;  %v1460_v50 = vld [vmem:[#allocation7 + $0x3f8] sm:$0xff] }
 0x1d7   : > { %5487 = vmatprep.mubr.f32.mxu1 %v963_v61  ;;  %v5805_v57 = vpack.c.bf16 %v1460_v50, %v1459_v47  ;;  %v974_v61 = vld [vmem:[#allocation2 + $0x9c] sm:$0xff] }
 0x1d8   : > { %1949 = vmatmul.mubr.f32.gmra.mrb[66].mxu0 %v8727_v8  ;;  %v1449_v8 = vld [vmem:[#allocation7 + $0x3a0] sm:$0xff]  ;;  %v7599_v47 = vld [vmem:[#allocation2 + $0x103] sm:$0xff] }
 0x1d9   : > { %2018 = vmatprep.mubr.f32.mxu0 %v755_v17  ;;  %v966_v17 = vld [vmem:[#allocation2 + $0x5c] sm:$0xff] }
 0x1da   : > { %5488 = vmatmul.mubr.f32.gmra.mrb[4].mxu1 %v964_v1  ;;  %v6658_v1 = vld [vmem:[#allocation2 + $0x92] sm:$0xff]  ;;  %v6671_v50 = vld [vmem:[#allocation2 + $0xfa] sm:$0xff] }
 0x1db   : > { %5490 = vmatprep.mubr.f32.mxu1 %v965_v7  ;;  %v7572_v7 = vld [vmem:[#allocation2 + $0xbb] sm:$0xff] }
 0x1dc   : > { %2019 = vmatmul.mubr.f32.vlgmr.msra.gmra.mrb[0].mxu0 %v6642_v21  ;;  %v968_v21 = vld [vmem:[#allocation2 + $0x6c] sm:$0xff] }
 0x1dd   : > { %5761 = vmatpush1.bf16.msra.mxu0 %v5760_v15  ;;  %2023 = vmatprep.mubr.f32.mxu0 %v756_v63  ;;  %v1450_v15 = vld [vmem:[#allocation7 + $0x3a8] sm:$0xff] }
 0x1de   : > { %5762 = vmatprep.subr.bf16.mxu0 %v8714_v10  ;;  %5491 = vmatmul.mubr.f32.gmra.mrb[6].mxu1 %v966_v17  ;;  %v5790_v63 = vpack.c.bf16 %v1450_v15, %v1449_v8  ;;  %v977_v17 = vld [vmem:[#allocation2 + $0xb4] sm:$0xff]  ;;  %v7575_v8 = vld [vmem:[#allocation2 + $0xc3] sm:$0xff] }
 0x1df   : > { %5493 = vmatprep.mubr.f32.mxu1 %v967_v11  ;;  %v6663_v15 = vld [vmem:[#allocation2 + $0xba] sm:$0xff] }
 0x1e0   : > { %2024 = vmatmul.mubr.f32.gmra.mrb[2].mxu0 %v6643_v5  ;;  %v7544_v5 = vld [vmem:[#allocation2 + $0x7b] sm:$0xff]  ;;  %v7581_v11 = vld [vmem:[#allocation2 + $0xd3] sm:$0xff] }
 0x1e1   : > { %2028 = vmatprep.mubr.f32.mxu0 %v7499_v3  ;;  %5764 = vmatpush1.bf16.msra.mxu0 %v5763_v58  ;;  %v6652_v58 = vld [vmem:[#allocation2 + $0x62] sm:$0xff] }
 0x1e2   : > { %5765 = vmatprep.subr.bf16.mxu0 %v8714_v10  ;;  %5494 = vmatmul.mubr.f32.gmra.mrb[8].mxu1 %v968_v21  ;;  %v6665_v21 = vld [vmem:[#allocation2 + $0xca] sm:$0xff] }
 0x1e3   : > { %5496 = vmatprep.mubr.f32.mxu1 %v969_v45  ;;  %v984_v45 = vld [vmem:[#allocation2 + $0xec] sm:$0xff] }
 0x1e4   : > { %2029 = vmatmul.mubr.f32.gmra.mrb[4].mxu0 %v6644_v29  ;;  %v6654_v29 = vld [vmem:[#allocation2 + $0x72] sm:$0xff] }
 0x1e5   : > { %2033 = vmatprep.mubr.f32.mxu0 %v7503_v27  ;;  %5767 = vmatpush1.bf16.msra.mxu0 %v5766_v31  ;;  %v5796_v31 = vpack.c.bf16 %v1454_v26, %v1453_v48  ;;  %v982_v48 = vld [vmem:[#allocation2 + $0xdc] sm:$0xff]  ;;  %v6666_v26 = vld [vmem:[#allocation2 + $0xd2] sm:$0xff] }
 0x1e6   : > { %5768 = vmatprep.subr.bf16.mxu0 %v8714_v10  ;;  %5497 = vmatmul.mubr.f32.gmra.mrb[10].mxu1 %v970_v14  ;;  %v6668_v14 = vld [vmem:[#allocation2 + $0xe2] sm:$0xff] }
 0x1e8   : > { %2034 = vmatmul.mubr.f32.gmra.mrb[6].mxu0 %v6645_v35  ;;  %v1458_v35 = vld [vmem:[#allocation7 + $0x3e8] sm:$0xff] }
 0x1e9   : > { %2038 = vmatprep.mubr.f32.mxu0 %v7508_v60  ;;  %5770 = vmatpush1.bf16.msra.mxu0 %v5769_v62  ;;  %v5799_v62 = vpack.c.bf16 %v1456_v28, %v1455_v41  ;;  %v5802_v46 = vpack.c.bf16 %v1458_v35, %v1457_v32  ;;  %v7590_v41 = vld [vmem:[#allocation2 + $0xeb] sm:$0xff]  ;;  %v7596_v32 = vld [vmem:[#allocation2 + $0xfb] sm:$0xff] }
 0x1ea   : > { %5771 = vmatprep.subr.bf16.mxu0 %v8714_v10  ;;  %v983_v28 = vld [vmem:[#allocation2 + $0xe4] sm:$0xff]  ;;  %v985_v35 = vld [vmem:[#allocation2 + $0xf4] sm:$0xff] }
 0x1ec   : > { %2039 = vmatmul.mubr.f32.gmra.mrb[8].mxu0 %v6646_v51  ;;  %v971_v51 = vld [vmem:[#allocation2 + $0x84] sm:$0xff] }
 0x1ed   : > { %2043 = vmatprep.mubr.f32.mxu0 %v7512_v42  ;;  %5773 = vmatpush1.bf16.msra.mxu0 %v5772_v43  ;;  %v6655_v43 = vld [vmem:[#allocation2 + $0x7a] sm:$0xff] }
 0x1ee   : > { %5774 = vmatprep.subr.bf16.mxu0 %v8714_v10  ;;  %5499 = vmatprep.mubr.f32.mxu1 %v971_v51  ;;  %v7602_v51 = vld [vmem:[#allocation2 + $0x10b] sm:$0xff] }
 0x1f0   : > { %2044 = vmatmul.mubr.f32.gmra.mrb[10].mxu0 %v6647_v9  ;;  %v7556_v9 = vld [vmem:[#allocation2 + $0x93] sm:$0xff] }
 0x1f1   : > { %2048 = vmatprep.mubr.f32.mxu0 %v7516_v53  ;;  %5776 = vmatpush1.bf16.msra.mxu0 %v5775_v52  ;;  %v972_v52 = vld [vmem:[#allocation2 + $0x8c] sm:$0xff] }
 0x1f2   : > { %5777 = vmatprep.subr.bf16.mxu0 %v8714_v10  ;;  %5500 = vmatmul.mubr.f32.gmra.mrb[12].mxu1 %v972_v52  ;;  %v987_v52 = vld [vmem:[#allocation2 + $0x104] sm:$0xff] }
 0x1f3   : > { %5502 = vmatprep.mubr.f32.mxu1 %v973_v49  ;;  %v6673_v49 = vld [vmem:[#allocation2 + $0x10a] sm:$0xff] }
 0x1f4   : > { %2049 = vmatmul.mubr.f32.gmra.mrb[12].mxu0 %v6648_v6  ;;  %v7563_v6 = vld [vmem:[#allocation2 + $0xa3] sm:$0xff] }
 0x1f5   : > { %2053 = vmatprep.mubr.f32.mxu0 %v7520_v25  ;;  %5779 = vmatpush1.bf16.msra.mxu0 %v5778_v37  ;;  %v6657_v37 = vld [vmem:[#allocation2 + $0x8a] sm:$0xff] }
 0x1f6   : > { %5780 = vmatprep.subr.bf16.mxu0 %v8714_v10  ;;  %5503 = vmatmul.mubr.f32.gmra.mrb[14].mxu1 %v974_v61  ;;  %v7608_v61 = vld [vmem:[#allocation2 + $0x11b] sm:$0xff] }
 0x1f7   : > { %5505 = vmatprep.mubr.f32.mxu1 %v975_v55  ;;  %v8728_v55 = vld [vmem:[#allocation31_spill] sm:$0xff] }
 0x1f8   : > { %2054 = vmatmul.mubr.f32.gmra.mrb[14].mxu0 %v6649_v4  ;;  %v976_v4 = vld [vmem:[#allocation2 + $0xac] sm:$0xff] }
 0x1f9   : > { %2058 = vmatprep.mubr.f32.mxu0 %v7524_v22  ;;  %5782 = vmatpush1.bf16.msra.mxu0 %v5781_v13  ;;  %v6659_v13 = vld [vmem:[#allocation2 + $0x9a] sm:$0xff] }
 0x1fa   : > { %5783 = vmatprep.subr.bf16.mxu0 %v8714_v10  ;;  %5506 = vmatmul.mubr.f32.gmra.mrb[16].mxu1 %v976_v4  ;;  %v823_v4 = vld [vmem:[#allocation2 + $0x22] sm:$0xff] }
 0x1fb   : > { %5508 = vmatprep.mubr.f32.mxu1 %v977_v17  ;;  %v824_v17 = vld [vmem:[#allocation2 + $0x2a] sm:$0xff] }
 0x1fc   : > { %2059 = vmatmul.mubr.f32.gmra.mrb[16].mxu0 %v6650_v56  ;;  %v978_v56 = vld [vmem:[#allocation2 + $0xbc] sm:$0xff] }
 0x1fd   : > { %2063 = vmatprep.mubr.f32.mxu0 %v7528_v16  ;;  %5785 = vmatpush1.bf16.msra.mxu0 %v5784_v34  ;;  %v6660_v34 = vld [vmem:[#allocation2 + $0xa2] sm:$0xff] }
 0x1fe   : > { %5786 = vmatprep.subr.bf16.mxu0 %v8714_v10  ;;  %5509 = vmatmul.mubr.f32.gmra.mrb[18].mxu1 %v978_v56  ;;  %v3788_v56 = vld [vmem:[#allocation9] sm:$0xff] }
 0x200   : > { %2064 = vmatmul.mubr.f32.gmra.mrb[18].mxu0 %v6651_v19  ;;  %v7578_v19 = vld [vmem:[#allocation2 + $0xcb] sm:$0xff] }
 0x201   : > { %2068 = vmatprep.mubr.f32.mxu0 %v7532_v18  ;;  %5788 = vmatpush1.bf16.msra.mxu0 %v5787_v2  ;;  %v6662_v2 = vld [vmem:[#allocation2 + $0xb2] sm:$0xff] }
 0x202   : > { %5789 = vmatprep.subr.bf16.mxu0 %v8714_v10 }
 0x204   : > { %2069 = vmatmul.mubr.f32.gmra.mrb[20].mxu0 %v6652_v58  ;;  %v7584_v58 = vld [vmem:[#allocation2 + $0xdb] sm:$0xff] }
 0x205   : > { %2073 = vmatprep.mubr.f32.mxu0 %v7536_v33  ;;  %5791 = vmatpush1.bf16.msra.mxu0 %v5790_v63  ;;  %v979_v63 = vld [vmem:[#allocation2 + $0xc4] sm:$0xff] }
 0x206   : > { %5792 = vmatprep.subr.bf16.mxu0 %v8714_v10  ;;  %5511 = vmatprep.mubr.f32.mxu1 %v979_v63  ;;  %v825_v63 = vld [vmem:[#allocation2 + $0x32] sm:$0xff] }
 0x207   : > { %5512 = vmatmul.mubr.f32.gmra.mrb[20].mxu1 %v980_v20 }
 0x208   : > { %2074 = vmatmul.mubr.f32.gmra.mrb[22].mxu0 %v6653_v12  ;;  %v7587_v12 = vld [vmem:[#allocation2 + $0xe3] sm:$0xff] }
 0x209   : > { %2078 = vmatprep.mubr.f32.mxu0 %v7540_v24  ;;  %5794 = vmatpush1.bf16.msra.mxu0 %v5793_v36  ;;  %v981_v36 = vld [vmem:[#allocation2 + $0xd4] sm:$0xff] }
 0x20a   : > { %5795 = vmatprep.subr.bf16.mxu0 %v8714_v10  ;;  %5514 = vmatprep.mubr.f32.mxu1 %v981_v36 }
 0x20b   : > { %5515 = vmatmul.mubr.f32.gmra.mrb[22].mxu1 %v982_v48  ;;  %v3794_v48 = vld [vmem:[#allocation9 + $0x30] sm:$0xff] }
 0x20c   : > { %2079 = vmatmul.mubr.f32.gmra.mrb[24].mxu0 %v6654_v29  ;;  %5517 = vmatprep.mubr.f32.mxu1 %v983_v28  ;;  %v7593_v29 = vld [vmem:[#allocation2 + $0xf3] sm:$0xff] }
 0x20d   : > { %2083 = vmatprep.mubr.f32.mxu0 %v7544_v5  ;;  %5797 = vmatpush1.bf16.msra.mxu0 %v5796_v31  ;;  %v6667_v31 = vld [vmem:[#allocation2 + $0xda] sm:$0xff] }
 0x20e   : > { %5798 = vmatprep.subr.bf16.mxu0 %v8714_v10  ;;  %v3796_v28 = vld [vmem:[#allocation9 + $0x40] sm:$0xff] }
 0x20f   : > { %5518 = vmatmul.mubr.f32.gmra.mrb[24].mxu1 %v984_v45  ;;  %v3797_v45 = vld [vmem:[#allocation9 + $0x48] sm:$0xff] }
 0x210   : > { %2084 = vmatmul.mubr.f32.gmra.mrb[26].mxu0 %v6655_v43  ;;  %5520 = vmatprep.mubr.f32.mxu1 %v985_v35  ;;  %v986_v43 = vld [vmem:[#allocation2 + $0xfc] sm:$0xff]  ;;  %v3799_v35 = vld [vmem:[#allocation9 + $0x58] sm:$0xff] }
 0x211   : > { %2088 = vmatprep.mubr.f32.mxu0 %v7548_v30  ;;  %5800 = vmatpush1.bf16.msra.mxu0 %v5799_v62  ;;  %v6669_v62 = vld [vmem:[#allocation2 + $0xea] sm:$0xff] }
 0x212   : > { %5801 = vmatprep.subr.bf16.mxu0 %v8714_v10 }
 0x213   : > { %5521 = vmatmul.mubr.f32.gmra.mrb[26].mxu1 %v986_v43 }
 0x214   : > { %2089 = vmatmul.mubr.f32.gmra.mrb[28].mxu0 %v6656_v54  ;;  %5523 = vmatprep.mubr.f32.mxu1 %v987_v52  ;;  %v988_v54 = vld [vmem:[#allocation2 + $0x10c] sm:$0xff] }
 0x215   : > { %2093 = vmatprep.mubr.f32.mxu0 %v7552_v44  ;;  %5803 = vmatpush1.bf16.msra.mxu0 %v5802_v46  ;;  %v6670_v46 = vld [vmem:[#allocation2 + $0xf2] sm:$0xff] }
 0x216   : > { %5804 = vmatprep.subr.bf16.mxu0 %v8714_v10 }
 0x217   : > { %5524 = vmatmul.mubr.f32.gmra.mrb[28].mxu1 %v988_v54  ;;  %v3802_v54 = vld [vmem:[#allocation9 + $0x70] sm:$0xff] }
 0x218   : > { %2094 = vmatmul.mubr.f32.gmra.mrb[30].mxu0 %v6657_v37  ;;  %v7605_v37 = vld [vmem:[#allocation2 + $0x113] sm:$0xff] }
 0x219   : > { %2098 = vmatprep.mubr.f32.mxu0 %v7556_v9  ;;  %5806 = vmatpush1.bf16.msra.mxu0 %v5805_v57  ;;  %v6672_v57 = vld [vmem:[#allocation2 + $0x102] sm:$0xff] }
 0x21c   : > { %2099 = vmatmul.mubr.f32.gmra.mrb[32].mxu0 %v6658_v1  ;;  %v989_v1 = vld [vmem:[#allocation2 + $0x114] sm:$0xff] }
 0x21d   : > { %2103 = vmatprep.mubr.f32.mxu0 %v7560_v39  ;;  %5526 = vmatprep.mubr.f32.mxu1 %v989_v1  ;;  %v3804_v1 = vld [vmem:[#allocation9 + $0x80] sm:$0xff] }
 0x220   : > { %2104 = vmatmul.mubr.f32.gmra.mrb[34].mxu0 %v6659_v13  ;;  %v990_v13 = vld [vmem:[#allocation2 + $0x11c] sm:$0xff] }
 0x221   : > { %2108 = vmatprep.mubr.f32.mxu0 %v7563_v6  ;;  %5527 = vmatmul.mubr.f32.gmra.mrb[30].mxu1 %v990_v13  ;;  %v3805_v13 = vld [vmem:[#allocation9 + $0x88] sm:$0xff] }
 0x224   : > { %2109 = vmatmul.mubr.f32.gmra.mrb[36].mxu0 %v6660_v34  ;;  %v991_v34 = vld [vmem:[#allocation2 + $0x124] sm:$0xff] }
 0x225   : > { %2113 = vmatprep.mubr.f32.mxu0 %v7566_v38  ;;  %5529 = vmatprep.mubr.f32.mxu1 %v991_v34  ;;  %v3807_v34 = vld [vmem:[#allocation9 + $0x98] sm:$0xff] }
 0x228   : > { %2114 = vmatmul.mubr.f32.gmra.mrb[38].mxu0 %v6661_v59  ;;  %v992_v59 = vld [vmem:[#allocation2 + $0x12c] sm:$0xff] }
 0x229   : > { %2118 = vmatprep.mubr.f32.mxu0 %v7569_v0  ;;  %5530 = vmatmul.mubr.f32.gmra.mrb[32].mxu1 %v992_v59 }
 0x22c   : > { %2119 = vmatmul.mubr.f32.gmra.mrb[40].mxu0 %v6662_v2  ;;  %v3789_v2 = vld [vmem:[#allocation9 + $0x8] sm:$0xff] }
 0x22d   : > { %2123 = vmatprep.mubr.f32.mxu0 %v7572_v7  ;;  %v5840_v20 = vpack.c.bf16 %v3789_v2, %v3788_v56  ;;  %v3809_v56 = vld [vmem:[#allocation9 + $0xa8] sm:$0xff] }
 0x22f   : > { %5841 = vmatpush1.bf16.msra.mxu1 %v5840_v20 }
 0x230   : > { %2124 = vmatmul.mubr.f32.gmra.mrb[42].mxu0 %v6663_v15  ;;  %v3790_v15 = vld [vmem:[#allocation9 + $0x10] sm:$0xff]  ;;  %5842 = vmatprep.subr.bf16.mxu1 %v8714_v10 }
 0x231   : > { %2128 = vmatprep.mubr.f32.mxu0 %v7575_v8 }
 0x234   : > { %2129 = vmatmul.mubr.f32.gmra.mrb[44].mxu0 %v6664_v40  ;;  %v3792_v40 = vld [vmem:[#allocation9 + $0x20] sm:$0xff] }
 0x235   : > { %2133 = vmatprep.mubr.f32.mxu0 %v7578_v19 }
 0x238   : > { %2134 = vmatmul.mubr.f32.gmra.mrb[46].mxu0 %v6665_v21  ;;  %v3793_v21 = vld [vmem:[#allocation9 + $0x28] sm:$0xff] }
 0x239   : > { %2138 = vmatprep.mubr.f32.mxu0 %v7581_v11  ;;  %v5846_v36 = vpack.c.bf16 %v3793_v21, %v3792_v40  ;;  %v837_v21 = vld [vmem:[#allocation2 + $0x92] sm:$0xff] }
 0x23c   : > { %2139 = vmatmul.mubr.f32.gmra.mrb[48].mxu0 %v6666_v26  ;;  %v827_v26 = vld [vmem:[#allocation2 + $0x42] sm:$0xff] }
 0x23d   : > { %2143 = vmatprep.mubr.f32.mxu0 %v7584_v58 }
 0x240   : > { %2144 = vmatmul.mubr.f32.gmra.mrb[50].mxu0 %v6667_v31 }
 0x241   : > { %2148 = vmatprep.mubr.f32.mxu0 %v7587_v12 }
 0x244   : > { %2149 = vmatmul.mubr.f32.gmra.mrb[52].mxu0 %v6668_v14  ;;  %v5852_v14 = vpack.c.bf16 %v3797_v45, %v3796_v28  ;;  %v3817_v28 = vld [vmem:[#allocation9 + $0xe8] sm:$0xff] }
 0x245   : > { %2153 = vmatprep.mubr.f32.mxu0 %v7590_v41 }
 0x248   : > { %2154 = vmatmul.mubr.f32.gmra.mrb[54].mxu0 %v6669_v62  ;;  %v3798_v62 = vld [vmem:[#allocation9 + $0x50] sm:$0xff] }
 0x249   : > { %2158 = vmatprep.mubr.f32.mxu0 %v7593_v29  ;;  %v5855_v43 = vpack.c.bf16 %v3799_v35, %v3798_v62  ;;  %v3919_v62 = vld [vmem:[#allocation9 + $0x418] sm:$0xff] }
 0x24c   : > { %2159 = vmatmul.mubr.f32.gmra.mrb[56].mxu0 %v6670_v46  ;;  %v3800_v46 = vld [vmem:[#allocation9 + $0x60] sm:$0xff] }
 0x24d   : > { %2163 = vmatprep.mubr.f32.mxu0 %v7596_v32 }
 0x250   : > { %2164 = vmatmul.mubr.f32.gmra.mrb[58].mxu0 %v6671_v50  ;;  %v3801_v50 = vld [vmem:[#allocation9 + $0x68] sm:$0xff] }
 0x251   : > { %2168 = vmatprep.mubr.f32.mxu0 %v7599_v47  ;;  %v5858_v52 = vpack.c.bf16 %v3801_v50, %v3800_v46  ;;  %v3920_v50 = vld [vmem:[#allocation9 + $0x420] sm:$0xff] }
 0x254   : > { %2169 = vmatmul.mubr.f32.gmra.mrb[60].mxu0 %v6672_v57  ;;  %v3803_v57 = vld [vmem:[#allocation9 + $0x78] sm:$0xff] }
 0x255   : > { %2173 = vmatprep.mubr.f32.mxu0 %v7602_v51 }
 0x258   : > { %2174 = vmatmul.mubr.f32.gmra.mrb[62].mxu0 %v6673_v49  ;;  %v5861_v49 = vpack.c.bf16 %v3803_v57, %v3802_v54 }
 0x259   : > { %2178 = vmatprep.mubr.f32.mxu0 %v7605_v37 }
 0x25c   : > { %2179 = vmatmul.mubr.f32.gmra.mrb[64].mxu0 %v8728_v55  ;;  %v5864_v55 = vpack.c.bf16 %v3805_v13, %v3804_v1  ;;  %v3922_v1 = vld [vmem:[#allocation9 + $0x430] sm:$0xff]  ;;  %v3923_v13 = vld [vmem:[#allocation9 + $0x438] sm:$0xff] }
 0x25d   : > { %2183 = vmatprep.mubr.f32.mxu0 %v7608_v61 }
 0x260   : > { %2184 = vmatmul.mubr.f32.gmra.mrb[66].mxu0 %v7416_v23  ;;  %v3791_v23 = vld [vmem:[#allocation9 + $0x18] sm:$0xff] }
 0x261   : > { %2253 = vmatprep.mubr.f32.mxu0 %v7499_v3  ;;  %v5843_v3 = vpack.c.bf16 %v3791_v23, %v3790_v15  ;;  %v3810_v15 = vld [vmem:[#allocation9 + $0xb0] sm:$0xff]  ;;  %v3812_v23 = vld [vmem:[#allocation9 + $0xc0] sm:$0xff] }
 0x263   : > { %5844 = vmatpush1.bf16.msra.mxu1 %v5843_v3  ;;  %v3813_v3 = vld [vmem:[#allocation9 + $0xc8] sm:$0xff] }
 0x264   : > { %2254 = vmatmul.mubr.f32.vlgmr.msra.gmra.mrb[0].mxu0 %v823_v4  ;;  %5845 = vmatprep.subr.bf16.mxu1 %v8714_v10  ;;  %v3806_v4 = vld [vmem:[#allocation9 + $0x90] sm:$0xff]  ;;  %v5876_v40 = vpack.c.bf16 %v3813_v3, %v3812_v23  ;;  %v3928_v23 = vld [vmem:[#allocation9 + $0x460] sm:$0xff] }
 0x265   : > { %2258 = vmatprep.mubr.f32.mxu0 %v7503_v27  ;;  %v826_v27 = vld [vmem:[#allocation2 + $0x3a] sm:$0xff]  ;;  %v5867_v59 = vpack.c.bf16 %v3807_v34, %v3806_v4  ;;  %v848_v4 = vld [vmem:[#allocation2 + $0xea] sm:$0xff] }
 0x266   : > { %v3925_v34 = vld [vmem:[#allocation9 + $0x448] sm:$0xff] }
 0x267   : > { %5847 = vmatpush1.bf16.msra.mxu1 %v5846_v36  ;;  %v842_v36 = vld [vmem:[#allocation2 + $0xba] sm:$0xff] }
 0x268   : > { %2259 = vmatmul.mubr.f32.gmra.mrb[2].mxu0 %v824_v17  ;;  %5848 = vmatprep.subr.bf16.mxu1 %v8714_v10  ;;  %v3808_v17 = vld [vmem:[#allocation9 + $0xa0] sm:$0xff] }
 0x269   : > { %2263 = vmatprep.mubr.f32.mxu0 %v7508_v60  ;;  %v3795_v60 = vld [vmem:[#allocation9 + $0x38] sm:$0xff]  ;;  %v5870_v2 = vpack.c.bf16 %v3809_v56, %v3808_v17  ;;  %v3926_v56 = vld [vmem:[#allocation9 + $0x450] sm:$0xff] }
 0x26a   : > { %v5849_v31 = vpack.c.bf16 %v3795_v60, %v3794_v48  ;;  %v3814_v48 = vld [vmem:[#allocation9 + $0xd0] sm:$0xff] }
 0x26b   : > { %v844_v60 = vld [vmem:[#allocation2 + $0xca] sm:$0xff] }
 0x26c   : > { %2264 = vmatmul.mubr.f32.gmra.mrb[4].mxu0 %v825_v63  ;;  %5850 = vmatpush1.bf16.msra.mxu1 %v5849_v31  ;;  %v3811_v63 = vld [vmem:[#allocation9 + $0xb8] sm:$0xff]  ;;  %v3917_v31 = vld [vmem:[#allocation9 + $0x408] sm:$0xff] }
 0x26d   : > { %2268 = vmatprep.mubr.f32.mxu0 %v7512_v42  ;;  %v828_v42 = vld [vmem:[#allocation2 + $0x4a] sm:$0xff]  ;;  %5851 = vmatprep.subr.bf16.mxu1 %v8714_v10  ;;  %v5873_v20 = vpack.c.bf16 %v3811_v63, %v3810_v15  ;;  %v850_v15 = vld [vmem:[#allocation2 + $0xfa] sm:$0xff] }
 0x26e   : > { %v3820_v63 = vld [vmem:[#allocation9 + $0x100] sm:$0xff] }
 0x270   : > { %2269 = vmatmul.mubr.f32.gmra.mrb[6].mxu0 %v826_v27  ;;  %5853 = vmatpush1.bf16.msra.mxu1 %v5852_v14  ;;  %v840_v27 = vld [vmem:[#allocation2 + $0xaa] sm:$0xff] }
 0x271   : > { %2273 = vmatprep.mubr.f32.mxu0 %v7516_v53  ;;  %v829_v53 = vld [vmem:[#allocation2 + $0x52] sm:$0xff]  ;;  %5854 = vmatprep.subr.bf16.mxu1 %v8714_v10  ;;  %v3918_v14 = vld [vmem:[#allocation9 + $0x410] sm:$0xff] }
 0x272   : > { %v7658_v35 = vpack.c.bf16 %v3919_v62, %v3918_v14 }
 0x274   : > { %2274 = vmatmul.mubr.f32.gmra.mrb[8].mxu0 %v827_v26  ;;  %5856 = vmatpush1.bf16.msra.mxu1 %v5855_v43  ;;  %v3916_v26 = vld [vmem:[#allocation9 + $0x400] sm:$0xff]  ;;  %8729 = vst [vmem:[#allocation18_spill] sm:$0xff] %v7658_v35 }
 0x275   : > { %2278 = vmatprep.mubr.f32.mxu0 %v7520_v25  ;;  %v830_v25 = vld [vmem:[#allocation2 + $0x5a] sm:$0xff]  ;;  %5857 = vmatprep.subr.bf16.mxu1 %v8714_v10 }
 0x276   : > { %v846_v43 = vld [vmem:[#allocation2 + $0xda] sm:$0xff] }
 0x278   : > { %2279 = vmatmul.mubr.f32.gmra.mrb[10].mxu0 %v828_v42  ;;  %5859 = vmatpush1.bf16.msra.mxu1 %v5858_v52 }
 0x279   : > { %2283 = vmatprep.mubr.f32.mxu0 %v7524_v22  ;;  %v831_v22 = vld [vmem:[#allocation2 + $0x62] sm:$0xff]  ;;  %5860 = vmatprep.subr.bf16.mxu1 %v8714_v10 }
 0x27c   : > { %2284 = vmatmul.mubr.f32.gmra.mrb[12].mxu0 %v829_v53  ;;  %5862 = vmatpush1.bf16.msra.mxu1 %v5861_v49  ;;  %v3818_v53 = vld [vmem:[#allocation9 + $0xf0] sm:$0xff]  ;;  %v7673_v49 = vld [vmem:[#allocation2] sm:$0xff] }
 0x27d   : > { %2288 = vmatprep.mubr.f32.mxu0 %v7528_v16  ;;  %v832_v16 = vld [vmem:[#allocation2 + $0x6a] sm:$0xff]  ;;  %5863 = vmatprep.subr.bf16.mxu1 %v8714_v10 }
 0x280   : > { %2289 = vmatmul.mubr.f32.gmra.mrb[14].mxu0 %v830_v25  ;;  %5865 = vmatpush1.bf16.msra.mxu1 %v5864_v55  ;;  %v3921_v25 = vld [vmem:[#allocation9 + $0x428] sm:$0xff]  ;;  %v2939_v55 = vld [vmem:[#allocation2 + $0x9] sm:$0xff] }
 0x281   : > { %2293 = vmatprep.mubr.f32.mxu0 %v7532_v18  ;;  %v833_v18 = vld [vmem:[#allocation2 + $0x72] sm:$0xff]  ;;  %5866 = vmatprep.subr.bf16.mxu1 %v8714_v10  ;;  %v7666_v54 = vpack.c.bf16 %v3921_v25, %v3920_v50  ;;  %v3830_v25 = vld [vmem:[#allocation9 + $0x150] sm:$0xff] }
 0x283   : > { %8730 = vst [vmem:[#allocation26_spill] sm:$0xff] %v7666_v54 }
 0x284   : > { %2294 = vmatmul.mubr.f32.gmra.mrb[16].mxu0 %v831_v22  ;;  %5868 = vmatpush1.bf16.msra.mxu1 %v5867_v59  ;;  %v2938_v22 = vld [vmem:[#allocation2 + $0x1] sm:$0xff] }
 0x285   : > { %2298 = vmatprep.mubr.f32.mxu0 %v7536_v33  ;;  %v834_v33 = vld [vmem:[#allocation2 + $0x7a] sm:$0xff]  ;;  %5869 = vmatprep.subr.bf16.mxu1 %v8714_v10 }
 0x286   : > { %4003 = vmatprep.mubr.f32.mxu1 %v2938_v22  ;;  %v3831_v22 = vld [vmem:[#allocation9 + $0x158] sm:$0xff] }
 0x288   : > { %2299 = vmatmul.mubr.f32.gmra.mrb[18].mxu0 %v832_v16  ;;  %5871 = vmatpush1.bf16.msra.mxu1 %v5870_v2  ;;  %v7677_v16 = vpack.c.bf16 %v3923_v13, %v3922_v1  ;;  %v3832_v13 = vld [vmem:[#allocation9 + $0x160] sm:$0xff] }
 0x289   : > { %2303 = vmatprep.mubr.f32.mxu0 %v7540_v24  ;;  %v835_v24 = vld [vmem:[#allocation2 + $0x82] sm:$0xff]  ;;  %5872 = vmatprep.subr.bf16.mxu1 %v8714_v10 }
 0x28a   : > { %8731 = vst [vmem:[#allocation19_spill] sm:$0xff] %v7677_v16 }
 0x28c   : > { %2304 = vmatmul.mubr.f32.gmra.mrb[20].mxu0 %v833_v18  ;;  %5874 = vmatpush1.bf16.msra.mxu1 %v5873_v20 }
 0x28d   : > { %2308 = vmatprep.mubr.f32.mxu0 %v7544_v5  ;;  %v836_v5 = vld [vmem:[#allocation2 + $0x8a] sm:$0xff]  ;;  %5875 = vmatprep.subr.bf16.mxu1 %v8714_v10 }
 0x290   : > { %2309 = vmatmul.mubr.f32.gmra.mrb[22].mxu0 %v834_v33  ;;  %5877 = vmatpush1.bf16.msra.mxu1 %v5876_v40  ;;  %v3927_v33 = vld [vmem:[#allocation9 + $0x458] sm:$0xff] }
 0x291   : > { %2313 = vmatprep.mubr.f32.mxu0 %v7548_v30  ;;  %5878 = vmatprep.subr.bf16.mxu1 %v8714_v10  ;;  %v838_v30 = vld [vmem:[#allocation2 + $0x9a] sm:$0xff]  ;;  %v7692_v2 = vpack.c.bf16 %v3927_v33, %v3926_v56  ;;  %v3835_v56 = vld [vmem:[#allocation9 + $0x178] sm:$0xff] }
 0x293   : > { %8733 = vst [vmem:[#allocation20_spill] sm:$0xff] %v7692_v2 }
 0x294   : > { %2314 = vmatmul.mubr.f32.gmra.mrb[24].mxu0 %v835_v24  ;;  %v3821_v24 = vld [vmem:[#allocation9 + $0x108] sm:$0xff] }
 0x295   : > { %2318 = vmatprep.mubr.f32.mxu0 %v7552_v44  ;;  %v839_v44 = vld [vmem:[#allocation2 + $0xa2] sm:$0xff]  ;;  %v5888_v20 = vpack.c.bf16 %v3821_v24, %v3820_v63  ;;  %v3836_v24 = vld [vmem:[#allocation9 + $0x180] sm:$0xff] }
 0x298   : > { %2319 = vmatmul.mubr.f32.gmra.mrb[26].mxu0 %v836_v5 }
 0x299   : > { %2323 = vmatprep.mubr.f32.mxu0 %v7556_v9  ;;  %v841_v9 = vld [vmem:[#allocation2 + $0xb2] sm:$0xff] }
 0x29c   : > { %2324 = vmatmul.mubr.f32.gmra.mrb[28].mxu0 %v837_v21  ;;  %v3930_v21 = vld [vmem:[#allocation9 + $0x470] sm:$0xff] }
 0x29d   : > { %2328 = vmatprep.mubr.f32.mxu0 %v7560_v39  ;;  %v843_v39 = vld [vmem:[#allocation2 + $0xc2] sm:$0xff] }
 0x2a0   : > { %2329 = vmatmul.mubr.f32.gmra.mrb[30].mxu0 %v838_v30  ;;  %v3931_v30 = vld [vmem:[#allocation9 + $0x478] sm:$0xff] }
 0x2a1   : > { %2333 = vmatprep.mubr.f32.mxu0 %v7563_v6  ;;  %v3815_v6 = vld [vmem:[#allocation9 + $0xd8] sm:$0xff] }
 0x2a4   : > { %2334 = vmatmul.mubr.f32.gmra.mrb[32].mxu0 %v839_v44  ;;  %v7707_v44 = vpack.c.bf16 %v3931_v30, %v3930_v21  ;;  %v3838_v21 = vld [vmem:[#allocation9 + $0x190] sm:$0xff]  ;;  %v3839_v30 = vld [vmem:[#allocation9 + $0x198] sm:$0xff] }
 0x2a5   : > { %2338 = vmatprep.mubr.f32.mxu0 %v7566_v38  ;;  %v5879_v38 = vpack.c.bf16 %v3815_v6, %v3814_v48  ;;  %v7652_v45 = vpop.f32.mrb[0].mxu1  ;;  %v6675_v6 = vld [vmem:[#allocation2 + $0x112] sm:$0xff] }
 0x2a6   : > { %v7655_v42 = vpop.f32.mrb[1].mxu1  ;;  %8735 = vst [vmem:[#allocation21_spill] sm:$0xff] %v7707_v44 }
 0x2a7   : > { %5880 = vmatpush1.bf16.msra.mxu1 %v5879_v38  ;;  %v923_v38 = vld [vmem:[#allocation2 + $0x123] sm:$0xff] }
 0x2a8   : > { %2339 = vmatmul.mubr.f32.gmra.mrb[34].mxu0 %v840_v27  ;;  %5881 = vmatprep.subr.bf16.mxu1 %v8714_v10  ;;  %v852_v27 = vld [vmem:[#allocation2 + $0x10a] sm:$0xff] }
 0x2a9   : > { %2343 = vmatprep.mubr.f32.mxu0 %v7569_v0  ;;  %v7648_v0 = vpack.c.bf16 %v3917_v31, %v3916_v26  ;;  %v7664_v52 = vpop.f32.mrb[2].mxu1 }
 0x2aa   : > { %v7668_v57 = vpop.f32.mrb[3].mxu1 }
 0x2ab   : > { %6032 = vmatprep.subr.bf16.mxu0 %v7648_v0 }
 0x2ac   : > { %2344 = vmatmul.mubr.f32.gmra.mrb[36].mxu0 %v841_v9  ;;  %v3822_v9 = vld [vmem:[#allocation9 + $0x110] sm:$0xff] }
 0x2ad   : > { %2348 = vmatprep.mubr.f32.mxu0 %v7572_v7  ;;  %v3816_v7 = vld [vmem:[#allocation9 + $0xe0] sm:$0xff]  ;;  %6034 = vmatpush3.bf16.msra.mxu0 %v7648_v0  ;;  %v7683_v18 = vpop.f32.mrb[4].mxu1 }
 0x2ae   : > { %6036 = vmatprep.subr.bf16.mxu0 %v7658_v35  ;;  %v7687_v17 = vpop.f32.mrb[5].mxu1 }
 0x2b0   : > { %2349 = vmatmul.mubr.f32.gmra.mrb[38].mxu0 %v842_v36  ;;  %v3823_v36 = vld [vmem:[#allocation9 + $0x118] sm:$0xff] }
 0x2b1   : > { %2353 = vmatprep.mubr.f32.mxu0 %v7575_v8  ;;  %v845_v8 = vld [vmem:[#allocation2 + $0xd2] sm:$0xff]  ;;  %6038 = vmatpush3.bf16.msra.mxu0 %v7658_v35  ;;  %v7697_v3 = vpop.f32.mrb[6].mxu1 }
 0x2b2   : > { %6040 = vmatprep.subr.bf16.mxu0 %v7666_v54  ;;  %v7701_v40 = vpop.f32.mrb[7].mxu1 }
 0x2b4   : > { %2354 = vmatmul.mubr.f32.gmra.mrb[40].mxu0 %v843_v39 }
 0x2b5   : > { %2358 = vmatprep.mubr.f32.mxu0 %v7578_v19  ;;  %v5882_v19 = vpack.c.bf16 %v3817_v28, %v3816_v7  ;;  %6042 = vmatpush3.bf16.msra.mxu0 %v7666_v54  ;;  %v7712_v39 = vpop.f32.mrb[8].mxu1  ;;  %v6676_v7 = vld [vmem:[#allocation2 + $0x11a] sm:$0xff] }
 0x2b6   : > { %6044 = vmatprep.subr.bf16.mxu0 %v7677_v16  ;;  %v7714_v48 = vpop.f32.mrb[9].mxu1 }
 0x2b7   : > { %5883 = vmatpush1.bf16.msra.mxu1 %v5882_v19 }
 0x2b8   : > { %2359 = vmatmul.mubr.f32.gmra.mrb[42].mxu0 %v844_v60  ;;  %5884 = vmatprep.subr.bf16.mxu1 %v8714_v10  ;;  %v3825_v60 = vld [vmem:[#allocation9 + $0x128] sm:$0xff] }
 0x2b9   : > { %2363 = vmatprep.mubr.f32.mxu0 %v7581_v11  ;;  %v3819_v11 = vld [vmem:[#allocation9 + $0xf8] sm:$0xff]  ;;  %6046 = vmatpush3.bf16.msra.mxu0 %v7677_v16  ;;  %v7719_v31 = vpop.f32.mrb[10].mxu1 }
 0x2ba   : > { %v5885_v46 = vpack.c.bf16 %v3819_v11, %v3818_v53  ;;  %v7721_v28 = vpop.f32.mrb[11].mxu1  ;;  %v3828_v53 = vld [vmem:[#allocation9 + $0x140] sm:$0xff]  ;;  %v3829_v11 = vld [vmem:[#allocation9 + $0x148] sm:$0xff] }
 0x2bc   : > { %2364 = vmatmul.mubr.f32.gmra.mrb[44].mxu0 %v845_v8  ;;  %5886 = vmatpush1.bf16.msra.mxu1 %v5885_v46  ;;  %v3826_v8 = vld [vmem:[#allocation9 + $0x130] sm:$0xff] }
 0x2bd   : > { %2368 = vmatprep.mubr.f32.mxu0 %v7584_v58  ;;  %5887 = vmatprep.subr.bf16.mxu1 %v8714_v10  ;;  %v847_v58 = vld [vmem:[#allocation2 + $0xe2] sm:$0xff] }
 0x2bf   : > { %4004 = vmatmul.mubr.f32.vlgmr.msra.gmra.mrb[34].mxu1 %v7673_v49 }
 0x2c0   : > { %2369 = vmatmul.mubr.f32.gmra.mrb[46].mxu0 %v846_v43  ;;  %4008 = vmatprep.mubr.f32.mxu1 %v2939_v55  ;;  %v5900_v43 = vpack.c.bf16 %v3829_v11, %v3828_v53  ;;  %v3833_v55 = vld [vmem:[#allocation9 + $0x168] sm:$0xff]  ;;  %v3844_v11 = vld [vmem:[#allocation9 + $0x1c0] sm:$0xff] }
 0x2c1   : > { %2373 = vmatprep.mubr.f32.mxu0 %v7587_v12  ;;  %v3924_v12 = vld [vmem:[#allocation9 + $0x440] sm:$0xff]  ;;  %5889 = vmatpush1.bf16.msra.mxu1 %v5888_v20  ;;  %v3837_v20 = vld [vmem:[#allocation9 + $0x188] sm:$0xff] }
 0x2c2   : > { %v7685_v59 = vpack.c.bf16 %v3925_v34, %v3924_v12  ;;  %5890 = vmatprep.subr.bf16.mxu1 %v8714_v10 }
 0x2c3   : > { %4009 = vmatmul.mubr.f32.gmra.mrb[36].mxu1 %v7673_v49 }
 0x2c4   : > { %2374 = vmatmul.mubr.f32.gmra.mrb[48].mxu0 %v847_v58  ;;  %8732 = vst [vmem:[#allocation27_spill] sm:$0xff] %v7685_v59  ;;  %6048 = vmatprep.subr.bf16.mxu0 %v7685_v59  ;;  %v5903_v58 = vpack.c.bf16 %v3831_v22, %v3830_v25  ;;  %v7778_v22 = vld [vmem:[%s8640_s2] ss:$0 sm:$0xff] }
 0x2c5   : > { %2378 = vmatprep.mubr.f32.mxu0 %v7590_v41  ;;  %v849_v41 = vld [vmem:[#allocation2 + $0xf2] sm:$0xff]  ;;  %6050 = vmatpush3.bf16.msra.mxu0 %v7685_v59  ;;  %v7725_v14 = vpop.f32.mrb[12].mxu1 }
 0x2c6   : > { %6052 = vmatprep.subr.bf16.mxu0 %v7692_v2  ;;  %v7728_v62 = vpop.f32.mrb[13].mxu1 }
 0x2c8   : > { %2379 = vmatmul.mubr.f32.gmra.mrb[50].mxu0 %v848_v4  ;;  %v5906_v4 = vpack.c.bf16 %v3833_v55, %v3832_v13 }
 0x2c9   : > { %2383 = vmatprep.mubr.f32.mxu0 %v7593_v29  ;;  %v3929_v29 = vld [vmem:[#allocation9 + $0x468] sm:$0xff]  ;;  %6054 = vmatpush3.bf16.msra.mxu0 %v7692_v2  ;;  %v7731_v46 = vpop.f32.mrb[14].mxu1 }
 0x2ca   : > { %v7699_v5 = vpack.c.bf16 %v3929_v29, %v3928_v23  ;;  %v7733_v50 = vpop.f32.mrb[15].mxu1  ;;  %v5912_v23 = vpack.c.bf16 %v3837_v20, %v3836_v24 }
 0x2cc   : > { %2384 = vmatmul.mubr.f32.gmra.mrb[52].mxu0 %v849_v41  ;;  %8734 = vst [vmem:[#allocation28_spill] sm:$0xff] %v7699_v5  ;;  %6056 = vmatprep.subr.bf16.mxu0 %v7699_v5  ;;  %v3834_v41 = vld [vmem:[#allocation9 + $0x170] sm:$0xff] }
 0x2cd   : > { %2388 = vmatprep.mubr.f32.mxu0 %v7596_v32  ;;  %v851_v32 = vld [vmem:[#allocation2 + $0x102] sm:$0xff]  ;;  %6058 = vmatpush3.bf16.msra.mxu0 %v7699_v5  ;;  %v7736_v1 = vpop.f32.mrb[16].mxu1  ;;  %v5909_v33 = vpack.c.bf16 %v3835_v56, %v3834_v41  ;;  %v7787_v41 = vld [vmem:[%s8641_s3] ss:$0 sm:$0xff] }
 0x2ce   : > { %6060 = vmatprep.subr.bf16.mxu0 %v7707_v44  ;;  %v3846_v56 = vld [vmem:[#allocation9 + $0x1d0] sm:$0xff] }
 0x2d0   : > { %2389 = vmatmul.mubr.f32.gmra.mrb[54].mxu0 %v850_v15 }
 0x2d1   : > { %2393 = vmatprep.mubr.f32.mxu0 %v7599_v47  ;;  %v5891_v47 = vpack.c.bf16 %v3823_v36, %v3822_v9  ;;  %6062 = vmatpush3.bf16.msra.mxu0 %v7707_v44 }
 0x2d3   : > { %5892 = vmatpush1.bf16.msra.mxu1 %v5891_v47  ;;  %v3840_v47 = vld [vmem:[#allocation9 + $0x1a0] sm:$0xff] }
 0x2d4   : > { %2394 = vmatmul.mubr.f32.gmra.mrb[56].mxu0 %v851_v32  ;;  %5893 = vmatprep.subr.bf16.mxu1 %v8714_v10 }
 0x2d5   : > { %2398 = vmatprep.mubr.f32.mxu0 %v7602_v51  ;;  %v3824_v51 = vld [vmem:[#allocation9 + $0x120] sm:$0xff] }
 0x2d6   : > { %v5894_v26 = vpack.c.bf16 %v3825_v60, %v3824_v51 }
 0x2d8   : > { %2399 = vmatmul.mubr.f32.gmra.mrb[58].mxu0 %v852_v27  ;;  %5895 = vmatpush1.bf16.msra.mxu1 %v5894_v26  ;;  %v5915_v27 = vpack.c.bf16 %v3839_v30, %v3838_v21 }
 0x2d9   : > { %2403 = vmatprep.mubr.f32.mxu0 %v7605_v37  ;;  %5896 = vmatprep.subr.bf16.mxu1 %v8714_v10  ;;  %v924_v37 = vld [vmem:[#allocation2 + $0x12b] sm:$0xff] }
 0x2dc   : > { %2404 = vmatmul.mubr.f32.gmra.mrb[60].mxu0 %v6675_v6  ;;  %v3841_v6 = vld [vmem:[#allocation9 + $0x1a8] sm:$0xff] }
 0x2dd   : > { %2408 = vmatprep.mubr.f32.mxu0 %v7608_v61  ;;  %v3827_v61 = vld [vmem:[#allocation9 + $0x138] sm:$0xff]  ;;  %v5918_v51 = vpack.c.bf16 %v3841_v6, %v3840_v47 }
 0x2de   : > { %v5897_v19 = vpack.c.bf16 %v3827_v61, %v3826_v8  ;;  %v3843_v8 = vld [vmem:[#allocation9 + $0x1b8] sm:$0xff] }
 0x2e0   : > { %2409 = vmatmul.mubr.f32.gmra.mrb[62].mxu0 %v6676_v7  ;;  %5898 = vmatpush1.bf16.msra.mxu1 %v5897_v19 }
 0x2e1   : > { %2413 = vmatprep.mubr.f32.mxu0 %v923_v38  ;;  %5899 = vmatprep.subr.bf16.mxu1 %v8714_v10 }
 0x2e4   : > { %2414 = vmatmul.mubr.f32.gmra.mrb[64].mxu0 %v7673_v49  ;;  %5901 = vmatpush1.bf16.msra.mxu1 %v5900_v43  ;;  %v3845_v43 = vld [vmem:[#allocation9 + $0x1c8] sm:$0xff] }
 0x2e5   : > { %2418 = vmatprep.mubr.f32.mxu0 %v924_v37  ;;  %5902 = vmatprep.subr.bf16.mxu1 %v8714_v10  ;;  %v3842_v37 = vld [vmem:[#allocation9 + $0x1b0] sm:$0xff]  ;;  %v5924_v25 = vpack.c.bf16 %v3845_v43, %v3844_v11  ;;  %v2769_v11 = vld [vmem:[#allocation10 + $0x8] sm:$0xff] }
 0x2e6   : > { %v5921_v61 = vpack.c.bf16 %v3843_v8, %v3842_v37 }
 0x2e8   : > { %2419 = vmatmul.mubr.f32.gmra.mrb[66].mxu0 %v7673_v49  ;;  %5904 = vmatpush1.bf16.msra.mxu1 %v5903_v58  ;;  %v7738_v49 = vpop.f32.mrb[17].mxu1 }
 0x2e9   : > { %5905 = vmatprep.subr.bf16.mxu1 %v8714_v10  ;;  %v7741_v12 = vpop.f32.mrb[18].mxu1 }
 0x2ea   : > { %v7743_v34 = vpop.f32.mrb[19].mxu1 }
 0x2eb   : > { %v7746_v15 = vpop.f32.mrb[20].mxu1 }
 0x2ec   : > { %5907 = vmatpush1.bf16.msra.mxu1 %v5906_v4  ;;  %v7748_v63 = vpop.f32.mrb[21].mxu1 }
 0x2ed   : > { %5908 = vmatprep.subr.bf16.mxu1 %v8714_v10  ;;  %v7751_v29 = vpop.f32.mrb[22].mxu1 }
 0x2ee   : > { %v7753_v32 = vpop.f32.mrb[23].mxu1 }
 0x2ef   : > { %v7756_v9 = vpop.f32.mrb[24].mxu1 }
 0x2f0   : > { %5910 = vmatpush1.bf16.msra.mxu1 %v5909_v33  ;;  %v7758_v36 = vpop.f32.mrb[25].mxu1  ;;  %v3847_v33 = vld [vmem:[#allocation9 + $0x1d8] sm:$0xff] }
 0x2f1   : > { %5911 = vmatprep.subr.bf16.mxu1 %v8714_v10  ;;  %v7761_v60 = vpop.f32.mrb[26].mxu1 }
 0x2f2   : > { %v7763_v38 = vpop.f32.mrb[27].mxu1 }
 0x2f3   : > { %v7766_v26 = vpop.f32.mrb[28].mxu1 }
 0x2f4   : > { %5913 = vmatpush1.bf16.msra.mxu1 %v5912_v23  ;;  %v7768_v7 = vpop.f32.mrb[29].mxu1  ;;  %v5927_v23 = vpack.c.bf16 %v3847_v33, %v3846_v56 }
 0x2f5   : > { %5914 = vmatprep.subr.bf16.mxu1 %v8714_v10  ;;  %v7771_v19 = vpop.f32.mrb[30].mxu1 }
 0x2f6   : > { %v7773_v53 = vpop.f32.mrb[31].mxu1 }
 0x2f8   : > { %5916 = vmatpush1.bf16.msra.mxu1 %v5915_v27  ;;  %v2768_v27 = vld [vmem:[#allocation10] sm:$0xff] }
 0x2f9   : > { %5917 = vmatprep.subr.bf16.mxu1 %v8714_v10 }
 0x2fc   : > { %5919 = vmatpush1.bf16.msra.mxu1 %v5918_v51  ;;  %v7782_v4 = vpop.f32.mrb[32].mxu1 }
 0x2fd   : > { %5920 = vmatprep.subr.bf16.mxu1 %v8714_v10  ;;  %v7789_v24 = vpop.f32.mrb[33].mxu1 }
 0x300   : > { %5922 = vmatpush1.bf16.msra.mxu1 %v5921_v61 }
 0x301   : > { %5923 = vmatprep.subr.bf16.mxu1 %v8714_v10 }
 0x304   : > { %5925 = vmatpush1.bf16.msra.mxu1 %v5924_v25 }
 0x305   : > { %5926 = vmatprep.subr.bf16.mxu1 %v8714_v10 }
 0x308   : > { %5928 = vmatpush1.bf16.msra.mxu1 %v5927_v23 }
 0x309   : > { %5929 = vmatprep.subr.bf16.mxu1 %v8714_v10 }
 0x337   : > { %v2255_v58 = vpop.f32.mrb[0].mxu0 }
 0x338   : > { %v6079_v13 = vadd.f32 %v7778_v22, %v2255_v58  ;;  %v2257_v55 = vpop.f32.mrb[1].mxu0  ;;  %v3848_v58 = vld [vmem:[#allocation9 + $0x1e0] sm:$0xff] }
 0x33a   : > { %v2491_v20 = vadd.f32 %v6079_v13, %v7655_v42  ;;  %v3849_v13 = vld [vmem:[#allocation9 + $0x1e8] sm:$0xff] }
 0x33b   : > { %v2260_v21 = vpop.f32.mrb[2].mxu0  ;;  %v5930_v55 = vpack.c.bf16 %v3849_v13, %v3848_v58 }
 0x33c   : > { %vm2659_vm0 = vcmp.gt.f32.partialorder %v2491_v20, 0.0  ;;  %v2700_v30 = vmul.f32 %v7787_v41, %v2491_v20  ;;  %v6080_v47 = vadd.f32 %v7778_v22, %v2260_v21  ;;  %v2262_v6 = vpop.f32.mrb[3].mxu0  ;;  %v2770_v21 = vld [vmem:[#allocation10 + $0x10] sm:$0xff] }
 0x33d   : > { %5931 = vmatpush1.bf16.msra.mxu1 %v5930_v55  ;;  %v3851_v6 = vld [vmem:[#allocation9 + $0x1f8] sm:$0xff] }
 0x33e   : > { %v2734_v51 = vsel %vm2659_vm0, %v2491_v20, %v2700_v30  ;;  %v2496_v37 = vadd.f32 %v6080_v47, %v7652_v45  ;;  %5932 = vmatprep.subr.bf16.mxu1 %v8714_v10  ;;  %v3850_v47 = vld [vmem:[#allocation9 + $0x1f0] sm:$0xff] }
 0x33f   : > { %v2802_v8 = vmul.f32 %v2768_v27, %v2734_v51  ;;  %v2265_v61 = vpop.f32.mrb[4].mxu0  ;;  %v5933_v51 = vpack.c.bf16 %v3851_v6, %v3850_v47 }
 0x340   : > { %vm2660_vm1 = vcmp.gt.f32.partialorder %v2496_v37, 0.0  ;;  %v2701_v42 = vmul.f32 %v7787_v41, %v2496_v37  ;;  %v6081_v43 = vadd.f32 %v7778_v22, %v2265_v61  ;;  %v2267_v25 = vpop.f32.mrb[5].mxu0 }
 0x341   : > { %2836 = vst [vmem:[#allocation2 + $0x12] sm:$0xff] %v2802_v8  ;;  %5934 = vmatpush1.bf16.msra.mxu1 %v5933_v51 }
 0x342   : > { %v2735_v56 = vsel %vm2660_vm1, %v2496_v37, %v2701_v42  ;;  %v2501_v33 = vadd.f32 %v6081_v43, %v7668_v57  ;;  %5935 = vmatprep.subr.bf16.mxu1 %v8714_v10 }
 0x343   : > { %v2803_v23 = vmul.f32 %v2769_v11, %v2735_v56  ;;  %v2270_v20 = vpop.f32.mrb[6].mxu0  ;;  %v2771_v11 = vld [vmem:[#allocation10 + $0x18] sm:$0xff] }
 0x344   : > { %vm2661_vm2 = vcmp.gt.f32.partialorder %v2501_v33, 0.0  ;;  %v2702_v45 = vmul.f32 %v7787_v41, %v2501_v33  ;;  %v6082_v30 = vadd.f32 %v7778_v22, %v2270_v20  ;;  %v2272_v27 = vpop.f32.mrb[7].mxu0  ;;  %v2772_v20 = vld [vmem:[#allocation10 + $0x20] sm:$0xff] }
 0x345   : > { %2837 = vst [vmem:[#allocation2 + $0x1a] sm:$0xff] %v2803_v23 }
 0x346   : > { %v2736_v8 = vsel %vm2661_vm2, %v2501_v33, %v2702_v45  ;;  %v2506_v37 = vadd.f32 %v6082_v30, %v7664_v52 }
 0x347   : > { %v2804_v57 = vmul.f32 %v2770_v21, %v2736_v8  ;;  %v2275_v61 = vpop.f32.mrb[8].mxu0 }
 0x348   : > { %vm2662_vm3 = vcmp.gt.f32.partialorder %v2506_v37, 0.0  ;;  %v2703_v42 = vmul.f32 %v7787_v41, %v2506_v37  ;;  %v6083_v43 = vadd.f32 %v7778_v22, %v2275_v61  ;;  %v2277_v25 = vpop.f32.mrb[9].mxu0  ;;  %v2940_v58 = vld [vmem:[#allocation2 + $0x11] sm:$0xff] }
 0x349   : > { %v2872_v13 = vld [vmem:[#allocation2 + $0x10] sm:$0xff]  ;;  %2838 = vst [vmem:[#allocation2 + $0x22] sm:$0xff] %v2804_v57  ;;  %4013 = vmatprep.mubr.f32.mxu1 %v2940_v58 }
 0x34a   : > { %v2737_v55 = vsel %vm2662_vm3, %v2506_v37, %v2703_v42  ;;  %v2511_v56 = vadd.f32 %v6083_v43, %v7687_v17  ;;  %4014 = vmatmul.mubr.f32.gmra.mrb[38].mxu1 %v2872_v13  ;;  %v2773_v37 = vld [vmem:[#allocation10 + $0x28] sm:$0xff] }
 0x34b   : > { %v2805_v52 = vmul.f32 %v2771_v11, %v2737_v55  ;;  %v2280_v33 = vpop.f32.mrb[10].mxu0 }
 0x34c   : > { %vm2663_vm4 = vcmp.gt.f32.partialorder %v2511_v56, 0.0  ;;  %v2704_v23 = vmul.f32 %v7787_v41, %v2511_v56  ;;  %v6084_v45 = vadd.f32 %v7778_v22, %v2280_v33  ;;  %v2282_v21 = vpop.f32.mrb[11].mxu0  ;;  %v2941_v30 = vld [vmem:[#allocation2 + $0x19] sm:$0xff] }
 0x34d   : > { %v2873_v27 = vld [vmem:[#allocation2 + $0x18] sm:$0xff]  ;;  %2839 = vst [vmem:[#allocation2 + $0x2a] sm:$0xff] %v2805_v52  ;;  %4018 = vmatprep.mubr.f32.mxu1 %v2941_v30  ;;  %v2775_v30 = vld [vmem:[#allocation10 + $0x38] sm:$0xff] }
 0x34e   : > { %v2738_v47 = vsel %vm2663_vm4, %v2511_v56, %v2704_v23  ;;  %v2516_v6 = vadd.f32 %v6084_v45, %v7683_v18  ;;  %4019 = vmatmul.mubr.f32.gmra.mrb[40].mxu1 %v2873_v27  ;;  %v2774_v18 = vld [vmem:[#allocation10 + $0x30] sm:$0xff] }
 0x34f   : > { %v2806_v51 = vmul.f32 %v2772_v20, %v2738_v47  ;;  %v2285_v17 = vpop.f32.mrb[12].mxu0 }
 0x350   : > { %vm2664_vm5 = vcmp.gt.f32.partialorder %v2516_v6, 0.0  ;;  %v2705_v8 = vmul.f32 %v7787_v41, %v2516_v6  ;;  %v6085_v57 = vadd.f32 %v7778_v22, %v2285_v17  ;;  %v2287_v61 = vpop.f32.mrb[13].mxu0  ;;  %v2942_v42 = vld [vmem:[#allocation2 + $0x21] sm:$0xff] }
 0x351   : > { %v2874_v11 = vld [vmem:[#allocation2 + $0x20] sm:$0xff]  ;;  %2840 = vst [vmem:[#allocation2 + $0x32] sm:$0xff] %v2806_v51  ;;  %4023 = vmatprep.mubr.f32.mxu1 %v2942_v42  ;;  %v2776_v42 = vld [vmem:[#allocation10 + $0x40] sm:$0xff] }
 0x352   : > { %v2739_v43 = vsel %vm2664_vm5, %v2516_v6, %v2705_v8  ;;  %v2521_v25 = vadd.f32 %v6085_v57, %v7701_v40  ;;  %4024 = vmatmul.mubr.f32.gmra.mrb[42].mxu1 %v2874_v11 }
 0x353   : > { %v2807_v58 = vmul.f32 %v2773_v37, %v2739_v43  ;;  %v2290_v13 = vpop.f32.mrb[14].mxu0 }
 0x354   : > { %vm2665_vm6 = vcmp.gt.f32.partialorder %v2521_v25, 0.0  ;;  %v2706_v55 = vmul.f32 %v7787_v41, %v2521_v25  ;;  %v6086_v56 = vadd.f32 %v7778_v22, %v2290_v13  ;;  %v2292_v52 = vpop.f32.mrb[15].mxu0  ;;  %v2943_v33 = vld [vmem:[#allocation2 + $0x29] sm:$0xff] }
 0x355   : > { %v3414_v23 = vld [vmem:[#allocation2 + $0x24] sm:$0xff]  ;;  %2841 = vst [vmem:[#allocation2 + $0x3a] sm:$0xff] %v2807_v58  ;;  %4028 = vmatprep.mubr.f32.mxu1 %v2943_v33 }
 0x356   : > { %v2875_v20 = vld [vmem:[#allocation2 + $0x28] sm:$0xff]  ;;  %5564 = vmatprep.mubr.f32.mxu0 %v3414_v23  ;;  %v2740_v45 = vsel %vm2665_vm6, %v2521_v25, %v2706_v55  ;;  %v2526_v21 = vadd.f32 %v6086_v56, %v7697_v3  ;;  %v2777_v33 = vld [vmem:[#allocation10 + $0x48] sm:$0xff] }
 0x357   : > { %4029 = vmatmul.mubr.f32.gmra.mrb[44].mxu1 %v2875_v20  ;;  %v2808_v40 = vmul.f32 %v2774_v18, %v2740_v45  ;;  %v2295_v27 = vpop.f32.mrb[16].mxu0  ;;  %v8054_v35 = vld [vmem:[#allocation2 + $0x2a] sm:$0xff] }
 0x358   : > { %vm2666_vm7 = vcmp.gt.f32.partialorder %v2526_v21, 0.0  ;;  %v2707_v47 = vmul.f32 %v7787_v41, %v2526_v21  ;;  %v6087_v6 = vadd.f32 %v7778_v22, %v2295_v27  ;;  %v2297_v51 = vpop.f32.mrb[17].mxu0  ;;  %v2944_v17 = vld [vmem:[#allocation2 + $0x31] sm:$0xff] }
 0x359   : > { %v3415_v8 = vld [vmem:[#allocation2 + $0x2c] sm:$0xff]  ;;  %2842 = vst [vmem:[#allocation2 + $0x42] sm:$0xff] %v2808_v40  ;;  %4033 = vmatprep.mubr.f32.mxu1 %v2944_v17 }
 0x35a   : > { %v2876_v37 = vld [vmem:[#allocation2 + $0x30] sm:$0xff]  ;;  %5565 = vmatmul.mubr.f32.vlgmr.msra.gmra.mrb[68].mxu0 %v3415_v8  ;;  %v2741_v57 = vsel %vm2666_vm7, %v2526_v21, %v2707_v47  ;;  %v2531_v61 = vadd.f32 %v6087_v6, %v7714_v48  ;;  %v2778_v51 = vld [vmem:[#allocation10 + $0x50] sm:$0xff] }
 0x35b   : > { %4034 = vmatmul.mubr.f32.gmra.mrb[46].mxu1 %v2876_v37  ;;  %v2809_v3 = vmul.f32 %v2775_v30, %v2741_v57  ;;  %v2300_v11 = vpop.f32.mrb[18].mxu0 }
 0x35c   : > { %vm2667_vm8 = vcmp.gt.f32.partialorder %v2531_v61, 0.0  ;;  %v2708_v43 = vmul.f32 %v7787_v41, %v2531_v61  ;;  %v6088_v25 = vadd.f32 %v7778_v22, %v2300_v11  ;;  %v2302_v58 = vpop.f32.mrb[19].mxu0  ;;  %v2945_v18 = vld [vmem:[#allocation2 + $0x39] sm:$0xff] }
 0x35d   : > { %v3416_v13 = vld [vmem:[#allocation2 + $0x34] sm:$0xff]  ;;  %2843 = vst [vmem:[#allocation2 + $0x4a] sm:$0xff] %v2809_v3  ;;  %4038 = vmatprep.mubr.f32.mxu1 %v2945_v18 }
 0x35e   : > { %v2877_v55 = vld [vmem:[#allocation2 + $0x38] sm:$0xff]  ;;  %5567 = vmatprep.mubr.f32.mxu0 %v3416_v13  ;;  %v2742_v56 = vsel %vm2667_vm8, %v2531_v61, %v2708_v43  ;;  %v2536_v52 = vadd.f32 %v6088_v25, %v7712_v39  ;;  %v2779_v25 = vld [vmem:[#allocation10 + $0x58] sm:$0xff] }
 0x35f   : > { %4039 = vmatmul.mubr.f32.gmra.mrb[48].mxu1 %v2877_v55  ;;  %v2810_v48 = vmul.f32 %v2776_v42, %v2742_v56  ;;  %v2305_v23 = vpop.f32.mrb[20].mxu0 }
 0x360   : > { %vm2668_vm9 = vcmp.gt.f32.partialorder %v2536_v52, 0.0  ;;  %v2709_v20 = vmul.f32 %v7787_v41, %v2536_v52  ;;  %v6089_v45 = vadd.f32 %v7778_v22, %v2305_v23  ;;  %v2307_v21 = vpop.f32.mrb[21].mxu0  ;;  %v7824_v40 = vld [vmem:[#allocation2 + $0x41] sm:$0xff] }
 0x361   : > { %v3417_v30 = vld [vmem:[#allocation2 + $0x3c] sm:$0xff]  ;;  %2844 = vst [vmem:[#allocation2 + $0x52] sm:$0xff] %v2810_v48  ;;  %4043 = vmatprep.mubr.f32.mxu1 %v7824_v40 }
 0x362   : > { %v2878_v27 = vld [vmem:[#allocation2 + $0x40] sm:$0xff]  ;;  %5568 = vmatmul.mubr.f32.gmra.mrb[70].mxu0 %v3417_v30  ;;  %v2743_v47 = vsel %vm2668_vm9, %v2536_v52, %v2709_v20  ;;  %v2541_v39 = vadd.f32 %v6089_v45, %v7721_v28  ;;  %v2780_v20 = vld [vmem:[#allocation10 + $0x60] sm:$0xff] }
 0x363   : > { %4044 = vmatmul.mubr.f32.gmra.mrb[50].mxu1 %v2878_v27  ;;  %v2811_v6 = vmul.f32 %v2777_v33, %v2743_v47  ;;  %v2310_v17 = vpop.f32.mrb[22].mxu0 }
 0x364   : > { %vm2669_vm10 = vcmp.gt.f32.partialorder %v2541_v39, 0.0  ;;  %v2710_v8 = vmul.f32 %v7787_v41, %v2541_v39  ;;  %v6090_v37 = vadd.f32 %v7778_v22, %v2310_v17  ;;  %v2312_v57 = vpop.f32.mrb[23].mxu0  ;;  %v7830_v61 = vld [vmem:[#allocation2 + $0x49] sm:$0xff] }
 0x365   : > { %v3418_v3 = vld [vmem:[#allocation2 + $0x44] sm:$0xff]  ;;  %2845 = vst [vmem:[#allocation2 + $0x5a] sm:$0xff] %v2811_v6  ;;  %4048 = vmatprep.mubr.f32.mxu1 %v7830_v61 }
 0x366   : > { %v2879_v42 = vld [vmem:[#allocation2 + $0x48] sm:$0xff]  ;;  %5570 = vmatprep.mubr.f32.mxu0 %v3418_v3  ;;  %v2744_v11 = vsel %vm2669_vm10, %v2541_v39, %v2710_v8  ;;  %v2546_v28 = vadd.f32 %v6090_v37, %v7719_v31  ;;  %v2781_v8 = vld [vmem:[#allocation10 + $0x68] sm:$0xff] }
 0x367   : > { %4049 = vmatmul.mubr.f32.gmra.mrb[52].mxu1 %v2879_v42  ;;  %v2812_v43 = vmul.f32 %v2778_v51, %v2744_v11  ;;  %v2315_v58 = vpop.f32.mrb[24].mxu0 }
 0x368   : > { %vm2670_vm11 = vcmp.gt.f32.partialorder %v2546_v28, 0.0  ;;  %v2711_v18 = vmul.f32 %v7787_v41, %v2546_v28  ;;  %v6091_v13 = vadd.f32 %v7778_v22, %v2315_v58  ;;  %v2317_v55 = vpop.f32.mrb[25].mxu0  ;;  %v7836_v56 = vld [vmem:[#allocation2 + $0x51] sm:$0xff] }
 0x369   : > { %v3419_v52 = vld [vmem:[#allocation2 + $0x4c] sm:$0xff]  ;;  %2846 = vst [vmem:[#allocation2 + $0x62] sm:$0xff] %v2812_v43  ;;  %4053 = vmatprep.mubr.f32.mxu1 %v7836_v56 }
 0x36a   : > { %v2880_v48 = vld [vmem:[#allocation2 + $0x50] sm:$0xff]  ;;  %5571 = vmatmul.mubr.f32.gmra.mrb[72].mxu0 %v3419_v52  ;;  %v2745_v33 = vsel %vm2670_vm11, %v2546_v28, %v2711_v18  ;;  %v2551_v31 = vadd.f32 %v6091_v13, %v7728_v62  ;;  %v2782_v18 = vld [vmem:[#allocation10 + $0x70] sm:$0xff] }
 0x36b   : > { %4054 = vmatmul.mubr.f32.gmra.mrb[54].mxu1 %v2880_v48  ;;  %v2813_v23 = vmul.f32 %v2779_v25, %v2745_v33  ;;  %v2320_v45 = vpop.f32.mrb[26].mxu0 }
 0x36c   : > { %vm2671_vm12 = vcmp.gt.f32.partialorder %v2551_v31, 0.0  ;;  %v2712_v21 = vmul.f32 %v7787_v41, %v2551_v31  ;;  %v6092_v30 = vadd.f32 %v7778_v22, %v2320_v45  ;;  %v2322_v27 = vpop.f32.mrb[27].mxu0  ;;  %v7842_v47 = vld [vmem:[#allocation2 + $0x59] sm:$0xff] }
 0x36d   : > { %v3420_v39 = vld [vmem:[#allocation2 + $0x54] sm:$0xff]  ;;  %2847 = vst [vmem:[#allocation2 + $0x6a] sm:$0xff] %v2813_v23  ;;  %4058 = vmatprep.mubr.f32.mxu1 %v7842_v47 }
 0x36e   : > { %v2881_v6 = vld [vmem:[#allocation2 + $0x58] sm:$0xff]  ;;  %5573 = vmatprep.mubr.f32.mxu0 %v3420_v39  ;;  %v2746_v51 = vsel %vm2671_vm12, %v2551_v31, %v2712_v21  ;;  %v2556_v62 = vadd.f32 %v6092_v30, %v7725_v14  ;;  %v2783_v21 = vld [vmem:[#allocation10 + $0x78] sm:$0xff] }
 0x36f   : > { %4059 = vmatmul.mubr.f32.gmra.mrb[56].mxu1 %v2881_v6  ;;  %v2814_v17 = vmul.f32 %v2780_v20, %v2746_v51  ;;  %v2325_v37 = vpop.f32.mrb[28].mxu0 }
 0x370   : > { %vm2672_vm13 = vcmp.gt.f32.partialorder %v2556_v62, 0.0  ;;  %v2713_v57 = vmul.f32 %v7787_v41, %v2556_v62  ;;  %v6093_v3 = vadd.f32 %v7778_v22, %v2325_v37  ;;  %v2327_v42 = vpop.f32.mrb[29].mxu0  ;;  %v7848_v11 = vld [vmem:[#allocation2 + $0x61] sm:$0xff] }
 0x371   : > { %v3421_v28 = vld [vmem:[#allocation2 + $0x5c] sm:$0xff]  ;;  %2848 = vst [vmem:[#allocation2 + $0x72] sm:$0xff] %v2814_v17  ;;  %4063 = vmatprep.mubr.f32.mxu1 %v7848_v11 }
 0x372   : > { %v2882_v43 = vld [vmem:[#allocation2 + $0x60] sm:$0xff]  ;;  %5574 = vmatmul.mubr.f32.gmra.mrb[74].mxu0 %v3421_v28  ;;  %v2747_v25 = vsel %vm2672_vm13, %v2556_v62, %v2713_v57  ;;  %v2561_v14 = vadd.f32 %v6093_v3, %v7733_v50  ;;  %v2784_v57 = vld [vmem:[#allocation10 + $0x80] sm:$0xff] }
 0x373   : > { %4064 = vmatmul.mubr.f32.gmra.mrb[58].mxu1 %v2882_v43  ;;  %v7852_v58 = vmul.f32 %v2781_v8, %v2747_v25  ;;  %v2330_v13 = vpop.f32.mrb[30].mxu0 }
 0x374   : > { %vm2673_vm14 = vcmp.gt.f32.partialorder %v2561_v14, 0.0  ;;  %v2714_v55 = vmul.f32 %v7787_v41, %v2561_v14  ;;  %v6094_v52 = vadd.f32 %v7778_v22, %v2330_v13  ;;  %v2332_v48 = vpop.f32.mrb[31].mxu0  ;;  %v7856_v33 = vld [vmem:[#allocation2 + $0x69] sm:$0xff] }
 0x375   : > { %v3422_v31 = vld [vmem:[#allocation2 + $0x64] sm:$0xff]  ;;  %2849 = vst [vmem:[#allocation2 + $0x7a] sm:$0xff] %v7852_v58  ;;  %4068 = vmatprep.mubr.f32.mxu1 %v7856_v33 }
 0x376   : > { %v2883_v23 = vld [vmem:[#allocation2 + $0x68] sm:$0xff]  ;;  %5576 = vmatprep.mubr.f32.mxu0 %v3422_v31  ;;  %v2748_v50 = vsel %vm2673_vm14, %v2561_v14, %v2714_v55  ;;  %v2566_v20 = vadd.f32 %v6094_v52, %v7731_v46  ;;  %v2785_v52 = vld [vmem:[#allocation10 + $0x88] sm:$0xff] }
 0x377   : > { %4069 = vmatmul.mubr.f32.gmra.mrb[60].mxu1 %v2883_v23  ;;  %v7861_v45 = vmul.f32 %v2782_v18, %v2748_v50  ;;  %v2335_v30 = vpop.f32.mrb[32].mxu0 }
 0x378   : > { %vm2674_vm15 = vcmp.gt.f32.partialorder %v2566_v20, 0.0  ;;  %v2715_v27 = vmul.f32 %v7787_v41, %v2566_v20  ;;  %v6095_v39 = vadd.f32 %v7778_v22, %v2335_v30  ;;  %v2337_v6 = vpop.f32.mrb[33].mxu0  ;;  %v7865_v51 = vld [vmem:[#allocation2 + $0x71] sm:$0xff] }
 0x379   : > { %v3423_v62 = vld [vmem:[#allocation2 + $0x6c] sm:$0xff]  ;;  %2850 = vst [vmem:[#allocation2 + $0x82] sm:$0xff] %v7861_v45  ;;  %4073 = vmatprep.mubr.f32.mxu1 %v7865_v51 }
 0x37a   : > { %v2884_v17 = vld [vmem:[#allocation2 + $0x70] sm:$0xff]  ;;  %5577 = vmatmul.mubr.f32.gmra.mrb[76].mxu0 %v3423_v62  ;;  %v2749_v46 = vsel %vm2674_vm15, %v2566_v20, %v2715_v27  ;;  %v2571_v8 = vadd.f32 %v6095_v39, %v7738_v49  ;;  %v2786_v6 = vld [vmem:[#allocation10 + $0x90] sm:$0xff] }
 0x37b   : > { %4074 = vmatmul.mubr.f32.gmra.mrb[62].mxu1 %v2884_v17  ;;  %v7870_v37 = vmul.f32 %v2783_v21, %v2749_v46  ;;  %v2340_v3 = vpop.f32.mrb[34].mxu0 }
 0x37c   : > { %vm2675_vm0 = vcmp.gt.f32.partialorder %v2571_v8, 0.0  ;;  %v2716_v42 = vmul.f32 %v7787_v41, %v2571_v8  ;;  %v6096_v28 = vadd.f32 %v7778_v22, %v2340_v3  ;;  %v2342_v43 = vpop.f32.mrb[35].mxu0  ;;  %v7874_v25 = vld [vmem:[#allocation2 + $0x79] sm:$0xff] }
 0x37d   : > { %v3424_v14 = vld [vmem:[#allocation2 + $0x74] sm:$0xff]  ;;  %2851 = vst [vmem:[#allocation2 + $0x8a] sm:$0xff] %v7870_v37  ;;  %4078 = vmatprep.mubr.f32.mxu1 %v7874_v25 }
 0x37e   : > { %v2885_v18 = vld [vmem:[#allocation2 + $0x78] sm:$0xff]  ;;  %5579 = vmatprep.mubr.f32.mxu0 %v3424_v14  ;;  %v2750_v49 = vsel %vm2675_vm0, %v2571_v8, %v2716_v42  ;;  %v2576_v13 = vadd.f32 %v6096_v28, %v7736_v1  ;;  %v2787_v14 = vld [vmem:[#allocation10 + $0x98] sm:$0xff] }
 0x37f   : > { %4079 = vmatmul.mubr.f32.gmra.mrb[64].mxu1 %v2885_v18  ;;  %v7879_v55 = vmul.f32 %v2784_v57, %v2750_v49  ;;  %v2345_v48 = vpop.f32.mrb[36].mxu0 }
 0x380   : > { %vm2676_vm1 = vcmp.gt.f32.partialorder %v2576_v13, 0.0  ;;  %v2717_v31 = vmul.f32 %v7787_v41, %v2576_v13  ;;  %v6097_v23 = vadd.f32 %v7778_v22, %v2345_v48  ;;  %v2347_v50 = vpop.f32.mrb[37].mxu0  ;;  %v7883_v20 = vld [vmem:[#allocation2 + $0x81] sm:$0xff] }
 0x381   : > { %v3425_v21 = vld [vmem:[#allocation2 + $0x7c] sm:$0xff]  ;;  %2852 = vst [vmem:[#allocation2 + $0x92] sm:$0xff] %v7879_v55  ;;  %4083 = vmatprep.mubr.f32.mxu1 %v7883_v20 }
 0x382   : > { %v2886_v30 = vld [vmem:[#allocation2 + $0x80] sm:$0xff]  ;;  %5580 = vmatmul.mubr.f32.gmra.mrb[78].mxu0 %v3425_v21  ;;  %v2751_v1 = vsel %vm2676_vm1, %v2576_v13, %v2717_v31  ;;  %v2581_v27 = vadd.f32 %v6097_v23, %v7743_v34 }
 0x383   : > { %4084 = vmatmul.mubr.f32.gmra.mrb[66].mxu1 %v2886_v30  ;;  %v7888_v39 = vmul.f32 %v2785_v52, %v2751_v1  ;;  %v2350_v62 = vpop.f32.mrb[38].mxu0  ;;  %v2788_v30 = vld [vmem:[#allocation10 + $0xa0] sm:$0xff] }
 0x384   : > { %vm2677_vm2 = vcmp.gt.f32.partialorder %v2581_v27, 0.0  ;;  %v2718_v17 = vmul.f32 %v7787_v41, %v2581_v27  ;;  %v6098_v46 = vadd.f32 %v7778_v22, %v2350_v62  ;;  %v2352_v8 = vpop.f32.mrb[39].mxu0  ;;  %v7892_v57 = vld [vmem:[#allocation2 + $0x89] sm:$0xff] }
 0x385   : > { %v3426_v3 = vld [vmem:[#allocation2 + $0x84] sm:$0xff]  ;;  %2853 = vst [vmem:[#allocation2 + $0x9a] sm:$0xff] %v7888_v39  ;;  %4088 = vmatprep.mubr.f32.mxu1 %v7892_v57 }
 0x386   : > { %v2887_v42 = vld [vmem:[#allocation2 + $0x88] sm:$0xff]  ;;  %5582 = vmatprep.mubr.f32.mxu0 %v3426_v3  ;;  %v2752_v34 = vsel %vm2677_vm2, %v2581_v27, %v2718_v17  ;;  %v2586_v28 = vadd.f32 %v6098_v46, %v7741_v12 }
 0x387   : > { %4089 = vmatmul.mubr.f32.gmra.mrb[68].mxu1 %v2887_v42  ;;  %v7897_v43 = vmul.f32 %v2786_v6, %v2752_v34  ;;  %v2355_v18 = vpop.f32.mrb[40].mxu0  ;;  %v2789_v34 = vld [vmem:[#allocation10 + $0xa8] sm:$0xff] }
 0x388   : > { %vm2678_vm3 = vcmp.gt.f32.partialorder %v2586_v28, 0.0  ;;  %v2719_v49 = vmul.f32 %v7787_v41, %v2586_v28  ;;  %v6099_v13 = vadd.f32 %v7778_v22, %v2355_v18  ;;  %v2357_v52 = vpop.f32.mrb[41].mxu0  ;;  %v7901_v48 = vld [vmem:[#allocation2 + $0x91] sm:$0xff] }
 0x389   : > { %v3427_v31 = vld [vmem:[#allocation2 + $0x8c] sm:$0xff]  ;;  %2854 = vst [vmem:[#allocation2 + $0xa2] sm:$0xff] %v7897_v43  ;;  %4093 = vmatprep.mubr.f32.mxu1 %v7901_v48 }
 0x38a   : > { %v2888_v23 = vld [vmem:[#allocation2 + $0x90] sm:$0xff]  ;;  %5583 = vmatmul.mubr.f32.gmra.mrb[80].mxu0 %v3427_v31  ;;  %v2753_v12 = vsel %vm2678_vm3, %v2586_v28, %v2719_v49  ;;  %v2591_v50 = vadd.f32 %v6099_v13, %v7748_v63 }
 0x38b   : > { %4094 = vmatmul.mubr.f32.gmra.mrb[70].mxu1 %v2888_v23  ;;  %v7906_v21 = vmul.f32 %v2787_v14, %v2753_v12  ;;  %v2360_v1 = vpop.f32.mrb[42].mxu0 }
 0x38c   : > { %vm2679_vm4 = vcmp.gt.f32.partialorder %v2591_v50, 0.0  ;;  %v2720_v27 = vmul.f32 %v7787_v41, %v2591_v50  ;;  %v6100_v6 = vadd.f32 %v7778_v22, %v2360_v1  ;;  %v2362_v62 = vpop.f32.mrb[43].mxu0  ;;  %v7910_v17 = vld [vmem:[#allocation2 + $0x99] sm:$0xff] }
 0x38d   : > { %v3428_v46 = vld [vmem:[#allocation2 + $0x94] sm:$0xff]  ;;  %2855 = vst [vmem:[#allocation2 + $0xaa] sm:$0xff] %v7906_v21  ;;  %4098 = vmatprep.mubr.f32.mxu1 %v7910_v17 }
 0x38e   : > { %v2889_v8 = vld [vmem:[#allocation2 + $0x98] sm:$0xff]  ;;  %5585 = vmatprep.mubr.f32.mxu0 %v3428_v46  ;;  %v2754_v63 = vsel %vm2679_vm4, %v2591_v50, %v2720_v27  ;;  %v2596_v3 = vadd.f32 %v6100_v6, %v7746_v15  ;;  %v2790_v50 = vld [vmem:[#allocation10 + $0xb0] sm:$0xff] }
 0x38f   : > { %4099 = vmatmul.mubr.f32.gmra.mrb[72].mxu1 %v2889_v8  ;;  %v7915_v42 = vmul.f32 %v2788_v30, %v2754_v63  ;;  %v2365_v28 = vpop.f32.mrb[44].mxu0 }
 0x390   : > { %vm2680_vm5 = vcmp.gt.f32.partialorder %v2596_v3, 0.0  ;;  %v2721_v14 = vmul.f32 %v7787_v41, %v2596_v3  ;;  %v6101_v18 = vadd.f32 %v7778_v22, %v2365_v28  ;;  %v2367_v49 = vpop.f32.mrb[45].mxu0  ;;  %v7919_v13 = vld [vmem:[#allocation2 + $0xa1] sm:$0xff] }
 0x391   : > { %v3429_v52 = vld [vmem:[#allocation2 + $0x9c] sm:$0xff]  ;;  %2856 = vst [vmem:[#allocation2 + $0xb2] sm:$0xff] %v7915_v42  ;;  %4103 = vmatprep.mubr.f32.mxu1 %v7919_v13 }
 0x392   : > { %v2890_v31 = vld [vmem:[#allocation2 + $0xa0] sm:$0xff]  ;;  %5586 = vmatmul.mubr.f32.gmra.mrb[82].mxu0 %v3429_v52  ;;  %v2755_v15 = vsel %vm2680_vm5, %v2596_v3, %v2721_v14  ;;  %v2601_v23 = vadd.f32 %v6101_v18, %v7753_v32 }
 0x393   : > { %4104 = vmatmul.mubr.f32.gmra.mrb[74].mxu1 %v2890_v31  ;;  %v7924_v12 = vmul.f32 %v2789_v34, %v2755_v15  ;;  %v2370_v30 = vpop.f32.mrb[46].mxu0  ;;  %v2791_v34 = vld [vmem:[#allocation10 + $0xb8] sm:$0xff] }
 0x394   : > { %vm2681_vm6 = vcmp.gt.f32.partialorder %v2601_v23, 0.0  ;;  %v2722_v1 = vmul.f32 %v7787_v41, %v2601_v23  ;;  %v6102_v27 = vadd.f32 %v7778_v22, %v2370_v30  ;;  %v2372_v6 = vpop.f32.mrb[47].mxu0  ;;  %v7928_v62 = vld [vmem:[#allocation2 + $0xa9] sm:$0xff]  ;;  %v2792_v30 = vld [vmem:[#allocation10 + $0xc0] sm:$0xff] }
 0x395   : > { %v3430_v46 = vld [vmem:[#allocation2 + $0xa4] sm:$0xff]  ;;  %2857 = vst [vmem:[#allocation2 + $0xba] sm:$0xff] %v7924_v12  ;;  %4108 = vmatprep.mubr.f32.mxu1 %v7928_v62 }
 0x396   : > { %v2891_v8 = vld [vmem:[#allocation2 + $0xa8] sm:$0xff]  ;;  %5588 = vmatprep.mubr.f32.mxu0 %v3430_v46  ;;  %v2756_v32 = vsel %vm2681_vm6, %v2601_v23, %v2722_v1  ;;  %v2606_v63 = vadd.f32 %v6102_v27, %v7751_v29 }
 0x397   : > { %4109 = vmatmul.mubr.f32.gmra.mrb[76].mxu1 %v2891_v8  ;;  %v7933_v3 = vmul.f32 %v2790_v50, %v2756_v32  ;;  %v2375_v28 = vpop.f32.mrb[48].mxu0 }
 0x398   : > { %vm2682_vm7 = vcmp.gt.f32.partialorder %v2606_v63, 0.0  ;;  %v2723_v14 = vmul.f32 %v7787_v41, %v2606_v63  ;;  %v6103_v18 = vadd.f32 %v7778_v22, %v2375_v28  ;;  %v2377_v49 = vpop.f32.mrb[49].mxu0  ;;  %v7937_v52 = vld [vmem:[#allocation2 + $0xb1] sm:$0xff] }
 0x399   : > { %v3431_v31 = vld [vmem:[#allocation2 + $0xac] sm:$0xff]  ;;  %2858 = vst [vmem:[#allocation2 + $0xc2] sm:$0xff] %v7933_v3  ;;  %4113 = vmatprep.mubr.f32.mxu1 %v7937_v52 }
 0x39a   : > { %v2892_v15 = vld [vmem:[#allocation2 + $0xb0] sm:$0xff]  ;;  %5589 = vmatmul.mubr.f32.gmra.mrb[84].mxu0 %v3431_v31  ;;  %v2757_v29 = vsel %vm2682_vm7, %v2606_v63, %v2723_v14  ;;  %v2611_v23 = vadd.f32 %v6103_v18, %v7758_v36  ;;  %v2793_v14 = vld [vmem:[#allocation10 + $0xc8] sm:$0xff] }
 0x39b   : > { %4114 = vmatmul.mubr.f32.gmra.mrb[78].mxu1 %v2892_v15  ;;  %v7942_v50 = vmul.f32 %v2791_v34, %v2757_v29  ;;  %v2380_v1 = vpop.f32.mrb[50].mxu0 }
 0x39c   : > { %vm2683_vm8 = vcmp.gt.f32.partialorder %v2611_v23, 0.0  ;;  %v2724_v27 = vmul.f32 %v7787_v41, %v2611_v23  ;;  %v6104_v6 = vadd.f32 %v7778_v22, %v2380_v1  ;;  %v2382_v46 = vpop.f32.mrb[51].mxu0  ;;  %v7946_v8 = vld [vmem:[#allocation2 + $0xb9] sm:$0xff] }
 0x39d   : > { %v3432_v32 = vld [vmem:[#allocation2 + $0xb4] sm:$0xff]  ;;  %2859 = vst [vmem:[#allocation2 + $0xca] sm:$0xff] %v7942_v50  ;;  %4118 = vmatprep.mubr.f32.mxu1 %v7946_v8 }
 0x39e   : > { %v2893_v28 = vld [vmem:[#allocation2 + $0xb8] sm:$0xff]  ;;  %5591 = vmatprep.mubr.f32.mxu0 %v3432_v32  ;;  %v2758_v36 = vsel %vm2683_vm8, %v2611_v23, %v2724_v27  ;;  %v2616_v63 = vadd.f32 %v6104_v6, %v7756_v9  ;;  %v2794_v27 = vld [vmem:[#allocation10 + $0xd0] sm:$0xff] }
 0x39f   : > { %4119 = vmatmul.mubr.f32.gmra.mrb[80].mxu1 %v2893_v28  ;;  %v7951_v34 = vmul.f32 %v2792_v30, %v2758_v36  ;;  %v2385_v18 = vpop.f32.mrb[52].mxu0 }
 0x3a0   : > { %vm2684_vm9 = vcmp.gt.f32.partialorder %v2616_v63, 0.0  ;;  %v2725_v49 = vmul.f32 %v7787_v41, %v2616_v63  ;;  %v6105_v31 = vadd.f32 %v7778_v22, %v2385_v18  ;;  %v2387_v15 = vpop.f32.mrb[53].mxu0  ;;  %v7955_v29 = vld [vmem:[#allocation2 + $0xc1] sm:$0xff] }
 0x3a1   : > { %v3433_v1 = vld [vmem:[#allocation2 + $0xbc] sm:$0xff]  ;;  %2860 = vst [vmem:[#allocation2 + $0xd2] sm:$0xff] %v7951_v34  ;;  %4123 = vmatprep.mubr.f32.mxu1 %v7955_v29 }
 0x3a2   : > { %v2894_v46 = vld [vmem:[#allocation2 + $0xc0] sm:$0xff]  ;;  %5592 = vmatmul.mubr.f32.gmra.mrb[86].mxu0 %v3433_v1  ;;  %v2759_v9 = vsel %vm2684_vm9, %v2616_v63, %v2725_v49  ;;  %v2621_v23 = vadd.f32 %v6105_v31, %v7763_v38  ;;  %v2795_v49 = vld [vmem:[#allocation10 + $0xd8] sm:$0xff] }
 0x3a3   : > { %4124 = vmatmul.mubr.f32.gmra.mrb[82].mxu1 %v2894_v46  ;;  %v7960_v30 = vmul.f32 %v2793_v14, %v2759_v9  ;;  %v2390_v6 = vpop.f32.mrb[54].mxu0 }
 0x3a4   : > { %vm2685_vm10 = vcmp.gt.f32.partialorder %v2621_v23, 0.0  ;;  %v2726_v32 = vmul.f32 %v7787_v41, %v2621_v23  ;;  %v6106_v28 = vadd.f32 %v7778_v22, %v2390_v6  ;;  %v2392_v36 = vpop.f32.mrb[55].mxu0  ;;  %v7964_v18 = vld [vmem:[#allocation2 + $0xc9] sm:$0xff] }
 0x3a5   : > { %v3434_v15 = vld [vmem:[#allocation2 + $0xc4] sm:$0xff]  ;;  %2861 = vst [vmem:[#allocation2 + $0xda] sm:$0xff] %v7960_v30  ;;  %4128 = vmatprep.mubr.f32.mxu1 %v7964_v18 }
 0x3a6   : > { %v2895_v44 = vld [vmem:[#allocation2 + $0xc8] sm:$0xff]  ;;  %5594 = vmatprep.mubr.f32.mxu0 %v3434_v15  ;;  %v2760_v38 = vsel %vm2685_vm10, %v2621_v23, %v2726_v32  ;;  %v2626_v63 = vadd.f32 %v6106_v28, %v7761_v60 }
 0x3a7   : > { %4129 = vmatmul.mubr.f32.gmra.mrb[84].mxu1 %v2895_v44  ;;  %v7969_v14 = vmul.f32 %v2794_v27, %v2760_v38  ;;  %v2395_v31 = vpop.f32.mrb[56].mxu0  ;;  %v2796_v27 = vld [vmem:[#allocation10 + $0xe0] sm:$0xff] }
 0x3a8   : > { %vm2686_vm11 = vcmp.gt.f32.partialorder %v2626_v63, 0.0  ;;  %v2727_v1 = vmul.f32 %v7787_v41, %v2626_v63  ;;  %v6107_v46 = vadd.f32 %v7778_v22, %v2395_v31  ;;  %v2397_v9 = vpop.f32.mrb[57].mxu0  ;;  %v7973_v6 = vld [vmem:[#allocation2 + $0xd1] sm:$0xff] }
 0x3a9   : > { %v3435_v36 = vld [vmem:[#allocation2 + $0xcc] sm:$0xff]  ;;  %2862 = vst [vmem:[#allocation2 + $0xe2] sm:$0xff] %v7969_v14  ;;  %4133 = vmatprep.mubr.f32.mxu1 %v7973_v6 }
 0x3aa   : > { %v2896_v5 = vld [vmem:[#allocation2 + $0xd0] sm:$0xff]  ;;  %5595 = vmatmul.mubr.f32.gmra.mrb[88].mxu0 %v3435_v36  ;;  %v2761_v44 = vsel %vm2686_vm11, %v2626_v63, %v2727_v1  ;;  %v2631_v60 = vadd.f32 %v6107_v46, %v7768_v7 }
 0x3ab   : > { %4134 = vmatmul.mubr.f32.gmra.mrb[86].mxu1 %v2896_v5  ;;  %v7978_v23 = vmul.f32 %v2795_v49, %v2761_v44  ;;  %v2400_v32 = vpop.f32.mrb[58].mxu0  ;;  %v2797_v49 = vld [vmem:[#allocation10 + $0xe8] sm:$0xff] }
 0x3ac   : > { %vm2687_vm12 = vcmp.gt.f32.partialorder %v2631_v60, 0.0  ;;  %v2728_v28 = vmul.f32 %v7787_v41, %v2631_v60  ;;  %v6108_v15 = vadd.f32 %v7778_v22, %v2400_v32  ;;  %v2402_v38 = vpop.f32.mrb[59].mxu0  ;;  %v7982_v31 = vld [vmem:[#allocation2 + $0xd9] sm:$0xff] }
 0x3ad   : > { %v3436_v9 = vld [vmem:[#allocation2 + $0xd4] sm:$0xff]  ;;  %2863 = vst [vmem:[#allocation2 + $0xea] sm:$0xff] %v7978_v23  ;;  %4138 = vmatprep.mubr.f32.mxu1 %v7982_v31 }
 0x3ae   : > { %v2897_v2 = vld [vmem:[#allocation2 + $0xd8] sm:$0xff]  ;;  %5597 = vmatprep.mubr.f32.mxu0 %v3436_v9  ;;  %v2762_v5 = vsel %vm2687_vm12, %v2631_v60, %v2728_v28  ;;  %v2636_v7 = vadd.f32 %v6108_v15, %v7766_v26 }
 0x3af   : > { %4139 = vmatmul.mubr.f32.gmra.mrb[88].mxu1 %v2897_v2  ;;  %v7987_v63 = vmul.f32 %v2796_v27, %v2762_v5  ;;  %v2405_v1 = vpop.f32.mrb[60].mxu0  ;;  %v2798_v27 = vld [vmem:[#allocation10 + $0xf0] sm:$0xff] }
 0x3b0   : > { %vm2688_vm13 = vcmp.gt.f32.partialorder %v2636_v7, 0.0  ;;  %v2729_v46 = vmul.f32 %v7787_v41, %v2636_v7  ;;  %v6109_v36 = vadd.f32 %v7778_v22, %v2405_v1  ;;  %v2407_v44 = vpop.f32.mrb[61].mxu0  ;;  %v7991_v32 = vld [vmem:[#allocation2 + $0xe1] sm:$0xff] }
 0x3b1   : > { %v3437_v38 = vld [vmem:[#allocation2 + $0xdc] sm:$0xff]  ;;  %2864 = vst [vmem:[#allocation2 + $0xf2] sm:$0xff] %v7987_v63  ;;  %4143 = vmatprep.mubr.f32.mxu1 %v7991_v32 }
 0x3b2   : > { %v2898_v59 = vld [vmem:[#allocation2 + $0xe0] sm:$0xff]  ;;  %5598 = vmatmul.mubr.f32.gmra.mrb[90].mxu0 %v3437_v38  ;;  %v2763_v2 = vsel %vm2688_vm13, %v2636_v7, %v2729_v46  ;;  %v2641_v26 = vadd.f32 %v6109_v36, %v7773_v53 }
 0x3b3   : > { %4144 = vmatmul.mubr.f32.gmra.mrb[90].mxu1 %v2898_v59  ;;  %v7996_v60 = vmul.f32 %v2797_v49, %v2763_v2  ;;  %v2410_v28 = vpop.f32.mrb[62].mxu0  ;;  %v2799_v49 = vld [vmem:[#allocation10 + $0xf8] sm:$0xff] }
 0x3b4   : > { %vm2689_vm14 = vcmp.gt.f32.partialorder %v2641_v26, 0.0  ;;  %v2730_v15 = vmul.f32 %v7787_v41, %v2641_v26  ;;  %v6110_v9 = vadd.f32 %v7778_v22, %v2410_v28  ;;  %v2412_v5 = vpop.f32.mrb[63].mxu0  ;;  %v8000_v1 = vld [vmem:[#allocation2 + $0xe9] sm:$0xff] }
 0x3b5   : > { %v3438_v44 = vld [vmem:[#allocation2 + $0xe4] sm:$0xff]  ;;  %2865 = vst [vmem:[#allocation2 + $0xfa] sm:$0xff] %v7996_v60  ;;  %4148 = vmatprep.mubr.f32.mxu1 %v8000_v1 }
 0x3b6   : > { %v2899_v16 = vld [vmem:[#allocation2 + $0xe8] sm:$0xff]  ;;  %5600 = vmatprep.mubr.f32.mxu0 %v3438_v44  ;;  %v2764_v59 = vsel %vm2689_vm14, %v2641_v26, %v2730_v15  ;;  %v2646_v53 = vadd.f32 %v6110_v9, %v7771_v19  ;;  %v2800_v15 = vld [vmem:[#allocation10 + $0x100] sm:$0xff]  ;;  %v6677_v9 = vld [vmem:[%s8640_s2] ss:$0 sm:$0xff] }
 0x3b7   : > { %4149 = vmatmul.mubr.f32.gmra.mrb[92].mxu1 %v2899_v16  ;;  %v8005_v7 = vmul.f32 %v2798_v27, %v2764_v59  ;;  %v2415_v46 = vpop.f32.mrb[64].mxu0 }
 0x3b8   : > { %vm2690_vm15 = vcmp.gt.f32.partialorder %v2646_v53, 0.0  ;;  %v2731_v36 = vmul.f32 %v7787_v41, %v2646_v53  ;;  %v6111_v38 = vadd.f32 %v7778_v22, %v2415_v46  ;;  %v2417_v2 = vpop.f32.mrb[65].mxu0  ;;  %v8009_v28 = vld [vmem:[#allocation2 + $0xf1] sm:$0xff] }
 0x3b9   : > { %v3439_v5 = vld [vmem:[#allocation2 + $0xec] sm:$0xff]  ;;  %2866 = vst [vmem:[#allocation2 + $0x102] sm:$0xff] %v8005_v7  ;;  %4153 = vmatprep.mubr.f32.mxu1 %v8009_v28 }
 0x3ba   : > { %v2900_v54 = vld [vmem:[#allocation2 + $0xf0] sm:$0xff]  ;;  %5601 = vmatmul.mubr.f32.gmra.mrb[92].mxu0 %v3439_v5  ;;  %v2765_v16 = vsel %vm2690_vm15, %v2646_v53, %v2731_v36  ;;  %v2651_v19 = vadd.f32 %v6111_v38, %v7789_v24  ;;  %v2801_v36 = vld [vmem:[#allocation10 + $0x108] sm:$0xff] }
 0x3bb   : > { %4154 = vmatmul.mubr.f32.gmra.mrb[94].mxu1 %v2900_v54  ;;  %v8014_v26 = vmul.f32 %v2799_v49, %v2765_v16  ;;  %v2420_v27 = vpop.f32.mrb[66].mxu0 }
 0x3bc   : > { %vm2691_vm0 = vcmp.gt.f32.partialorder %v2651_v19, 0.0  ;;  %v2732_v22 = vmul.f32 %v7787_v41, %v2651_v19  ;;  %v6112_v44 = vadd.f32 %v6677_v9, %v2420_v27  ;;  %v2422_v59 = vpop.f32.mrb[67].mxu0  ;;  %v8020_v46 = vld [vmem:[#allocation2 + $0xf9] sm:$0xff]  ;;  %v3074_v9 = vld [vmem:[#allocation2 + $0x11] sm:$0xff] }
 0x3bd   : > { %v2901_v2 = vld [vmem:[#allocation2 + $0xf8] sm:$0xff]  ;;  %2867 = vst [vmem:[#allocation2 + $0x10a] sm:$0xff] %v8014_v26  ;;  %4158 = vmatprep.mubr.f32.mxu1 %v8020_v46  ;;  %v6678_v41 = vld [vmem:[%s8641_s3] ss:$0 sm:$0xff] }
 0x3be   : > { %v2766_v54 = vsel %vm2691_vm0, %v2651_v19, %v2732_v22  ;;  %v2656_v24 = vadd.f32 %v6112_v44, %v7782_v4  ;;  %v3852_v19 = vld [vmem:[#allocation9 + $0x200] sm:$0xff]  ;;  %v3006_v44 = vld [vmem:[#allocation2 + $0x2] sm:$0xff] }
 0x3bf   : > { %4159 = vmatmul.mubr.f32.gmra.mrb[96].mxu1 %v2901_v2  ;;  %v8025_v53 = vmul.f32 %v2800_v15, %v2766_v54  ;;  %v3853_v15 = vld [vmem:[#allocation9 + $0x208] sm:$0xff]  ;;  %v3854_v2 = vld [vmem:[#allocation9 + $0x210] sm:$0xff]  ;;  %v3855_v54 = vld [vmem:[#allocation9 + $0x218] sm:$0xff] }
 0x3c0   : > { %vm2692_vm1 = vcmp.gt.f32.partialorder %v2656_v24, 0.0  ;;  %v2733_v49 = vmul.f32 %v6678_v41, %v2656_v24  ;;  %v8030_v38 = vld [vmem:[#allocation2 + $0x101] sm:$0xff]  ;;  %v5936_v59 = vpack.c.bf16 %v3853_v15, %v3852_v19  ;;  %v3007_v41 = vld [vmem:[#allocation2 + $0xa] sm:$0xff] }
 0x3c1   : > { %v2902_v5 = vld [vmem:[#allocation2 + $0x100] sm:$0xff]  ;;  %2868 = vst [vmem:[#allocation2 + $0x112] sm:$0xff] %v8025_v53  ;;  %4163 = vmatprep.mubr.f32.mxu1 %v8030_v38  ;;  %v3858_v19 = vld [vmem:[#allocation9 + $0x230] sm:$0xff]  ;;  %v3859_v15 = vld [vmem:[#allocation9 + $0x238] sm:$0xff] }
 0x3c2   : > { %v2767_v16 = vsel %vm2692_vm1, %v2656_v24, %v2733_v49  ;;  %v3075_v24 = vld [vmem:[#allocation2 + $0x19] sm:$0xff]  ;;  %v5939_v49 = vpack.c.bf16 %v3855_v54, %v3854_v2 }
 0x3c3   : > { %4164 = vmatmul.mubr.f32.gmra.mrb[98].mxu1 %v2902_v5  ;;  %v8034_v4 = vmul.f32 %v2801_v36, %v2767_v16  ;;  %v3856_v36 = vld [vmem:[#allocation9 + $0x220] sm:$0xff]  ;;  %v3857_v5 = vld [vmem:[#allocation9 + $0x228] sm:$0xff] }
 0x3c4   : > { %v8036_v27 = vld [vmem:[#allocation2 + $0x109] sm:$0xff]  ;;  %v3076_v16 = vld [vmem:[#allocation2 + $0x21] sm:$0xff]  ;;  %v3860_v2 = vld [vmem:[#allocation9 + $0x240] sm:$0xff] }
 0x3c5   : > { %v2903_v22 = vld [vmem:[#allocation2 + $0x108] sm:$0xff]  ;;  %2869 = vst [vmem:[#allocation2 + $0x11a] sm:$0xff] %v8034_v4  ;;  %4168 = vmatprep.mubr.f32.mxu1 %v8036_v27  ;;  %v3861_v54 = vld [vmem:[#allocation9 + $0x248] sm:$0xff] }
 0x3c7   : > { %4169 = vmatmul.mubr.f32.gmra.mrb[100].mxu1 %v2903_v22  ;;  %v5942_v22 = vpack.c.bf16 %v3857_v5, %v3856_v36  ;;  %v3862_v36 = vld [vmem:[#allocation9 + $0x250] sm:$0xff]  ;;  %v3863_v5 = vld [vmem:[#allocation9 + $0x258] sm:$0xff] }
 0x3c8   : > { %4238 = vmatprep.mubr.f32.mxu1 %v3074_v9  ;;  %v8042_v9 = vld [vmem:[#allocation2 + $0x12] sm:$0xff] }
 0x3cb   : > { %4239 = vmatmul.mubr.f32.vlgmr.msra.gmra.mrb[34].mxu1 %v3006_v44  ;;  %v3077_v44 = vld [vmem:[#allocation2 + $0x29] sm:$0xff] }
 0x3cc   : > { %4243 = vmatprep.mubr.f32.mxu1 %v3075_v24  ;;  %5937 = vmatpush1.bf16.msra.mxu1 %v5936_v59  ;;  %v5945_v59 = vpack.c.bf16 %v3859_v15, %v3858_v19  ;;  %v8046_v24 = vld [vmem:[#allocation2 + $0x1a] sm:$0xff]  ;;  %v5951_v19 = vpack.c.bf16 %v3863_v5, %v3862_v36 }
 0x3cd   : > { %5938 = vmatprep.subr.bf16.mxu1 %v8714_v10  ;;  %v3864_v15 = vld [vmem:[#allocation9 + $0x260] sm:$0xff]  ;;  %v3869_v5 = vld [vmem:[#allocation9 + $0x288] sm:$0xff] }
 0x3ce   : > { %v3868_v36 = vld [vmem:[#allocation9 + $0x280] sm:$0xff] }
 0x3cf   : > { %4244 = vmatmul.mubr.f32.gmra.mrb[36].mxu1 %v3007_v41  ;;  %v3078_v41 = vld [vmem:[#allocation2 + $0x31] sm:$0xff] }
 0x3d0   : > { %4248 = vmatprep.mubr.f32.mxu1 %v3076_v16  ;;  %5940 = vmatpush1.bf16.msra.mxu1 %v5939_v49  ;;  %v5948_v49 = vpack.c.bf16 %v3861_v54, %v3860_v2  ;;  %v8050_v16 = vld [vmem:[#allocation2 + $0x22] sm:$0xff]  ;;  %v3867_v54 = vld [vmem:[#allocation9 + $0x278] sm:$0xff] }
 0x3d1   : > { %5941 = vmatprep.subr.bf16.mxu1 %v8714_v10  ;;  %v3866_v2 = vld [vmem:[#allocation9 + $0x270] sm:$0xff] }
 0x3d3   : > { %4249 = vmatmul.mubr.f32.gmra.mrb[38].mxu1 %v8042_v9 }
 0x3d4   : > { %4253 = vmatprep.mubr.f32.mxu1 %v3077_v44  ;;  %5943 = vmatpush1.bf16.msra.mxu1 %v5942_v22  ;;  %v3079_v22 = vld [vmem:[#allocation2 + $0x39] sm:$0xff] }
 0x3d5   : > { %5944 = vmatprep.subr.bf16.mxu1 %v8714_v10  ;;  %v3865_v44 = vld [vmem:[#allocation9 + $0x268] sm:$0xff] }
 0x3d7   : > { %4254 = vmatmul.mubr.f32.gmra.mrb[40].mxu1 %v8046_v24 }
 0x3d8   : > { %4258 = vmatprep.mubr.f32.mxu1 %v3078_v41  ;;  %5946 = vmatpush1.bf16.msra.mxu1 %v5945_v59  ;;  %v5954_v59 = vpack.c.bf16 %v3865_v44, %v3864_v15  ;;  %v8059_v41 = vld [vmem:[#allocation2 + $0x32] sm:$0xff]  ;;  %v8069_v44 = vld [vmem:[#allocation2 + $0x42] sm:$0xff] }
 0x3d9   : > { %5947 = vmatprep.subr.bf16.mxu1 %v8714_v10  ;;  %v3871_v15 = vld [vmem:[#allocation9 + $0x298] sm:$0xff] }
 0x3db   : > { %4259 = vmatmul.mubr.f32.gmra.mrb[42].mxu1 %v8050_v16 }
 0x3dc   : > { %4263 = vmatprep.mubr.f32.mxu1 %v3079_v22  ;;  %5949 = vmatpush1.bf16.msra.mxu1 %v5948_v49  ;;  %v5957_v49 = vpack.c.bf16 %v3867_v54, %v3866_v2  ;;  %v8064_v22 = vld [vmem:[#allocation2 + $0x3a] sm:$0xff]  ;;  %v8074_v54 = vld [vmem:[#allocation2 + $0x4a] sm:$0xff] }
 0x3dd   : > { %5950 = vmatprep.subr.bf16.mxu1 %v8714_v10  ;;  %v3873_v2 = vld [vmem:[#allocation9 + $0x2a8] sm:$0xff] }
 0x3df   : > { %4264 = vmatmul.mubr.f32.gmra.mrb[44].mxu1 %v8054_v35 }
 0x3e0   : > { %4268 = vmatprep.mubr.f32.mxu1 %v7824_v40  ;;  %5952 = vmatpush1.bf16.msra.mxu1 %v5951_v19  ;;  %v5960_v40 = vpack.c.bf16 %v3869_v5, %v3868_v36  ;;  %v3870_v19 = vld [vmem:[#allocation9 + $0x290] sm:$0xff]  ;;  %v3875_v36 = vld [vmem:[#allocation9 + $0x2b8] sm:$0xff] }
 0x3e1   : > { %5953 = vmatprep.subr.bf16.mxu1 %v8714_v10  ;;  %v8079_v5 = vld [vmem:[#allocation2 + $0x52] sm:$0xff] }
 0x3e3   : > { %4269 = vmatmul.mubr.f32.gmra.mrb[46].mxu1 %v8059_v41 }
 0x3e4   : > { %4273 = vmatprep.mubr.f32.mxu1 %v7830_v61  ;;  %5955 = vmatpush1.bf16.msra.mxu1 %v5954_v59  ;;  %v5963_v61 = vpack.c.bf16 %v3871_v15, %v3870_v19  ;;  %v3872_v59 = vld [vmem:[#allocation9 + $0x2a0] sm:$0xff]  ;;  %v3877_v19 = vld [vmem:[#allocation9 + $0x2c8] sm:$0xff] }
 0x3e5   : > { %5956 = vmatprep.subr.bf16.mxu1 %v8714_v10  ;;  %v8084_v15 = vld [vmem:[#allocation2 + $0x5a] sm:$0xff] }
 0x3e7   : > { %4274 = vmatmul.mubr.f32.gmra.mrb[48].mxu1 %v8064_v22 }
 0x3e8   : > { %4278 = vmatprep.mubr.f32.mxu1 %v7836_v56  ;;  %5958 = vmatpush1.bf16.msra.mxu1 %v5957_v49  ;;  %v5966_v56 = vpack.c.bf16 %v3873_v2, %v3872_v59  ;;  %v3874_v49 = vld [vmem:[#allocation9 + $0x2b0] sm:$0xff]  ;;  %v3879_v59 = vld [vmem:[#allocation9 + $0x2d8] sm:$0xff] }
 0x3e9   : > { %5959 = vmatprep.subr.bf16.mxu1 %v8714_v10  ;;  %v8089_v2 = vld [vmem:[#allocation2 + $0x62] sm:$0xff] }
 0x3eb   : > { %4279 = vmatmul.mubr.f32.gmra.mrb[50].mxu1 %v8069_v44 }
 0x3ec   : > { %4283 = vmatprep.mubr.f32.mxu1 %v7842_v47  ;;  %5961 = vmatpush1.bf16.msra.mxu1 %v5960_v40  ;;  %v5969_v47 = vpack.c.bf16 %v3875_v36, %v3874_v49  ;;  %v3876_v40 = vld [vmem:[#allocation9 + $0x2c0] sm:$0xff]  ;;  %v3881_v49 = vld [vmem:[#allocation9 + $0x2e8] sm:$0xff]  ;;  %v8094_v36 = vld [vmem:[#allocation2 + $0x6a] sm:$0xff] }
 0x3ed   : > { %5962 = vmatprep.subr.bf16.mxu1 %v8714_v10 }
 0x3ef   : > { %4284 = vmatmul.mubr.f32.gmra.mrb[52].mxu1 %v8074_v54 }
 0x3f0   : > { %4288 = vmatprep.mubr.f32.mxu1 %v7848_v11  ;;  %5964 = vmatpush1.bf16.msra.mxu1 %v5963_v61  ;;  %v5972_v11 = vpack.c.bf16 %v3877_v19, %v3876_v40  ;;  %v3878_v61 = vld [vmem:[#allocation9 + $0x2d0] sm:$0xff]  ;;  %v3883_v40 = vld [vmem:[#allocation9 + $0x2f8] sm:$0xff] }
 0x3f1   : > { %5965 = vmatprep.subr.bf16.mxu1 %v8714_v10  ;;  %v8099_v19 = vld [vmem:[#allocation2 + $0x72] sm:$0xff] }
 0x3f3   : > { %4289 = vmatmul.mubr.f32.gmra.mrb[54].mxu1 %v8079_v5 }
 0x3f4   : > { %4293 = vmatprep.mubr.f32.mxu1 %v7856_v33  ;;  %5967 = vmatpush1.bf16.msra.mxu1 %v5966_v56  ;;  %v5975_v33 = vpack.c.bf16 %v3879_v59, %v3878_v61  ;;  %v3880_v56 = vld [vmem:[#allocation9 + $0x2e0] sm:$0xff] }
 0x3f5   : > { %5968 = vmatprep.subr.bf16.mxu1 %v8714_v10 }
 0x3f7   : > { %4294 = vmatmul.mubr.f32.gmra.mrb[56].mxu1 %v8084_v15 }
 0x3f8   : > { %4298 = vmatprep.mubr.f32.mxu1 %v7865_v51  ;;  %5970 = vmatpush1.bf16.msra.mxu1 %v5969_v47  ;;  %v5978_v51 = vpack.c.bf16 %v3881_v49, %v3880_v56  ;;  %v3882_v47 = vld [vmem:[#allocation9 + $0x2f0] sm:$0xff]  ;;  %v3897_v56 = vld [vmem:[#allocation9 + $0x368] sm:$0xff] }
 0x3f9   : > { %5971 = vmatprep.subr.bf16.mxu1 %v8714_v10 }
 0x3fb   : > { %4299 = vmatmul.mubr.f32.gmra.mrb[58].mxu1 %v8089_v2 }
 0x3fc   : > { %4303 = vmatprep.mubr.f32.mxu1 %v7874_v25  ;;  %5973 = vmatpush1.bf16.msra.mxu1 %v5972_v11  ;;  %v5981_v25 = vpack.c.bf16 %v3883_v40, %v3882_v47  ;;  %v8186_v11 = vld [vmem:[#allocation2 + $0x3b] sm:$0xff]  ;;  %v3898_v40 = vld [vmem:[#allocation9 + $0x370] sm:$0xff] }
 0x3fd   : > { %5974 = vmatprep.subr.bf16.mxu1 %v8714_v10 }
 0x3ff   : > { %4304 = vmatmul.mubr.f32.gmra.mrb[60].mxu1 %v8094_v36 }
 0x400   : > { %4308 = vmatprep.mubr.f32.mxu1 %v7883_v20  ;;  %5976 = vmatpush1.bf16.msra.mxu1 %v5975_v33  ;;  %v3896_v33 = vld [vmem:[#allocation9 + $0x360] sm:$0xff] }
 0x401   : > { %5977 = vmatprep.subr.bf16.mxu1 %v8714_v10  ;;  %v6002_v47 = vpack.c.bf16 %v3897_v56, %v3896_v33  ;;  %v3908_v56 = vld [vmem:[#allocation9 + $0x3c0] sm:$0xff] }
 0x403   : > { %4309 = vmatmul.mubr.f32.gmra.mrb[62].mxu1 %v8099_v19 }
 0x404   : > { %4313 = vmatprep.mubr.f32.mxu1 %v7892_v57  ;;  %5979 = vmatpush1.bf16.msra.mxu1 %v5978_v51  ;;  %v8195_v51 = vld [vmem:[#allocation2 + $0x43] sm:$0xff] }
 0x405   : > { %5980 = vmatprep.subr.bf16.mxu1 %v8714_v10 }
 0x407   : > { %4314 = vmatmul.mubr.f32.gmra.mrb[64].mxu1 %v7852_v58 }
 0x408   : > { %4318 = vmatprep.mubr.f32.mxu1 %v7901_v48  ;;  %5982 = vmatpush1.bf16.msra.mxu1 %v5981_v25  ;;  %v3106_v48 = vld [vmem:[#allocation2 + $0x111] sm:$0xff] }
 0x409   : > { %5983 = vmatprep.subr.bf16.mxu1 %v8714_v10  ;;  %v3899_v25 = vld [vmem:[#allocation9 + $0x378] sm:$0xff] }
 0x40b   : > { %4319 = vmatmul.mubr.f32.gmra.mrb[66].mxu1 %v7861_v45 }
 0x40c   : > { %4323 = vmatprep.mubr.f32.mxu1 %v7910_v17 }
 0x40f   : > { %4324 = vmatmul.mubr.f32.gmra.mrb[68].mxu1 %v7870_v37 }
 0x410   : > { %4328 = vmatprep.mubr.f32.mxu1 %v7919_v13  ;;  %v3885_v13 = vld [vmem:[#allocation9 + $0x308] sm:$0xff] }
 0x413   : > { %4329 = vmatmul.mubr.f32.gmra.mrb[70].mxu1 %v7879_v55 }
 0x414   : > { %4333 = vmatprep.mubr.f32.mxu1 %v7928_v62  ;;  %v3210_v62 = vld [vmem:[#allocation2 + $0x13] sm:$0xff] }
 0x417   : > { %4334 = vmatmul.mubr.f32.gmra.mrb[72].mxu1 %v7888_v39 }
 0x418   : > { %4338 = vmatprep.mubr.f32.mxu1 %v7937_v52  ;;  %v3886_v52 = vld [vmem:[#allocation9 + $0x310] sm:$0xff] }
 0x41b   : > { %4339 = vmatmul.mubr.f32.gmra.mrb[74].mxu1 %v7897_v43 }
 0x41c   : > { %4343 = vmatprep.mubr.f32.mxu1 %v7946_v8  ;;  %v3211_v8 = vld [vmem:[#allocation2 + $0x1b] sm:$0xff] }
 0x41f   : > { %4344 = vmatmul.mubr.f32.gmra.mrb[76].mxu1 %v7906_v21  ;;  %v3107_v21 = vld [vmem:[#allocation2 + $0x119] sm:$0xff] }
 0x420   : > { %4348 = vmatprep.mubr.f32.mxu1 %v7955_v29 }
 0x423   : > { %4349 = vmatmul.mubr.f32.gmra.mrb[78].mxu1 %v7915_v42  ;;  %v3884_v42 = vld [vmem:[#allocation9 + $0x300] sm:$0xff] }
 0x424   : > { %4353 = vmatprep.mubr.f32.mxu1 %v7964_v18  ;;  %v3889_v18 = vld [vmem:[#allocation9 + $0x328] sm:$0xff] }
 0x427   : > { %4354 = vmatmul.mubr.f32.gmra.mrb[80].mxu1 %v7924_v12 }
 0x428   : > { %4358 = vmatprep.mubr.f32.mxu1 %v7973_v6  ;;  %v8167_v6 = vld [vmem:[#allocation2 + $0x23] sm:$0xff] }
 0x42b   : > { %4359 = vmatmul.mubr.f32.gmra.mrb[82].mxu1 %v7933_v3  ;;  %v5984_v3 = vpack.c.bf16 %v3885_v13, %v3884_v42  ;;  %v3900_v13 = vld [vmem:[#allocation9 + $0x380] sm:$0xff] }
 0x42c   : > { %4363 = vmatprep.mubr.f32.mxu1 %v7982_v31  ;;  %v3890_v31 = vld [vmem:[#allocation9 + $0x330] sm:$0xff] }
 0x42d   : > { %v8125_v58 = vpop.f32.mrb[68].mxu0 }
 0x42e   : > { %8736 = vst [vmem:[#allocation29_spill] sm:$0xff] %v8125_v58  ;;  %v8127_v45 = vpop.f32.mrb[69].mxu0  ;;  %v8362_v58 = vld [vmem:[#allocation2 + $0x10b] sm:$0xff] }
 0x42f   : > { %8737 = vst [vmem:[#allocation22_spill] sm:$0xff] %v8127_v45  ;;  %4364 = vmatmul.mubr.f32.gmra.mrb[84].mxu1 %v7942_v50  ;;  %v3887_v50 = vld [vmem:[#allocation9 + $0x318] sm:$0xff] }
 0x430   : > { %4368 = vmatprep.mubr.f32.mxu1 %v7991_v32  ;;  %v8172_v32 = vld [vmem:[#allocation2 + $0x2b] sm:$0xff]  ;;  %v8366_v45 = vld [vmem:[#allocation2 + $0x113] sm:$0xff] }
 0x433   : > { %4369 = vmatmul.mubr.f32.gmra.mrb[86].mxu1 %v7951_v34  ;;  %v5987_v34 = vpack.c.bf16 %v3887_v50, %v3886_v52  ;;  %v8209_v52 = vld [vmem:[#allocation2 + $0x53] sm:$0xff] }
 0x434   : > { %4373 = vmatprep.mubr.f32.mxu1 %v8000_v1 }
 0x435   : > { %v8133_v37 = vpop.f32.mrb[70].mxu0 }
 0x436   : > { %8738 = vst [vmem:[#allocation30_spill] sm:$0xff] %v8133_v37  ;;  %v8135_v55 = vpop.f32.mrb[71].mxu0  ;;  %v8356_v37 = vld [vmem:[#allocation2 + $0x103] sm:$0xff] }
 0x437   : > { %8739 = vst [vmem:[#allocation23_spill] sm:$0xff] %v8135_v55  ;;  %4374 = vmatmul.mubr.f32.gmra.mrb[88].mxu1 %v7960_v30  ;;  %v3888_v30 = vld [vmem:[#allocation9 + $0x320] sm:$0xff]  ;;  %v8359_v55 = vld [vmem:[#allocation2 + $0x102] sm:$0xff] }
 0x438   : > { %4378 = vmatprep.mubr.f32.mxu1 %v8009_v28  ;;  %v3893_v28 = vld [vmem:[#allocation9 + $0x348] sm:$0xff] }
 0x43b   : > { %4379 = vmatmul.mubr.f32.gmra.mrb[90].mxu1 %v7969_v14 }
 0x43c   : > { %4383 = vmatprep.mubr.f32.mxu1 %v8020_v46 }
 0x43d   : > { %v8141_v20 = vpop.f32.mrb[72].mxu0 }
 0x43e   : > { %8740 = vst [vmem:[#allocation24_spill] sm:$0xff] %v8141_v20  ;;  %v8143_v39 = vpop.f32.mrb[73].mxu0  ;;  %v8350_v20 = vld [vmem:[#allocation2 + $0xfb] sm:$0xff] }
 0x43f   : > { %8741 = vst [vmem:[#allocation25_spill] sm:$0xff] %v8143_v39  ;;  %4384 = vmatmul.mubr.f32.gmra.mrb[92].mxu1 %v7978_v23  ;;  %v5990_v23 = vpack.c.bf16 %v3889_v18, %v3888_v30  ;;  %v8214_v30 = vld [vmem:[#allocation2 + $0x5b] sm:$0xff] }
 0x440   : > { %4388 = vmatprep.mubr.f32.mxu1 %v8030_v38  ;;  %v8181_v38 = vld [vmem:[#allocation2 + $0x33] sm:$0xff] }
 0x441   : > { %v8353_v39 = vld [vmem:[#allocation2 + $0xfa] sm:$0xff] }
 0x442   : > { %8762 = vst [vmem:[#allocation51_spill] sm:$0xff] %v8353_v39 }
 0x443   : > { %4389 = vmatmul.mubr.f32.gmra.mrb[94].mxu1 %v7987_v63  ;;  %v3891_v63 = vld [vmem:[#allocation9 + $0x338] sm:$0xff] }
 0x444   : > { %4393 = vmatprep.mubr.f32.mxu1 %v8036_v27 }
 0x445   : > { %v8149_v57 = vpop.f32.mrb[74].mxu0 }
 0x446   : > { %8742 = vst [vmem:[#allocation31_spill] sm:$0xff] %v8149_v57  ;;  %v8151_v43 = vpop.f32.mrb[75].mxu0  ;;  %v8344_v57 = vld [vmem:[#allocation2 + $0xf3] sm:$0xff] }
 0x447   : > { %8743 = vst [vmem:[#allocation32_spill] sm:$0xff] %v8151_v43  ;;  %4394 = vmatmul.mubr.f32.gmra.mrb[96].mxu1 %v7996_v60  ;;  %v5993_v60 = vpack.c.bf16 %v3891_v63, %v3890_v31  ;;  %v3904_v31 = vld [vmem:[#allocation9 + $0x3a0] sm:$0xff]  ;;  %v3905_v63 = vld [vmem:[#allocation9 + $0x3a8] sm:$0xff] }
 0x448   : > { %4398 = vmatprep.mubr.f32.mxu1 %v3106_v48  ;;  %v8200_v48 = vld [vmem:[#allocation2 + $0x4b] sm:$0xff] }
 0x449   : > { %v8347_v43 = vld [vmem:[#allocation2 + $0xf2] sm:$0xff] }
 0x44b   : > { %4399 = vmatmul.mubr.f32.gmra.mrb[98].mxu1 %v8005_v7  ;;  %v3892_v7 = vld [vmem:[#allocation9 + $0x340] sm:$0xff] }
 0x44c   : > { %4403 = vmatprep.mubr.f32.mxu1 %v3107_v21  ;;  %v5996_v27 = vpack.c.bf16 %v3893_v28, %v3892_v7  ;;  %v6005_v21 = vpack.c.bf16 %v3899_v25, %v3898_v40  ;;  %v8223_v7 = vld [vmem:[#allocation2 + $0x63] sm:$0xff]  ;;  %v6014_v28 = vpack.c.bf16 %v3905_v63, %v3904_v31  ;;  %v8237_v25 = vld [vmem:[#allocation2 + $0x73] sm:$0xff] }
 0x44d   : > { %v8155_v17 = vpop.f32.mrb[76].mxu0  ;;  %v3913_v31 = vld [vmem:[#allocation9 + $0x3e8] sm:$0xff] }
 0x44e   : > { %8744 = vst [vmem:[#allocation33_spill] sm:$0xff] %v8155_v17  ;;  %v8157_v12 = vpop.f32.mrb[77].mxu0  ;;  %v8338_v17 = vld [vmem:[#allocation2 + $0xeb] sm:$0xff] }
 0x44f   : > { %8745 = vst [vmem:[#allocation34_spill] sm:$0xff] %v8157_v12  ;;  %4404 = vmatmul.mubr.f32.gmra.mrb[100].mxu1 %v8014_v26  ;;  %v8341_v12 = vld [vmem:[#allocation2 + $0xea] sm:$0xff] }
 0x450   : > { %4473 = vmatprep.mubr.f32.mxu1 %v3210_v62  ;;  %v3901_v62 = vld [vmem:[#allocation9 + $0x388] sm:$0xff] }
 0x451   : > { %v6008_v50 = vpack.c.bf16 %v3901_v62, %v3900_v13  ;;  %v3910_v13 = vld [vmem:[#allocation9 + $0x3d0] sm:$0xff]  ;;  %v3911_v62 = vld [vmem:[#allocation9 + $0x3d8] sm:$0xff] }
 0x453   : > { %4474 = vmatmul.mubr.f32.vlgmr.msra.gmra.mrb[34].mxu1 %v8042_v9  ;;  %v3894_v9 = vld [vmem:[#allocation9 + $0x350] sm:$0xff] }
 0x454   : > { %4478 = vmatprep.mubr.f32.mxu1 %v3211_v8  ;;  %5985 = vmatpush1.bf16.msra.mxu1 %v5984_v3  ;;  %v3902_v8 = vld [vmem:[#allocation9 + $0x390] sm:$0xff] }
 0x455   : > { %v8161_v29 = vpop.f32.mrb[78].mxu0  ;;  %5986 = vmatprep.subr.bf16.mxu1 %v8714_v10 }
 0x456   : > { %8746 = vst [vmem:[#allocation35_spill] sm:$0xff] %v8161_v29  ;;  %v8164_v14 = vpop.f32.mrb[79].mxu0  ;;  %v8332_v29 = vld [vmem:[#allocation2 + $0xe3] sm:$0xff] }
 0x457   : > { %8747 = vst [vmem:[#allocation36_spill] sm:$0xff] %v8164_v14  ;;  %4479 = vmatmul.mubr.f32.gmra.mrb[36].mxu1 %v8046_v24  ;;  %v3895_v24 = vld [vmem:[#allocation9 + $0x358] sm:$0xff]  ;;  %v8335_v14 = vld [vmem:[#allocation2 + $0xe2] sm:$0xff] }
 0x458   : > { %4483 = vmatprep.mubr.f32.mxu1 %v8167_v6  ;;  %5988 = vmatpush1.bf16.msra.mxu1 %v5987_v34  ;;  %v5999_v61 = vpack.c.bf16 %v3895_v24, %v3894_v9  ;;  %v3903_v34 = vld [vmem:[#allocation9 + $0x398] sm:$0xff] }
 0x459   : > { %5989 = vmatprep.subr.bf16.mxu1 %v8714_v10  ;;  %v6011_v18 = vpack.c.bf16 %v3903_v34, %v3902_v8  ;;  %v3907_v9 = vld [vmem:[#allocation9 + $0x3b8] sm:$0xff]  ;;  %v6023_v8 = vpack.c.bf16 %v3911_v62, %v3910_v13 }
 0x45a   : > { %v8228_v24 = vld [vmem:[#allocation2 + $0x6b] sm:$0xff] }
 0x45b   : > { %4484 = vmatmul.mubr.f32.gmra.mrb[38].mxu1 %v8050_v16 }
 0x45c   : > { %4488 = vmatprep.mubr.f32.mxu1 %v8172_v32  ;;  %5991 = vmatpush1.bf16.msra.mxu1 %v5990_v23 }
 0x45d   : > { %v8175_v1 = vpop.f32.mrb[80].mxu0  ;;  %5992 = vmatprep.subr.bf16.mxu1 %v8714_v10 }
 0x45e   : > { %8748 = vst [vmem:[#allocation37_spill] sm:$0xff] %v8175_v1  ;;  %v8178_v46 = vpop.f32.mrb[81].mxu0  ;;  %v8326_v1 = vld [vmem:[#allocation2 + $0xdb] sm:$0xff] }
 0x45f   : > { %8749 = vst [vmem:[#allocation38_spill] sm:$0xff] %v8178_v46  ;;  %4489 = vmatmul.mubr.f32.gmra.mrb[40].mxu1 %v8054_v35  ;;  %v8329_v46 = vld [vmem:[#allocation2 + $0xda] sm:$0xff] }
 0x460   : > { %4493 = vmatprep.mubr.f32.mxu1 %v8181_v38  ;;  %5994 = vmatpush1.bf16.msra.mxu1 %v5993_v60 }
 0x461   : > { %5995 = vmatprep.subr.bf16.mxu1 %v8714_v10 }
 0x463   : > { %4494 = vmatmul.mubr.f32.gmra.mrb[42].mxu1 %v8059_v41 }
 0x464   : > { %4498 = vmatprep.mubr.f32.mxu1 %v8186_v11  ;;  %5997 = vmatpush1.bf16.msra.mxu1 %v5996_v27  ;;  %v3906_v27 = vld [vmem:[#allocation9 + $0x3b0] sm:$0xff] }
 0x465   : > { %v8189_v59 = vpop.f32.mrb[82].mxu0  ;;  %5998 = vmatprep.subr.bf16.mxu1 %v8714_v10 }
 0x466   : > { %8750 = vst [vmem:[#allocation39_spill] sm:$0xff] %v8189_v59  ;;  %v8192_v49 = vpop.f32.mrb[83].mxu0  ;;  %v8320_v59 = vld [vmem:[#allocation2 + $0xd3] sm:$0xff] }
 0x467   : > { %8751 = vst [vmem:[#allocation40_spill] sm:$0xff] %v8192_v49  ;;  %4499 = vmatmul.mubr.f32.gmra.mrb[44].mxu1 %v8064_v22  ;;  %v8323_v49 = vld [vmem:[#allocation2 + $0xd2] sm:$0xff] }
 0x468   : > { %4503 = vmatprep.mubr.f32.mxu1 %v8195_v51  ;;  %6000 = vmatpush1.bf16.msra.mxu1 %v5999_v61  ;;  %v6017_v61 = vpack.c.bf16 %v3907_v9, %v3906_v27  ;;  %v8253_v27 = vld [vmem:[#allocation2 + $0x83] sm:$0xff] }
 0x469   : > { %6001 = vmatprep.subr.bf16.mxu1 %v8714_v10 }
 0x46b   : > { %4504 = vmatmul.mubr.f32.gmra.mrb[46].mxu1 %v8069_v44 }
 0x46c   : > { %4508 = vmatprep.mubr.f32.mxu1 %v8200_v48  ;;  %6003 = vmatpush1.bf16.msra.mxu1 %v6002_v47  ;;  %v3909_v47 = vld [vmem:[#allocation9 + $0x3c8] sm:$0xff] }
 0x46d   : > { %v8203_v42 = vpop.f32.mrb[84].mxu0  ;;  %6004 = vmatprep.subr.bf16.mxu1 %v8714_v10 }
 0x46e   : > { %8752 = vst [vmem:[#allocation41_spill] sm:$0xff] %v8203_v42  ;;  %v8206_v3 = vpop.f32.mrb[85].mxu0  ;;  %v8314_v42 = vld [vmem:[#allocation2 + $0xcb] sm:$0xff] }
 0x46f   : > { %8753 = vst [vmem:[#allocation42_spill] sm:$0xff] %v8206_v3  ;;  %4509 = vmatmul.mubr.f32.gmra.mrb[48].mxu1 %v8074_v54  ;;  %v8317_v3 = vld [vmem:[#allocation2 + $0xca] sm:$0xff] }
 0x470   : > { %4513 = vmatprep.mubr.f32.mxu1 %v8209_v52  ;;  %6006 = vmatpush1.bf16.msra.mxu1 %v6005_v21  ;;  %v6020_v21 = vpack.c.bf16 %v3909_v47, %v3908_v56  ;;  %v3915_v56 = vld [vmem:[#allocation9 + $0x3f8] sm:$0xff]  ;;  %v8257_v47 = vld [vmem:[#allocation2 + $0x82] sm:$0xff] }
 0x471   : > { %6007 = vmatprep.subr.bf16.mxu1 %v8714_v10 }
 0x473   : > { %4514 = vmatmul.mubr.f32.gmra.mrb[50].mxu1 %v8079_v5 }
 0x474   : > { %4518 = vmatprep.mubr.f32.mxu1 %v8214_v30  ;;  %6009 = vmatpush1.bf16.msra.mxu1 %v6008_v50  ;;  %v8242_v50 = vld [vmem:[#allocation2 + $0x7b] sm:$0xff] }
 0x475   : > { %v8217_v23 = vpop.f32.mrb[86].mxu0  ;;  %6010 = vmatprep.subr.bf16.mxu1 %v8714_v10 }
 0x476   : > { %8754 = vst [vmem:[#allocation43_spill] sm:$0xff] %v8217_v23  ;;  %v8220_v60 = vpop.f32.mrb[87].mxu0  ;;  %v8308_v23 = vld [vmem:[#allocation2 + $0xc3] sm:$0xff] }
 0x477   : > { %8755 = vst [vmem:[#allocation44_spill] sm:$0xff] %v8220_v60  ;;  %4519 = vmatmul.mubr.f32.gmra.mrb[52].mxu1 %v8084_v15  ;;  %v8311_v60 = vld [vmem:[#allocation2 + $0xc2] sm:$0xff] }
 0x478   : > { %4523 = vmatprep.mubr.f32.mxu1 %v8223_v7  ;;  %6012 = vmatpush1.bf16.msra.mxu1 %v6011_v18  ;;  %v3912_v18 = vld [vmem:[#allocation9 + $0x3e0] sm:$0xff] }
 0x479   : > { %6013 = vmatprep.subr.bf16.mxu1 %v8714_v10  ;;  %v6026_v9 = vpack.c.bf16 %v3913_v31, %v3912_v18  ;;  %v8268_v18 = vld [vmem:[#allocation2 + $0x8a] sm:$0xff]  ;;  %v8271_v31 = vld [vmem:[#allocation2 + $0x93] sm:$0xff] }
 0x47b   : > { %4524 = vmatmul.mubr.f32.gmra.mrb[54].mxu1 %v8089_v2 }
 0x47c   : > { %4528 = vmatprep.mubr.f32.mxu1 %v8228_v24  ;;  %6015 = vmatpush1.bf16.msra.mxu1 %v6014_v28  ;;  %v8250_v28 = vld [vmem:[#allocation2 + $0x7a] sm:$0xff] }
 0x47d   : > { %v8231_v33 = vpop.f32.mrb[88].mxu0  ;;  %6016 = vmatprep.subr.bf16.mxu1 %v8714_v10 }
 0x47e   : > { %8756 = vst [vmem:[#allocation45_spill] sm:$0xff] %v8231_v33  ;;  %v8234_v40 = vpop.f32.mrb[89].mxu0  ;;  %v8302_v33 = vld [vmem:[#allocation2 + $0xbb] sm:$0xff] }
 0x47f   : > { %8757 = vst [vmem:[#allocation46_spill] sm:$0xff] %v8234_v40  ;;  %4529 = vmatmul.mubr.f32.gmra.mrb[56].mxu1 %v8094_v36  ;;  %v8305_v40 = vld [vmem:[#allocation2 + $0xba] sm:$0xff] }
 0x480   : > { %4533 = vmatprep.mubr.f32.mxu1 %v8237_v25  ;;  %6018 = vmatpush1.bf16.msra.mxu1 %v6017_v61  ;;  %v3914_v61 = vld [vmem:[#allocation9 + $0x3f0] sm:$0xff] }
 0x481   : > { %6019 = vmatprep.subr.bf16.mxu1 %v8714_v10  ;;  %v6029_v13 = vpack.c.bf16 %v3915_v56, %v3914_v61  ;;  %v8284_v61 = vld [vmem:[#allocation2 + $0xa3] sm:$0xff] }
 0x482   : > { %v8287_v56 = vld [vmem:[#allocation2 + $0xa2] sm:$0xff] }
 0x483   : > { %4534 = vmatmul.mubr.f32.gmra.mrb[58].mxu1 %v8099_v19 }
 0x484   : > { %4538 = vmatprep.mubr.f32.mxu1 %v8242_v50  ;;  %6021 = vmatpush1.bf16.msra.mxu1 %v6020_v21  ;;  %v8260_v21 = vld [vmem:[#allocation2 + $0x8b] sm:$0xff] }
 0x485   : > { %v8245_v34 = vpop.f32.mrb[90].mxu0  ;;  %6022 = vmatprep.subr.bf16.mxu1 %v8714_v10 }
 0x486   : > { %8758 = vst [vmem:[#allocation47_spill] sm:$0xff] %v8245_v34  ;;  %v8248_v63 = vpop.f32.mrb[91].mxu0  ;;  %v8275_v34 = vld [vmem:[#allocation2 + $0x92] sm:$0xff] }
 0x487   : > { %8759 = vst [vmem:[#allocation48_spill] sm:$0xff] %v8248_v63  ;;  %4539 = vmatmul.mubr.f32.gmra.mrb[60].mxu1 %v8250_v28  ;;  %v8299_v63 = vld [vmem:[#allocation2 + $0xb2] sm:$0xff] }
 0x488   : > { %4543 = vmatprep.mubr.f32.mxu1 %v8253_v27  ;;  %6024 = vmatpush1.bf16.msra.mxu1 %v6023_v8 }
 0x489   : > { %6025 = vmatprep.subr.bf16.mxu1 %v8714_v10 }
 0x48b   : > { %4544 = vmatmul.mubr.f32.gmra.mrb[62].mxu1 %v8257_v47 }
 0x48c   : > { %4548 = vmatprep.mubr.f32.mxu1 %v8260_v21  ;;  %6027 = vmatpush1.bf16.msra.mxu1 %v6026_v9  ;;  %v8278_v9 = vld [vmem:[#allocation2 + $0x9b] sm:$0xff] }
 0x48d   : > { %v8263_v62 = vpop.f32.mrb[92].mxu0  ;;  %6028 = vmatprep.subr.bf16.mxu1 %v8714_v10  ;;  %v8281_v10 = vld [vmem:[#allocation2 + $0x9a] sm:$0xff] }
 0x48e   : > { %8760 = vst [vmem:[#allocation49_spill] sm:$0xff] %v8263_v62  ;;  %v8266_v8 = vpop.f32.mrb[93].mxu0  ;;  %v8293_v62 = vld [vmem:[#allocation2 + $0xaa] sm:$0xff] }
 0x48f   : > { %8761 = vst [vmem:[#allocation50_spill] sm:$0xff] %v8266_v8  ;;  %4549 = vmatmul.mubr.f32.gmra.mrb[64].mxu1 %v8268_v18  ;;  %v8296_v8 = vld [vmem:[#allocation2 + $0xb3] sm:$0xff] }
 0x490   : > { %4553 = vmatprep.mubr.f32.mxu1 %v8271_v31  ;;  %6030 = vmatpush1.bf16.msra.mxu1 %v6029_v13  ;;  %v8290_v13 = vld [vmem:[#allocation2 + $0xab] sm:$0xff] }
 0x491   : > { %6063 = vmatprep.subr.bf16.mxu1 %v7648_v0 }
 0x493   : > { %4554 = vmatmul.mubr.f32.gmra.mrb[66].mxu1 %v8275_v34 }
 0x494   : > { %4558 = vmatprep.mubr.f32.mxu1 %v8278_v9 }
 0x497   : > { %4559 = vmatmul.mubr.f32.gmra.mrb[68].mxu1 %v8281_v10 }
 0x498   : > { %4563 = vmatprep.mubr.f32.mxu1 %v8284_v61 }
 0x49b   : > { %4564 = vmatmul.mubr.f32.gmra.mrb[70].mxu1 %v8287_v56 }
 0x49c   : > { %4568 = vmatprep.mubr.f32.mxu1 %v8290_v13 }
 0x49f   : > { %4569 = vmatmul.mubr.f32.gmra.mrb[72].mxu1 %v8293_v62 }
 0x4a0   : > { %4573 = vmatprep.mubr.f32.mxu1 %v8296_v8 }
 0x4a3   : > { %4574 = vmatmul.mubr.f32.gmra.mrb[74].mxu1 %v8299_v63 }
 0x4a4   : > { %4578 = vmatprep.mubr.f32.mxu1 %v8302_v33 }
 0x4a7   : > { %4579 = vmatmul.mubr.f32.gmra.mrb[76].mxu1 %v8305_v40 }
 0x4a8   : > { %4583 = vmatprep.mubr.f32.mxu1 %v8308_v23 }
 0x4ab   : > { %4584 = vmatmul.mubr.f32.gmra.mrb[78].mxu1 %v8311_v60 }
 0x4ac   : > { %4588 = vmatprep.mubr.f32.mxu1 %v8314_v42 }
 0x4af   : > { %4589 = vmatmul.mubr.f32.gmra.mrb[80].mxu1 %v8317_v3 }
 0x4b0   : > { %4593 = vmatprep.mubr.f32.mxu1 %v8320_v59 }
 0x4b3   : > { %4594 = vmatmul.mubr.f32.gmra.mrb[82].mxu1 %v8323_v49 }
 0x4b4   : > { %4598 = vmatprep.mubr.f32.mxu1 %v8326_v1 }
 0x4b7   : > { %4599 = vmatmul.mubr.f32.gmra.mrb[84].mxu1 %v8329_v46 }
 0x4b8   : > { %4603 = vmatprep.mubr.f32.mxu1 %v8332_v29 }
 0x4bb   : > { %4604 = vmatmul.mubr.f32.gmra.mrb[86].mxu1 %v8335_v14 }
 0x4bc   : > { %4608 = vmatprep.mubr.f32.mxu1 %v8338_v17 }
 0x4bf   : > { %4609 = vmatmul.mubr.f32.gmra.mrb[88].mxu1 %v8341_v12 }
 0x4c0   : > { %4613 = vmatprep.mubr.f32.mxu1 %v8344_v57 }
 0x4c3   : > { %4614 = vmatmul.mubr.f32.gmra.mrb[90].mxu1 %v8347_v43 }
 0x4c4   : > { %4618 = vmatprep.mubr.f32.mxu1 %v8350_v20 }
 0x4c7   : > { %4619 = vmatmul.mubr.f32.gmra.mrb[92].mxu1 %v8353_v39  ;;  %v8370_v39 = vld [vmem:[#allocation2 + $0x11b] sm:$0xff] }
 0x4c8   : > { %4623 = vmatprep.mubr.f32.mxu1 %v8356_v37 }
 0x4cb   : > { %4624 = vmatmul.mubr.f32.gmra.mrb[94].mxu1 %v8359_v55 }
 0x4cc   : > { %4628 = vmatprep.mubr.f32.mxu1 %v8362_v58 }
 0x4cf   : > { %4629 = vmatmul.mubr.f32.gmra.mrb[96].mxu1 %v8014_v26  ;;  %v8763_v26 = vld [vmem:[#allocation18_spill] sm:$0xff] }
 0x4d0   : > { %4633 = vmatprep.mubr.f32.mxu1 %v8366_v45 }
 0x4d3   : > { %4634 = vmatmul.mubr.f32.gmra.mrb[98].mxu1 %v8025_v53  ;;  %v8764_v53 = vld [vmem:[#allocation26_spill] sm:$0xff] }
 0x4d4   : > { %4638 = vmatprep.mubr.f32.mxu1 %v8370_v39 }
 0x4d7   : > { %4639 = vmatmul.mubr.f32.gmra.mrb[100].mxu1 %v8034_v4  ;;  %v8765_v4 = vld [vmem:[#allocation19_spill] sm:$0xff] }
 0x4d8   : > { %4708 = vmatprep.mubr.f32.mxu1 %v8167_v6  ;;  %v8771_v6 = vld [vmem:[#allocation22_spill] sm:$0xff] }
 0x4db   : > { %4709 = vmatmul.mubr.f32.vlgmr.msra.gmra.mrb[34].mxu1 %v8050_v16  ;;  %v8768_v16 = vld [vmem:[#allocation28_spill] sm:$0xff] }
 0x4dc   : > { %4713 = vmatprep.mubr.f32.mxu1 %v8172_v32  ;;  %6071 = vmatpush3.bf16.msra.mxu1 %v7648_v0  ;;  %v8766_v0 = vld [vmem:[#allocation27_spill] sm:$0xff] }
 0x4dd   : > { %6064 = vmatprep.subr.bf16.mxu1 %v8763_v26 }
 0x4df   : > { %4714 = vmatmul.mubr.f32.gmra.mrb[36].mxu1 %v8054_v35  ;;  %v8767_v35 = vld [vmem:[#allocation20_spill] sm:$0xff] }
 0x4e0   : > { %4718 = vmatprep.mubr.f32.mxu1 %v8181_v38  ;;  %6072 = vmatpush3.bf16.msra.mxu1 %v8763_v26 }
 0x4e1   : > { %6065 = vmatprep.subr.bf16.mxu1 %v8764_v53 }
 0x4e3   : > { %4719 = vmatmul.mubr.f32.gmra.mrb[38].mxu1 %v8059_v41  ;;  %v8769_v41 = vld [vmem:[#allocation21_spill] sm:$0xff] }
 0x4e4   : > { %4723 = vmatprep.mubr.f32.mxu1 %v8186_v11  ;;  %6073 = vmatpush3.bf16.msra.mxu1 %v8764_v53 }
 0x4e5   : > { %6066 = vmatprep.subr.bf16.mxu1 %v8765_v4 }
 0x4e7   : > { %4724 = vmatmul.mubr.f32.gmra.mrb[40].mxu1 %v8064_v22  ;;  %v8770_v22 = vld [vmem:[#allocation51_spill] sm:$0xff] }
 0x4e8   : > { %4728 = vmatprep.mubr.f32.mxu1 %v8195_v51  ;;  %6074 = vmatpush3.bf16.msra.mxu1 %v8765_v4 }
 0x4e9   : > { %6067 = vmatprep.subr.bf16.mxu1 %v8766_v0 }
 0x4eb   : > { %4729 = vmatmul.mubr.f32.gmra.mrb[42].mxu1 %v8069_v44  ;;  %v3307_v44 = vld [vmem:[#allocation2 + $0x10a] sm:$0xff] }
 0x4ec   : > { %4733 = vmatprep.mubr.f32.mxu1 %v8200_v48  ;;  %6075 = vmatpush3.bf16.msra.mxu1 %v8766_v0 }
 0x4ed   : > { %6068 = vmatprep.subr.bf16.mxu1 %v8767_v35 }
 0x4ef   : > { %4734 = vmatmul.mubr.f32.gmra.mrb[44].mxu1 %v8074_v54  ;;  %v3308_v54 = vld [vmem:[#allocation2 + $0x112] sm:$0xff] }
 0x4f0   : > { %4738 = vmatprep.mubr.f32.mxu1 %v8209_v52  ;;  %6076 = vmatpush3.bf16.msra.mxu1 %v8767_v35  ;;  %v5120_v35 = vld [vmem:[%s7132_s23 + $0x30] sm:$0xff] }
 0x4f1   : > { %6069 = vmatprep.subr.bf16.mxu1 %v8768_v16 }
 0x4f3   : > { %4739 = vmatmul.mubr.f32.gmra.mrb[46].mxu1 %v8079_v5  ;;  %v3378_v5 = vld [vmem:[#allocation2 + $0x123] sm:$0xff] }
 0x4f4   : > { %4743 = vmatprep.mubr.f32.mxu1 %v8214_v30  ;;  %6077 = vmatpush3.bf16.msra.mxu1 %v8768_v16  ;;  %v5116_v30 = vld [vmem:[%s7132_s23 + $0x10] sm:$0xff] }
 0x4f5   : > { %6070 = vmatprep.subr.bf16.mxu1 %v8769_v41  ;;  %v8777_v16 = vld [vmem:[#allocation32_spill] sm:$0xff] }
 0x4f7   : > { %4744 = vmatmul.mubr.f32.gmra.mrb[48].mxu1 %v8084_v15  ;;  %v3309_v15 = vld [vmem:[#allocation2 + $0x11a] sm:$0xff] }
 0x4f8   : > { %4748 = vmatprep.mubr.f32.mxu1 %v8223_v7  ;;  %6078 = vmatpush3.bf16.msra.mxu1 %v8769_v41 }
 0x4fb   : > { %4749 = vmatmul.mubr.f32.gmra.mrb[50].mxu1 %v8089_v2  ;;  %v3379_v2 = vld [vmem:[#allocation2 + $0x12b] sm:$0xff] }
 0x4fc   : > { %4753 = vmatprep.mubr.f32.mxu1 %v8228_v24 }
 0x4ff   : > { %4754 = vmatmul.mubr.f32.gmra.mrb[52].mxu1 %v8094_v36  ;;  %v6679_v36 = vld [vmem:[#allocation2] sm:$0xff] }
 0x500   : > { %4758 = vmatprep.mubr.f32.mxu1 %v8237_v25  ;;  %v5117_v25 = vld [vmem:[%s7132_s23 + $0x18] sm:$0xff] }
 0x503   : > { %4759 = vmatmul.mubr.f32.gmra.mrb[54].mxu1 %v8099_v19  ;;  %v3440_v19 = vld [vmem:[#allocation2 + $0xf4] sm:$0xff] }
 0x504   : > { %4763 = vmatprep.mubr.f32.mxu1 %v8242_v50  ;;  %v8774_v50 = vld [vmem:[#allocation30_spill] sm:$0xff] }
 0x507   : > { %4764 = vmatmul.mubr.f32.gmra.mrb[56].mxu1 %v8250_v28 }
 0x508   : > { %4768 = vmatprep.mubr.f32.mxu1 %v8253_v27 }
 0x50b   : > { %4769 = vmatmul.mubr.f32.gmra.mrb[58].mxu1 %v8257_v47 }
 0x50c   : > { %4773 = vmatprep.mubr.f32.mxu1 %v8260_v21  ;;  %v5118_v21 = vld [vmem:[%s7132_s23 + $0x20] sm:$0xff] }
 0x50f   : > { %4774 = vmatmul.mubr.f32.gmra.mrb[60].mxu1 %v8268_v18 }
 0x510   : > { %4778 = vmatprep.mubr.f32.mxu1 %v8271_v31 }
 0x513   : > { %4779 = vmatmul.mubr.f32.gmra.mrb[62].mxu1 %v8275_v34 }
 0x514   : > { %4783 = vmatprep.mubr.f32.mxu1 %v8278_v9 }
 0x517   : > { %4784 = vmatmul.mubr.f32.gmra.mrb[64].mxu1 %v8281_v10 }
 0x518   : > { %4788 = vmatprep.mubr.f32.mxu1 %v8284_v61  ;;  %v5119_v61 = vld [vmem:[%s7132_s23 + $0x28] sm:$0xff] }
 0x51b   : > { %4789 = vmatmul.mubr.f32.gmra.mrb[66].mxu1 %v8287_v56  ;;  %v8776_v56 = vld [vmem:[#allocation24_spill] sm:$0xff] }
 0x51c   : > { %4793 = vmatprep.mubr.f32.mxu1 %v8290_v13 }
 0x51f   : > { %4794 = vmatmul.mubr.f32.gmra.mrb[68].mxu1 %v8293_v62  ;;  %v8775_v62 = vld [vmem:[#allocation25_spill] sm:$0xff] }
 0x520   : > { %4798 = vmatprep.mubr.f32.mxu1 %v8296_v8 }
 0x523   : > { %4799 = vmatmul.mubr.f32.gmra.mrb[70].mxu1 %v8299_v63 }
 0x524   : > { %4803 = vmatprep.mubr.f32.mxu1 %v8302_v33 }
 0x527   : > { %4804 = vmatmul.mubr.f32.gmra.mrb[72].mxu1 %v8305_v40 }
 0x528   : > { %4808 = vmatprep.mubr.f32.mxu1 %v8308_v23  ;;  %v8773_v23 = vld [vmem:[#allocation23_spill] sm:$0xff] }
 0x52b   : > { %4809 = vmatmul.mubr.f32.gmra.mrb[74].mxu1 %v8311_v60 }
 0x52c   : > { %4813 = vmatprep.mubr.f32.mxu1 %v8314_v42 }
 0x52f   : > { %4814 = vmatmul.mubr.f32.gmra.mrb[76].mxu1 %v8317_v3 }
 0x530   : > { %4818 = vmatprep.mubr.f32.mxu1 %v8320_v59  ;;  %v5115_v59 = vld [vmem:[%s7132_s23 + $0x8] sm:$0xff] }
 0x533   : > { %4819 = vmatmul.mubr.f32.gmra.mrb[78].mxu1 %v8323_v49  ;;  %v8772_v49 = vld [vmem:[#allocation29_spill] sm:$0xff] }
 0x534   : > { %4823 = vmatprep.mubr.f32.mxu1 %v8326_v1 }
 0x537   : > { %4824 = vmatmul.mubr.f32.gmra.mrb[80].mxu1 %v8329_v46 }
 0x538   : > { %4828 = vmatprep.mubr.f32.mxu1 %v8332_v29 }
 0x53b   : > { %4829 = vmatmul.mubr.f32.gmra.mrb[82].mxu1 %v8335_v14  ;;  %v5114_v14 = vld [vmem:[%s7132_s23] sm:$0xff] }
 0x53c   : > { %4833 = vmatprep.mubr.f32.mxu1 %v8338_v17 }
 0x53f   : > { %4834 = vmatmul.mubr.f32.gmra.mrb[84].mxu1 %v8341_v12 }
 0x540   : > { %4838 = vmatprep.mubr.f32.mxu1 %v8344_v57  ;;  %v3447_v57 = vld [vmem:[#allocation2 + $0x12c] sm:$0xff] }
 0x543   : > { %4839 = vmatmul.mubr.f32.gmra.mrb[86].mxu1 %v8347_v43  ;;  %v8453_v43 = vld [vmem:[%s8643_s5] ss:$0 sm:$0xff] }
 0x544   : > { %4843 = vmatprep.mubr.f32.mxu1 %v8350_v20  ;;  %v3446_v20 = vld [vmem:[#allocation2 + $0x124] sm:$0xff] }
 0x547   : > { %4844 = vmatmul.mubr.f32.gmra.mrb[88].mxu1 %v8770_v22 }
 0x548   : > { %4848 = vmatprep.mubr.f32.mxu1 %v8356_v37  ;;  %v3442_v37 = vld [vmem:[#allocation2 + $0x104] sm:$0xff] }
 0x54b   : > { %4849 = vmatmul.mubr.f32.gmra.mrb[90].mxu1 %v8359_v55  ;;  %v3444_v55 = vld [vmem:[#allocation2 + $0x114] sm:$0xff] }
 0x54c   : > { %4853 = vmatprep.mubr.f32.mxu1 %v8362_v58  ;;  %v3441_v58 = vld [vmem:[#allocation2 + $0xfc] sm:$0xff] }
 0x54f   : > { %4854 = vmatmul.mubr.f32.gmra.mrb[92].mxu1 %v3307_v44 }
 0x550   : > { %4858 = vmatprep.mubr.f32.mxu1 %v8366_v45  ;;  %v3443_v45 = vld [vmem:[#allocation2 + $0x10c] sm:$0xff] }
 0x553   : > { %4859 = vmatmul.mubr.f32.gmra.mrb[94].mxu1 %v3308_v54 }
 0x554   : > { %4863 = vmatprep.mubr.f32.mxu1 %v8370_v39  ;;  %v3445_v39 = vld [vmem:[#allocation2 + $0x11c] sm:$0xff] }
 0x557   : > { %4864 = vmatmul.mubr.f32.gmra.mrb[96].mxu1 %v3309_v15  ;;  %v5121_v15 = vld [vmem:[%s7132_s23 + $0x38] sm:$0xff] }
 0x558   : > { %4868 = vmatprep.mubr.f32.mxu1 %v3378_v5 }
 0x55b   : > { %4869 = vmatmul.mubr.f32.gmra.mrb[98].mxu1 %v6679_v36 }
 0x55c   : > { %4873 = vmatprep.mubr.f32.mxu1 %v3379_v2  ;;  %v8778_v2 = vld [vmem:[#allocation31_spill] sm:$0xff] }
 0x55f   : > { %4874 = vmatmul.mubr.f32.gmra.mrb[100].mxu1 %v6679_v36 }
 0x560   : > { %5603 = vmatprep.mubr.f32.mxu1 %v3440_v19 }
 0x563   : > { %5604 = vmatmul.mubr.f32.vlgmr.msra.gmra.mrb[102].mxu1 %v3441_v58 }
 0x564   : > { %5606 = vmatprep.mubr.f32.mxu1 %v3442_v37 }
 0x567   : > { %5607 = vmatmul.mubr.f32.gmra.mrb[104].mxu1 %v3443_v45 }
 0x568   : > { %5609 = vmatprep.mubr.f32.mxu1 %v3444_v55  ;;  %v5122_v55 = vld [vmem:[%s7132_s23 + $0x40] sm:$0xff] }
 0x56b   : > { %5610 = vmatmul.mubr.f32.gmra.mrb[106].mxu1 %v3445_v39 }
 0x56c   : > { %5612 = vmatprep.mubr.f32.mxu1 %v3446_v20  ;;  %v8779_v20 = vld [vmem:[#allocation34_spill] sm:$0xff] }
 0x56f   : > { %5613 = vmatmul.mubr.f32.gmra.mrb[108].mxu1 %v3447_v57 }
 0x5ae   : > { %v4710_v17 = vpop.f32.mrb[34].mxu1 }
 0x5af   : > { %v6113_v12 = vadd.f32 %v8453_v43, %v4710_v17  ;;  %v4712_v29 = vpop.f32.mrb[35].mxu1 }
 0x5b1   : > { %v4946_v32 = vadd.f32 %v6113_v12, %v8771_v6  ;;  %v8780_v6 = vld [vmem:[#allocation33_spill] sm:$0xff] }
 0x5b2   : > { %v4715_v1 = vpop.f32.mrb[36].mxu1 }
 0x5b3   : > { %v5148_v46 = vadd.f32 %v5114_v14, %v4946_v32  ;;  %v6114_v38 = vadd.f32 %v8453_v43, %v4715_v1  ;;  %v4717_v11 = vpop.f32.mrb[37].mxu1  ;;  %v5123_v14 = vld [vmem:[%s7132_s23 + $0x48] sm:$0xff] }
 0x5b5   : > { %5182 = vst [vmem:[%s8462_s17] sm:$0xff] %v5148_v46  ;;  %v4951_v51 = vadd.f32 %v6114_v38, %v8772_v49  ;;  %v8781_v49 = vld [vmem:[#allocation36_spill] sm:$0xff] }
 0x5b6   : > { %v4720_v48 = vpop.f32.mrb[38].mxu1 }
 0x5b7   : > { %v5149_v42 = vadd.f32 %v5115_v59, %v4951_v51  ;;  %v6115_v3 = vadd.f32 %v8453_v43, %v4720_v48  ;;  %v4722_v52 = vpop.f32.mrb[39].mxu1  ;;  %v5124_v59 = vld [vmem:[%s7132_s23 + $0x50] sm:$0xff] }
 0x5b9   : > { %5183 = vst [vmem:[%s8462_s17 + $0x8] sm:$0xff] %v5149_v42  ;;  %v4956_v60 = vadd.f32 %v6115_v3, %v8773_v23  ;;  %v8782_v23 = vld [vmem:[#allocation35_spill] sm:$0xff] }
 0x5ba   : > { %v4725_v7 = vpop.f32.mrb[40].mxu1 }
 0x5bb   : > { %v5150_v24 = vadd.f32 %v5116_v30, %v4956_v60  ;;  %v6116_v33 = vadd.f32 %v8453_v43, %v4725_v7  ;;  %v4727_v40 = vpop.f32.mrb[41].mxu1  ;;  %v5125_v30 = vld [vmem:[%s7132_s23 + $0x58] sm:$0xff] }
 0x5bd   : > { %5184 = vst [vmem:[%s8462_s17 + $0x10] sm:$0xff] %v5150_v24  ;;  %v4961_v34 = vadd.f32 %v6116_v33, %v8774_v50  ;;  %v8783_v50 = vld [vmem:[#allocation38_spill] sm:$0xff] }
 0x5be   : > { %v4730_v63 = vpop.f32.mrb[42].mxu1 }
 0x5bf   : > { %v5151_v28 = vadd.f32 %v5117_v25, %v4961_v34  ;;  %v6117_v27 = vadd.f32 %v8453_v43, %v4730_v63  ;;  %v4732_v47 = vpop.f32.mrb[43].mxu1  ;;  %v5126_v25 = vld [vmem:[%s7132_s23 + $0x60] sm:$0xff] }
 0x5c1   : > { %5185 = vst [vmem:[%s8462_s17 + $0x18] sm:$0xff] %v5151_v28  ;;  %v4966_v8 = vadd.f32 %v6117_v27, %v8775_v62  ;;  %v8784_v62 = vld [vmem:[#allocation37_spill] sm:$0xff] }
 0x5c2   : > { %v4735_v18 = vpop.f32.mrb[44].mxu1 }
 0x5c3   : > { %v5152_v31 = vadd.f32 %v5118_v21, %v4966_v8  ;;  %v6118_v9 = vadd.f32 %v8453_v43, %v4735_v18  ;;  %v4737_v10 = vpop.f32.mrb[45].mxu1  ;;  %v5127_v21 = vld [vmem:[%s7132_s23 + $0x68] sm:$0xff] }
 0x5c5   : > { %5186 = vst [vmem:[%s8462_s17 + $0x20] sm:$0xff] %v5152_v31  ;;  %v4971_v13 = vadd.f32 %v6118_v9, %v8776_v56  ;;  %v8785_v56 = vld [vmem:[#allocation40_spill] sm:$0xff] }
 0x5c6   : > { %v4740_v26 = vpop.f32.mrb[46].mxu1 }
 0x5c7   : > { %v5153_v53 = vadd.f32 %v5119_v61, %v4971_v13  ;;  %v6119_v4 = vadd.f32 %v8453_v43, %v4740_v26  ;;  %v4742_v0 = vpop.f32.mrb[47].mxu1  ;;  %v5128_v61 = vld [vmem:[%s7132_s23 + $0x70] sm:$0xff] }
 0x5c9   : > { %5187 = vst [vmem:[%s8462_s17 + $0x28] sm:$0xff] %v5153_v53  ;;  %v4976_v41 = vadd.f32 %v6119_v4, %v8777_v16  ;;  %v8786_v16 = vld [vmem:[#allocation39_spill] sm:$0xff] }
 0x5ca   : > { %v4745_v22 = vpop.f32.mrb[48].mxu1 }
 0x5cb   : > { %v5154_v44 = vadd.f32 %v5120_v35, %v4976_v41  ;;  %v6120_v54 = vadd.f32 %v8453_v43, %v4745_v22  ;;  %v4747_v5 = vpop.f32.mrb[49].mxu1  ;;  %v5129_v35 = vld [vmem:[%s7132_s23 + $0x78] sm:$0xff] }
 0x5cd   : > { %5188 = vst [vmem:[%s8462_s17 + $0x30] sm:$0xff] %v5154_v44  ;;  %v4981_v36 = vadd.f32 %v6120_v54, %v8778_v2  ;;  %v8787_v2 = vld [vmem:[#allocation42_spill] sm:$0xff] }
 0x5ce   : > { %v4750_v19 = vpop.f32.mrb[50].mxu1 }
 0x5cf   : > { %v5155_v58 = vadd.f32 %v5121_v15, %v4981_v36  ;;  %v6121_v37 = vadd.f32 %v8453_v43, %v4750_v19  ;;  %v4752_v45 = vpop.f32.mrb[51].mxu1  ;;  %v5130_v15 = vld [vmem:[%s7132_s23 + $0x80] sm:$0xff] }
 0x5d1   : > { %5189 = vst [vmem:[%s8462_s17 + $0x38] sm:$0xff] %v5155_v58  ;;  %v4986_v39 = vadd.f32 %v6121_v37, %v8779_v20  ;;  %v8788_v20 = vld [vmem:[#allocation41_spill] sm:$0xff] }
 0x5d2   : > { %v4755_v57 = vpop.f32.mrb[52].mxu1 }
 0x5d3   : > { %v5156_v17 = vadd.f32 %v5122_v55, %v4986_v39  ;;  %v6122_v12 = vadd.f32 %v8453_v43, %v4755_v57  ;;  %v4757_v29 = vpop.f32.mrb[53].mxu1  ;;  %v5131_v55 = vld [vmem:[%s7132_s23 + $0x88] sm:$0xff] }
 0x5d5   : > { %5190 = vst [vmem:[%s8462_s17 + $0x40] sm:$0xff] %v5156_v17  ;;  %v4991_v32 = vadd.f32 %v6122_v12, %v8780_v6  ;;  %v8789_v6 = vld [vmem:[#allocation44_spill] sm:$0xff] }
 0x5d6   : > { %v4760_v1 = vpop.f32.mrb[54].mxu1 }
 0x5d7   : > { %v5157_v46 = vadd.f32 %v5123_v14, %v4991_v32  ;;  %v6123_v38 = vadd.f32 %v8453_v43, %v4760_v1  ;;  %v4762_v11 = vpop.f32.mrb[55].mxu1  ;;  %v5132_v14 = vld [vmem:[%s7132_s23 + $0x90] sm:$0xff] }
 0x5d9   : > { %5191 = vst [vmem:[%s8462_s17 + $0x48] sm:$0xff] %v5157_v46  ;;  %v4996_v51 = vadd.f32 %v6123_v38, %v8781_v49  ;;  %v8790_v49 = vld [vmem:[#allocation43_spill] sm:$0xff] }
 0x5da   : > { %v4765_v48 = vpop.f32.mrb[56].mxu1 }
 0x5db   : > { %v5158_v42 = vadd.f32 %v5124_v59, %v4996_v51  ;;  %v6124_v3 = vadd.f32 %v8453_v43, %v4765_v48  ;;  %v4767_v52 = vpop.f32.mrb[57].mxu1  ;;  %v5133_v59 = vld [vmem:[%s7132_s23 + $0x98] sm:$0xff] }
 0x5dd   : > { %5192 = vst [vmem:[%s8462_s17 + $0x50] sm:$0xff] %v5158_v42  ;;  %v5001_v60 = vadd.f32 %v6124_v3, %v8782_v23  ;;  %v8791_v23 = vld [vmem:[#allocation46_spill] sm:$0xff] }
 0x5de   : > { %v4770_v7 = vpop.f32.mrb[58].mxu1 }
 0x5df   : > { %v5159_v24 = vadd.f32 %v5125_v30, %v5001_v60  ;;  %v6125_v33 = vadd.f32 %v8453_v43, %v4770_v7  ;;  %v4772_v40 = vpop.f32.mrb[59].mxu1  ;;  %v5134_v30 = vld [vmem:[%s7132_s23 + $0xa0] sm:$0xff] }
 0x5e1   : > { %5193 = vst [vmem:[%s8462_s17 + $0x58] sm:$0xff] %v5159_v24  ;;  %v5006_v34 = vadd.f32 %v6125_v33, %v8783_v50  ;;  %v8792_v50 = vld [vmem:[#allocation45_spill] sm:$0xff] }
 0x5e2   : > { %v4775_v63 = vpop.f32.mrb[60].mxu1 }
 0x5e3   : > { %v5160_v28 = vadd.f32 %v5126_v25, %v5006_v34  ;;  %v6126_v27 = vadd.f32 %v8453_v43, %v4775_v63  ;;  %v4777_v47 = vpop.f32.mrb[61].mxu1  ;;  %v5135_v25 = vld [vmem:[%s7132_s23 + $0xa8] sm:$0xff] }
 0x5e5   : > { %5194 = vst [vmem:[%s8462_s17 + $0x60] sm:$0xff] %v5160_v28  ;;  %v5011_v8 = vadd.f32 %v6126_v27, %v8784_v62  ;;  %v8793_v62 = vld [vmem:[#allocation48_spill] sm:$0xff] }
 0x5e6   : > { %v4780_v18 = vpop.f32.mrb[62].mxu1 }
 0x5e7   : > { %v5161_v31 = vadd.f32 %v5127_v21, %v5011_v8  ;;  %v6127_v9 = vadd.f32 %v8453_v43, %v4780_v18  ;;  %v4782_v10 = vpop.f32.mrb[63].mxu1  ;;  %v5136_v21 = vld [vmem:[%s7132_s23 + $0xb0] sm:$0xff] }
 0x5e9   : > { %5195 = vst [vmem:[%s8462_s17 + $0x68] sm:$0xff] %v5161_v31  ;;  %v5016_v13 = vadd.f32 %v6127_v9, %v8785_v56  ;;  %v8794_v56 = vld [vmem:[#allocation47_spill] sm:$0xff] }
 0x5ea   : > { %v4785_v26 = vpop.f32.mrb[64].mxu1 }
 0x5eb   : > { %v5162_v53 = vadd.f32 %v5128_v61, %v5016_v13  ;;  %v6128_v4 = vadd.f32 %v8453_v43, %v4785_v26  ;;  %v4787_v0 = vpop.f32.mrb[65].mxu1  ;;  %v5137_v61 = vld [vmem:[%s7132_s23 + $0xb8] sm:$0xff] }
 0x5ed   : > { %5196 = vst [vmem:[%s8462_s17 + $0x70] sm:$0xff] %v5162_v53  ;;  %v5021_v41 = vadd.f32 %v6128_v4, %v8786_v16  ;;  %v8795_v16 = vld [vmem:[#allocation50_spill] sm:$0xff] }
 0x5ee   : > { %v4790_v22 = vpop.f32.mrb[66].mxu1 }
 0x5ef   : > { %v5163_v44 = vadd.f32 %v5129_v35, %v5021_v41  ;;  %v6129_v54 = vadd.f32 %v8453_v43, %v4790_v22  ;;  %v4792_v5 = vpop.f32.mrb[67].mxu1  ;;  %v5138_v35 = vld [vmem:[%s7132_s23 + $0xc0] sm:$0xff] }
 0x5f1   : > { %5197 = vst [vmem:[%s8462_s17 + $0x78] sm:$0xff] %v5163_v44  ;;  %v5026_v36 = vadd.f32 %v6129_v54, %v8787_v2  ;;  %v8796_v2 = vld [vmem:[#allocation49_spill] sm:$0xff] }
 0x5f2   : > { %v4795_v19 = vpop.f32.mrb[68].mxu1 }
 0x5f3   : > { %v5164_v58 = vadd.f32 %v5130_v15, %v5026_v36  ;;  %v6130_v37 = vadd.f32 %v8453_v43, %v4795_v19  ;;  %v4797_v45 = vpop.f32.mrb[69].mxu1  ;;  %v5139_v15 = vld [vmem:[%s7132_s23 + $0xc8] sm:$0xff] }
 0x5f5   : > { %5198 = vst [vmem:[%s8462_s17 + $0x80] sm:$0xff] %v5164_v58  ;;  %v5031_v39 = vadd.f32 %v6130_v37, %v8788_v20 }
 0x5f6   : > { %v4800_v57 = vpop.f32.mrb[70].mxu1 }
 0x5f7   : > { %v5165_v17 = vadd.f32 %v5131_v55, %v5031_v39  ;;  %v6131_v12 = vadd.f32 %v8453_v43, %v4800_v57  ;;  %v4802_v29 = vpop.f32.mrb[71].mxu1 }
 0x5f9   : > { %5199 = vst [vmem:[%s8462_s17 + $0x88] sm:$0xff] %v5165_v17  ;;  %v5036_v32 = vadd.f32 %v6131_v12, %v8789_v6 }
 0x5fa   : > { %v4805_v1 = vpop.f32.mrb[72].mxu1 }
 0x5fb   : > { %v5166_v46 = vadd.f32 %v5132_v14, %v5036_v32  ;;  %v6132_v38 = vadd.f32 %v8453_v43, %v4805_v1  ;;  %v4807_v11 = vpop.f32.mrb[73].mxu1 }
 0x5fd   : > { %5200 = vst [vmem:[%s8462_s17 + $0x90] sm:$0xff] %v5166_v46  ;;  %v5041_v51 = vadd.f32 %v6132_v38, %v8790_v49 }
 0x5fe   : > { %v4810_v48 = vpop.f32.mrb[74].mxu1 }
 0x5ff   : > { %v5167_v42 = vadd.f32 %v5133_v59, %v5041_v51  ;;  %v6133_v3 = vadd.f32 %v8453_v43, %v4810_v48  ;;  %v4812_v52 = vpop.f32.mrb[75].mxu1  ;;  %v5141_v51 = vld [vmem:[%s7132_s23 + $0xd8] sm:$0xff] }
 0x601   : > { %5201 = vst [vmem:[%s8462_s17 + $0x98] sm:$0xff] %v5167_v42  ;;  %v5046_v60 = vadd.f32 %v6133_v3, %v8791_v23  ;;  %v5140_v3 = vld [vmem:[%s7132_s23 + $0xd0] sm:$0xff] }
 0x602   : > { %v4815_v7 = vpop.f32.mrb[76].mxu1 }
 0x603   : > { %v5168_v24 = vadd.f32 %v5134_v30, %v5046_v60  ;;  %v6134_v33 = vadd.f32 %v8453_v43, %v4815_v7  ;;  %v4817_v40 = vpop.f32.mrb[77].mxu1 }
 0x605   : > { %5202 = vst [vmem:[%s8462_s17 + $0xa0] sm:$0xff] %v5168_v24  ;;  %v5051_v34 = vadd.f32 %v6134_v33, %v8792_v50  ;;  %v5143_v33 = vld [vmem:[%s7132_s23 + $0xe8] sm:$0xff]  ;;  %v5142_v50 = vld [vmem:[%s7132_s23 + $0xe0] sm:$0xff] }
 0x606   : > { %v4820_v63 = vpop.f32.mrb[78].mxu1 }
 0x607   : > { %v5169_v28 = vadd.f32 %v5135_v25, %v5051_v34  ;;  %v6135_v27 = vadd.f32 %v8453_v43, %v4820_v63  ;;  %v4822_v47 = vpop.f32.mrb[79].mxu1 }
 0x609   : > { %5203 = vst [vmem:[%s8462_s17 + $0xa8] sm:$0xff] %v5169_v28  ;;  %v5056_v8 = vadd.f32 %v6135_v27, %v8793_v62  ;;  %v5145_v62 = vld [vmem:[%s7132_s23 + $0xf8] sm:$0xff] }
 0x60a   : > { %v4825_v18 = vpop.f32.mrb[80].mxu1 }
 0x60b   : > { %v5170_v31 = vadd.f32 %v5136_v21, %v5056_v8  ;;  %v6136_v9 = vadd.f32 %v8453_v43, %v4825_v18  ;;  %v4827_v10 = vpop.f32.mrb[81].mxu1 }
 0x60d   : > { %5204 = vst [vmem:[%s8462_s17 + $0xb0] sm:$0xff] %v5170_v31  ;;  %v5061_v13 = vadd.f32 %v6136_v9, %v8794_v56  ;;  %v5144_v31 = vld [vmem:[%s7132_s23 + $0xf0] sm:$0xff] }
 0x60e   : > { %v4830_v26 = vpop.f32.mrb[82].mxu1 }
 0x60f   : > { %v5171_v53 = vadd.f32 %v5137_v61, %v5061_v13  ;;  %v6137_v4 = vadd.f32 %v8453_v43, %v4830_v26  ;;  %v4832_v0 = vpop.f32.mrb[83].mxu1 }
 0x611   : > { %5205 = vst [vmem:[%s8462_s17 + $0xb8] sm:$0xff] %v5171_v53  ;;  %v5066_v41 = vadd.f32 %v6137_v4, %v8795_v16  ;;  %v5147_v53 = vld [vmem:[%s7132_s23 + $0x108] sm:$0xff] }
 0x612   : > { %v4835_v22 = vpop.f32.mrb[84].mxu1 }
 0x613   : > { %v5172_v44 = vadd.f32 %v5138_v35, %v5066_v41  ;;  %v6138_v54 = vadd.f32 %v8453_v43, %v4835_v22  ;;  %v4837_v5 = vpop.f32.mrb[85].mxu1  ;;  %v5146_v35 = vld [vmem:[%s7132_s23 + $0x100] sm:$0xff]  ;;  %s6878_s23 = smov [#allocation12]  }
 0x614   : > { %s6798_s12 = sshll.u32 %s6878_s23, 4  ;;  %s6799_s12 = int_to_ptr.vmem [resolvable:$false] %s6798_s12 }
 0x615   : > { %5206 = vst [vmem:[%s8462_s17 + $0xc0] sm:$0xff] %v5172_v44  ;;  %v5071_v36 = vadd.f32 %v6138_v54, %v8796_v2  ;;  %s6800_s20 = scalar_lea.vmem %s6799_s12, 8704  ;;  %p6801_p12 = scmp.lt.s32.totalorder %s8592_s10, %s6799_s12 }
 0x616   : > { %v4840_v19 = vpop.f32.mrb[86].mxu1  ;;  %p6802_p1 = scmp.lt.s32.totalorder %s6800_s20, %s6794_s8 }
 0x617   : > { %v5173_v58 = vadd.f32 %v5139_v15, %v5071_v36  ;;  %v4842_v37 = vpop.f32.mrb[87].mxu1  ;;  %v6139_v59 = vadd.f32 %v8453_v43, %v4840_v19 }
 0x618   : > { %p6803_p2 = por %p6802_p1, %p6801_p12 }
 0x619   : > { %5207 = vst [vmem:[%s8462_s17 + $0xc8] sm:$0xff] %v5173_v58 }
 0x61a   : > { %v4845_v45 = vpop.f32.mrb[88].mxu1  ;;  %p6804_p4 = pnand %p6803_p2, %p6797_p7 }
 0x61b   : > { %v4847_v55 = vpop.f32.mrb[89].mxu1  ;;  %v6140_v11 = vadd.f32 %v8453_v43, %v4845_v45 }
 0x61e   : > { %v4850_v20 = vpop.f32.mrb[90].mxu1 }
 0x61f   : > { %v4852_v39 = vpop.f32.mrb[91].mxu1  ;;  %v6141_v60 = vadd.f32 %v8453_v43, %v4850_v20 }
 0x622   : > { %v4855_v57 = vpop.f32.mrb[92].mxu1 }
 0x623   : > { %v4857_v17 = vpop.f32.mrb[93].mxu1  ;;  %v6142_v30 = vadd.f32 %v8453_v43, %v4855_v57 }
 0x626   : > { %v4860_v12 = vpop.f32.mrb[94].mxu1 }
 0x627   : > { %v4862_v29 = vpop.f32.mrb[95].mxu1  ;;  %v6143_v27 = vadd.f32 %v8453_v43, %v4860_v12 }
 0x62a   : > { %v4865_v14 = vpop.f32.mrb[96].mxu1 }
 0x62b   : > { %v4867_v6 = vpop.f32.mrb[97].mxu1  ;;  %v6144_v63 = vadd.f32 %v8453_v43, %v4865_v14 }
 0x62e   : > { %v4870_v32 = vpop.f32.mrb[98].mxu1 }
 0x62f   : > { %v4872_v1 = vpop.f32.mrb[99].mxu1  ;;  %v6145_v56 = vadd.f32 %v8453_v43, %v4870_v32 }
 0x632   : > { %v4875_v46 = vpop.f32.mrb[100].mxu1 }
 0x633   : > { %v4877_v38 = vpop.f32.mrb[101].mxu1  ;;  %v6146_v10 = vadd.f32 %v8453_v43, %v4875_v46 }
 0x636   : > { %v5605_v49 = vpop.f32.mrb[102].mxu1 }
 0x637   : > { %v5081_v48 = vadd.f32 %v6140_v11, %v5605_v49  ;;  %v5075_v42 = vpop.f32.mrb[103].mxu1 }
 0x638   : > { %v5076_v52 = vadd.f32 %v6139_v59, %v5075_v42 }
 0x639   : > { %v5175_v23 = vadd.f32 %v5141_v51, %v5081_v48 }
 0x63a   : > { %v5174_v7 = vadd.f32 %v5140_v3, %v5076_v52  ;;  %v5608_v24 = vpop.f32.mrb[104].mxu1 }
 0x63b   : > { %5209 = vst [vmem:[%s8462_s17 + $0xd8] sm:$0xff] %v5175_v23  ;;  %v5091_v40 = vadd.f32 %v6142_v30, %v5608_v24  ;;  %v5085_v25 = vpop.f32.mrb[105].mxu1 }
 0x63c   : > { %5208 = vst [vmem:[%s8462_s17 + $0xd0] sm:$0xff] %v5174_v7  ;;  %v5086_v34 = vadd.f32 %v6141_v60, %v5085_v25 }
 0x63d   : > { %v5177_v28 = vadd.f32 %v5143_v33, %v5091_v40 }
 0x63e   : > { %v5176_v47 = vadd.f32 %v5142_v50, %v5086_v34  ;;  %v5611_v21 = vpop.f32.mrb[106].mxu1 }
 0x63f   : > { %5211 = vst [vmem:[%s8462_s17 + $0xe8] sm:$0xff] %v5177_v28  ;;  %v5101_v8 = vadd.f32 %v6144_v63, %v5611_v21  ;;  %v5095_v18 = vpop.f32.mrb[107].mxu1 }
 0x640   : > { %5210 = vst [vmem:[%s8462_s17 + $0xe0] sm:$0xff] %v5176_v47  ;;  %v5096_v9 = vadd.f32 %v6143_v27, %v5095_v18 }
 0x641   : > { %v5179_v61 = vadd.f32 %v5145_v62, %v5101_v8 }
 0x642   : > { %v5178_v13 = vadd.f32 %v5144_v31, %v5096_v9  ;;  %v5614_v26 = vpop.f32.mrb[108].mxu1 }
 0x643   : > { %5213 = vst [vmem:[%s8462_s17 + $0xf8] sm:$0xff] %v5179_v61  ;;  %v5111_v4 = vadd.f32 %v6146_v10, %v5614_v26  ;;  %v5105_v0 = vpop.f32.mrb[109].mxu1 }
 0x644   : > { %5212 = vst [vmem:[%s8462_s17 + $0xf0] sm:$0xff] %v5178_v13  ;;  %v5106_v16 = vadd.f32 %v6145_v56, %v5105_v0 }
 0x645   : > { %v5181_v41 = vadd.f32 %v5147_v53, %v5111_v4 }
 0x646   : > { %v5180_v43 = vadd.f32 %v5146_v35, %v5106_v16 }
 0x647   : > { %5215 = vst [vmem:[%s8462_s17 + $0x108] sm:$0xff] %v5181_v41 }
 0x648   : > { %5214 = vst [vmem:[%s8462_s17 + $0x100] sm:$0xff] %v5180_v43 }
 0x649   : > { %6807 = shalt.err (!%p6804_p4)
}
 0x64a   : > { %s6808_s16 = scalar_lea.hbm %s8590_s28, 4352  ;;  %s6812_s15 = scalar_lea.hbm %s8645_s7, 8704 }
 0x64b   : > { %p6809_p9 = scmp.ne.s32.totalorder %s8590_s28, %s6808_s16  ;;  %p6813_p8 = scmp.lt.u32.totalorder %s8590_s28, %s8645_s7 }
 0x64c   : > { %p6814_p13 = scmp.lt.u32.totalorder %s6812_s15, %s6808_s16  ;;  %p6816_p10 = scmp.lt.u32.totalorder %s6808_s16, %s8590_s28 }
 0x64d   : > { %p6810_p0 = pnand %p6809_p9, %p7075_p5 }
 0x64e   : > { %p6815_p6 = por %p6814_p13, %p6813_p8 }
 0x64f   : > { %p6811_p11 = pneg %p6810_p0 }
 0x650   : > { %p6817_p3 = por %p6816_p10, %p6815_p6 }
 0x652   : > { %p6818_p7 = pnand %p6817_p3, %p6811_p11 }
 0x654   : > { %6821 = shalt.err (!%p6818_p7)
}
 0x655   : > { %s6879_s30 = smov 128   ;;  %s6880_s9 = smov 8  }
 0x656   : > { %6573 = dma.vmem_to_hbm [thread:$0]  (%p7075_p5), %s8592_s10, 4352, %s8590_s28, %s5217_s11, %s6879_s30, %s6879_s30, %s6880_s9  }
 0x657 PF: > { %s8797_s8 = sld [smem:[#allocation17_spill]]  ;;  %s5245_s23 = sand.u32 1, %s6856_s24  }
 0x658   : > { %p8799_p1 = scmp.ge.s32.totalorder %s6868_s27, 2  ;;  %s5246_s12 = scalar_lea.sflag [#allocation6], %s5245_s23 }
 0x65d   : > { %p8798_p12 = scmp.ne.s32.totalorder %s8797_s8, 0 }
 0x65f   : > { %p6590_p2 = pnand %p8799_p1, %p8798_p12 }
 0x661   : > { %6851 = dma.done.wait (!%p6590_p2), %s5246_s12, 4352  }
 0x662   : > { %6853 = vsyncadd (!%p6590_p2), %s5246_s12, 4294962944  ;;  %p22_p4 = scmp.ge.s32.totalorder %s7061_s22, 4   ;;  %s8800_s24 = smov %s6860_s25 }
 0x663   : > { %s8801_s25 = smov %s6864_s26  ;;  %s8802_s26 = smov %s7071_s18 }
 0x664   : > { %s8803_s27 = smov %s7061_s22  ;;  %24 = sbr.rel (!%p22_p4) target bundleno = 7 (0x7), region = 105 }
 0x66b   :  { %5251 = vsyncpa [#allocation5], 1 }
 0x66c   :  { %5253 = vsyncpa [#allocation5 + $0x1], 1 }
 0x66d   :  { %5254 = vsyncpa [#allocation8], 1 }
 0x66e   :  { %5255 = vsyncpa [#allocation11], 1 }
 0x66f   :  { %5256 = vsyncpa [#allocation6], 1 }
 0x670   :  { %5258 = vsyncpa [#allocation6 + $0x1], 1 }

</bundles_post_ra>
